<compile_context>
chip_gen: v7x
topology: tpu7x:2x2x1
jax: 0.10.0
libtpu: 0.0.40
codegen_flags: <defaults>
</compile_context>

<pallas_src>
import functools

import jax
import jax.numpy as jnp
from jax.experimental import pallas as pl
from jax.experimental.pallas import tpu as pltpu

C_FEAT = 64   # encoder feature channels (conv1o1 kernels are [vc_num, 64, 1, 1])
LANE = 128    # TPU lane width


def _round_up(n, m):
    return ((n + m - 1) // m) * m


# --------------------------------------------------------------------------- #
# Fully fused CompCSD forward kernel (per tile of P rows).  Single packed output.
# --------------------------------------------------------------------------- #
def compcsd_fused_kernel(
    x_ref,                                   # (tile_p, cin)            f32
    wn_t_ref,                                # (64, OUT)   bf16  L2-normed kernels^T, cols placed at off_nvmf
    wcat_ref,                                # (OUT, 128)  bf16  [raw kernels | seg_w1], rows placed at off_nvmf
    ew1_ref, eb1_ref,                        # (cin, 64) f32, (1, 64) f32
    ew2_ref, eb2_ref,                        # (64, OUT) bf16 (cols 0:64 real), (1, OUT) f32
    dw1_ref, db1_ref,                        # (64, 64) bf16, (1, 64) f32
    dw2_ref, db2row_ref,                     # (cimg, 64) f32  (or (64, OUT) bf16), (1, OUT) f32 placed
    sb1_ref,                                 # (1, 64) f32
    sw2_ref, sb2_ref,                        # (64, OUT) bf16 placed at off_seg, (1, OUT) f32 placed
    out_ref,                                 # (tile_p, OUT) f32 packed slab
    *, kappa, cimg, vc_num, num_classes, off_rec, off_nvmf, off_seg, vpu_rec,
):
    f32, bf16 = jnp.float32, jnp.bfloat16
    out_cols = out_ref.shape[-1]
    cin = ew1_ref.shape[0]

    x = x_ref[...].astype(f32)
    lane = jax.lax.broadcasted_iota(jnp.int32, (1, out_cols), 1)

    # --- Encoder layer 1 (1x1).  K=cin is degenerate -> VPU outer product when tiny.
    # TODO(synk): real Encoder is a UNet2D; approximated with a 1x1-conv stack + ReLU.
    eb1 = eb1_ref[...]
    if cin <= 8:
        ew1 = ew1_ref[...]
        h = eb1
        for c in range(cin):
            h = h + x[:, c:c + 1] * ew1[c:c + 1, :]
    else:
        h = jnp.dot(x.astype(bf16), ew1_ref[...].astype(bf16),
                    preferred_element_type=f32) + eb1
    h = jnp.maximum(h, 0.0)

    # --- Encoder layer 2: weight column-padded so features land in slab lanes [0:64).
    feat_slab = jnp.maximum(
        jnp.dot(h.astype(bf16), ew2_ref[...], preferred_element_type=f32) + eb2_ref[...], 0.0)
    feat = feat_slab[:, :C_FEAT]

    # --- Conv1o1Layer: cosine 1x1 conv.  Features L2-normalized per pixel (zero-norm
    #     guard as in torch); kernels L2-normalized once in the wrapper and their
    #     columns placed at [off_nvmf : off_nvmf+vc_num) so vMF lanes are pre-placed.
    ssq = jnp.sum(feat * feat, axis=-1, keepdims=True)
    inv_norm = jax.lax.rsqrt(jnp.where(ssq == 0.0, 1.0, ssq))
    xn = (feat * inv_norm).astype(bf16)
    vc = jnp.dot(xn, wn_t_ref[...], preferred_element_type=f32)          # (tile_p, OUT)

    # --- ActivationLayer (vMF): exp(kappa*x) * (x > 0); non-placed lanes stay 0.
    vmf = jnp.exp(kappa * vc) * (vc > 0.0).astype(f32)

    # --- per-pixel L1 normalization over the VC axis (F.normalize p=1), exact divide.
    l1 = jnp.sum(vmf, axis=-1, keepdims=True)
    nvmf = vmf / jnp.maximum(l1, 1e-12)                                  # zeros outside vc lanes

    # --- Fused compose() | segmentor-layer-1 matmul (shared nvmf LHS, N=128).
    cs = jnp.dot(nvmf.astype(bf16), wcat_ref[...], preferred_element_type=f32)
    comp = cs[:, :C_FEAT]
    s = jnp.maximum(cs[:, C_FEAT:2 * C_FEAT] + sb1_ref[...], 0.0)

    # --- Decoder -> reconstruction.
    # TODO(synk): real Decoder architecture not in the provided module; approximated with 1x1 convs.
    d = jnp.maximum(
        jnp.dot(comp.astype(bf16), dw1_ref[...], preferred_element_type=f32) + db1_ref[...], 0.0)

    slab = feat_slab + nvmf + db2row_ref[...]
    if vpu_rec:
        # N=cimg degenerate matmul -> VPU multiply + lane reduce, placed via one-hot lanes.
        dw2 = dw2_ref[...]
        for c in range(cimg):
            rec_c = jnp.sum(d * dw2[c:c + 1, :], axis=-1, keepdims=True)
            slab = slab + rec_c * (lane == off_rec + c).astype(f32)
    else:
        # dw2 already column-placed at [off_rec : off_rec+cimg) in the wrapper.
        slab = slab + jnp.dot(d.astype(bf16), dw2_ref[...], preferred_element_type=f32)

    # --- Segmentor head + masked (lane-placed) softmax with exact divide.
    # TODO(synk): real Segmentor uses 3x3 convs + BatchNorm; approximated with 1x1 convs + softmax.
    logits = jnp.dot(s.astype(bf16), sw2_ref[...], preferred_element_type=f32) + sb2_ref[...]
    seg_mask = (lane >= off_seg) & (lane < off_seg + num_classes)
    masked = jnp.where(seg_mask, logits, -1e30)
    m = jnp.max(masked, axis=-1, keepdims=True)
    e = jnp.where(seg_mask, jnp.exp(masked - m), 0.0)
    slab = slab + e / jnp.sum(e, axis=-1, keepdims=True)

    out_ref[...] = slab                                                   # single dense 128-wide store


def compcsd_fused(x_rows, weights, *, kappa, cimg, vc_num, num_classes,
                  off_rec, off_nvmf, off_seg, out_cols, vpu_rec, tile_p):
    P, cin = x_rows.shape
    assert P % tile_p == 0
    grid = (P // tile_p,)

    def const(a):
        return pl.BlockSpec(a.shape, lambda i: (0, 0))

    in_specs = [pl.BlockSpec((tile_p, cin), lambda i: (i, 0))] + [const(w) for w in weights]
    out_spec = pl.BlockSpec((tile_p, out_cols), lambda i: (i, 0))

    kern = functools.partial(
        compcsd_fused_kernel, kappa=kappa, cimg=cimg, vc_num=vc_num,
        num_classes=num_classes, off_rec=off_rec, off_nvmf=off_nvmf,
        off_seg=off_seg, vpu_rec=vpu_rec)

    return pl.pallas_call(
        kern,
        out_shape=jax.ShapeDtypeStruct((P, out_cols), jnp.float32),
        grid=grid,
        in_specs=in_specs,
        out_specs=out_spec,
        compiler_params=pltpu.CompilerParams(
            dimension_semantics=("parallel",),
            vmem_limit_bytes=32 * 1024 * 1024),
    )(x_rows, *weights)


# --------------------------------------------------------------------------- #
# Parameter init (xavier-normal, deterministic), weight prep, and full forward
# --------------------------------------------------------------------------- #
def xavier_mat(key, cin, cout):
    std = (2.0 / (cin + cout)) ** 0.5
    return std * jax.random.normal(key, (cin, cout), dtype=jnp.float32)


def init_params(key, image_channels, vc_num, num_classes):
    ks = jax.random.split(key, 8)
    p = {}
    # Conv1o1 vMF kernels, shape [vc_num, 64, 1, 1] (xavier_normal_, as in get_xavier_kernels)
    std = (2.0 / (C_FEAT + vc_num)) ** 0.5
    p["conv1o1_w"] = std * jax.random.normal(ks[0], (vc_num, C_FEAT, 1, 1), dtype=jnp.float32)
    p["enc_w1"], p["enc_b1"] = xavier_mat(ks[1], image_channels, C_FEAT), jnp.zeros((C_FEAT,), jnp.float32)
    p["enc_w2"], p["enc_b2"] = xavier_mat(ks[2], C_FEAT, C_FEAT), jnp.zeros((C_FEAT,), jnp.float32)
    p["dec_w1"], p["dec_b1"] = xavier_mat(ks[3], C_FEAT, C_FEAT), jnp.zeros((C_FEAT,), jnp.float32)
    p["dec_w2"], p["dec_b2"] = xavier_mat(ks[4], C_FEAT, image_channels), jnp.zeros((image_channels,), jnp.float32)
    p["seg_w1"], p["seg_b1"] = xavier_mat(ks[5], vc_num, C_FEAT), jnp.zeros((C_FEAT,), jnp.float32)
    p["seg_w2"], p["seg_b2"] = xavier_mat(ks[6], C_FEAT, num_classes), jnp.zeros((num_classes,), jnp.float32)
    return p


def _prep_weights(params, cimg, vc_num, num_classes, out_cols, off_rec, off_nvmf, off_seg):
    """One-time weight prep: lane placement into the packed-output layout,
    hoisted L2 normalization of the vMF kernels, bf16 cast of MXU operands."""
    f32, bf16 = jnp.float32, jnp.bfloat16
    k2d = params["conv1o1_w"].reshape(vc_num, C_FEAT).astype(f32)

    # cosine-conv kernels: L2-normalize rows once; place columns at [off_nvmf, off_nvmf+vc_num)
    wnorm = jnp.sqrt(jnp.sum(k2d * k2d, axis=-1, keepdims=True))
    wnorm = jnp.where(wnorm == 0.0, 1.0, wnorm)
    wn = k2d / wnorm
    wn_t = jnp.zeros((C_FEAT, out_cols), f32).at[:, off_nvmf:off_nvmf + vc_num].set(wn.T).astype(bf16)

    # fused [compose | segmentor-layer-1] weight, rows placed at off_nvmf
    wcat = jnp.zeros((out_cols, 2 * C_FEAT), f32)
    wcat = wcat.at[off_nvmf:off_nvmf + vc_num, :C_FEAT].set(k2d)                 # raw kernels
    wcat = wcat.at[off_nvmf:off_nvmf + vc_num, C_FEAT:].set(params["seg_w1"])    # seg layer 1
    wcat = wcat.astype(bf16)

    ew2 = jnp.zeros((C_FEAT, out_cols), f32).at[:, :C_FEAT].set(params["enc_w2"]).astype(bf16)
    eb2 = jnp.zeros((1, out_cols), f32).at[:, :C_FEAT].set(params["enc_b2"][None, :])

    sw2 = jnp.zeros((C_FEAT, out_cols), f32).at[:, off_seg:off_seg + num_classes].set(params["seg_w2"]).astype(bf16)
    sb2 = jnp.zeros((1, out_cols), f32).at[:, off_seg:off_seg + num_classes].set(params["seg_b2"][None, :])

    db2row = jnp.zeros((1, out_cols), f32).at[:, off_rec:off_rec + cimg].set(params["dec_b2"][None, :])

    vpu_rec = cimg <= 8
    if vpu_rec:
        dw2 = params["dec_w2"].T.astype(f32)                                      # (cimg, 64)
    else:
        dw2 = jnp.zeros((C_FEAT, out_cols), f32).at[:, off_rec:off_rec + cimg].set(params["dec_w2"]).astype(bf16)

    row = lambda b: b.reshape(1, -1).astype(f32)
    weights = (
        wn_t, wcat,
        params["enc_w1"].astype(f32), row(params["enc_b1"]),
        ew2, eb2,
        params["dec_w1"].astype(bf16), row(params["dec_b1"]),
        dw2, db2row,
        row(params["seg_b1"]),
        sw2, sb2,
    )
    return weights, vpu_rec


def compcsd_forward(params, x_nchw, *, vmf_kappa, tile_p=2048):
    N, cimg, H, W = x_nchw.shape
    vc_num = params["conv1o1_w"].shape[0]
    num_classes = params["seg_w2"].shape[1]

    # packed-output column layout: [feat(64) | rec(cimg) | nvmf(vc_num) | seg(num_classes) | pad]
    off_rec = C_FEAT
    off_nvmf = off_rec + cimg
    off_seg = off_nvmf + vc_num
    out_cols = max(LANE, _round_up(off_seg + num_classes, LANE))

    P = N * H * W
    # tile: multiple of 8 sublanes, capped by P, and capped so the grid has >= 2
    # steps when possible (v7x has two TensorCores to shard the "parallel" axis).
    tile_p = max(8, min(_round_up(tile_p, 8), _round_up(P, 8)))
    if P > 8:
        tile_p = min(tile_p, max(8, _round_up(pl.cdiv(P, 2), 8)))
    P_pad = _round_up(P, tile_p)

    # NCHW -> rows (NHWC flattened); channels land on the lane axis.
    x_rows = jnp.transpose(x_nchw, (0, 2, 3, 1)).reshape(P, cimg).astype(jnp.float32)
    if P_pad != P:
        x_rows = jnp.pad(x_rows, ((0, P_pad - P), (0, 0)))

    weights, vpu_rec = _prep_weights(params, cimg, vc_num, num_classes,
                                     out_cols, off_rec, off_nvmf, off_seg)
    slab = compcsd_fused(
        x_rows, weights, kappa=vmf_kappa, cimg=cimg, vc_num=vc_num,
        num_classes=num_classes, off_rec=off_rec, off_nvmf=off_nvmf,
        off_seg=off_seg, out_cols=out_cols, vpu_rec=vpu_rec, tile_p=tile_p)

    def to_nchw(col0, c):
        rows = slab[:P, col0:col0 + c]
        return jnp.transpose(rows.reshape(N, H, W, c), (0, 3, 1, 2))

    rec = to_nchw(off_rec, cimg)              # (N, image_channels, H, W)
    pre_seg = to_nchw(off_seg, num_classes)   # (N, num_classes, H, W) softmax probs
    features = to_nchw(0, C_FEAT)             # (N, 64, H, W)
    norm_vmf = to_nchw(off_nvmf, vc_num)      # (N, vc_num, H, W)
    return rec, pre_seg, features, params["conv1o1_w"], norm_vmf


if __name__ == "__main__":
    # Small, deterministic configuration.
    image_channels = 1
    vc_num = 12
    num_classes = 4
    vmf_kappa = 30.0
    N, H, W = 2, 16, 16

    key = jax.random.PRNGKey(0)
    k_param, k_input = jax.random.split(key)
    params = init_params(k_param, image_channels, vc_num, num_classes)
    x = jax.random.normal(k_input, (N, image_channels, H, W), dtype=jnp.float32)

    rec, pre_seg, features, kernels, norm_vmf = compcsd_forward(params, x, vmf_kappa=vmf_kappa)
    jax.block_until_ready((rec, pre_seg, features, kernels, norm_vmf))

    assert rec.shape == (N, image_channels, H, W)
    assert pre_seg.shape == (N, num_classes, H, W)
    assert features.shape == (N, C_FEAT, H, W)
    assert kernels.shape == (vc_num, C_FEAT, 1, 1)
    assert norm_vmf.shape == (N, vc_num, H, W)
    for t in (rec, pre_seg, features, norm_vmf):
        assert bool(jnp.all(jnp.isfinite(t)))
    # segmentation probabilities sum to ~1 per pixel (exact softmax divide)
    assert float(jnp.max(jnp.abs(jnp.sum(pre_seg, axis=1) - 1.0))) < 1e-3
    print("KERNEL_OK")
</pallas_src>

<mosaic_0001>
module attributes {stable_mosaic.version = 11 : i64} {
  func.func @compcsd_fused_kernel(%arg0: i32, %arg1: memref<256x1xf32, #tpu.memory_space<vmem>>, %arg2: memref<64x128xbf16, #tpu.memory_space<vmem>>, %arg3: memref<128x128xbf16, #tpu.memory_space<vmem>>, %arg4: memref<1x64xf32, #tpu.memory_space<vmem>>, %arg5: memref<1x64xf32, #tpu.memory_space<vmem>>, %arg6: memref<64x128xbf16, #tpu.memory_space<vmem>>, %arg7: memref<1x128xf32, #tpu.memory_space<vmem>>, %arg8: memref<64x64xbf16, #tpu.memory_space<vmem>>, %arg9: memref<1x64xf32, #tpu.memory_space<vmem>>, %arg10: memref<1x64xf32, #tpu.memory_space<vmem>>, %arg11: memref<1x128xf32, #tpu.memory_space<vmem>>, %arg12: memref<1x64xf32, #tpu.memory_space<vmem>>, %arg13: memref<64x128xbf16, #tpu.memory_space<vmem>>, %arg14: memref<1x128xf32, #tpu.memory_space<vmem>>, %arg15: memref<256x128xf32, #tpu.memory_space<vmem>>) attributes {dimension_semantics = [#tpu.dimension_semantics<parallel>], iteration_bounds = array<i64: 2>, scalar_prefetch = 0 : i64, scratch_operands = 0 : i64, tpu.core_type = #tpu.core_type<tc>, window_params = [{transform_indices = @transform_0, window_bounds = array<i64: 256, 1>}, {pipeline_mode = #tpu.pipeline_mode<synchronous>, transform_indices = @transform_1, window_bounds = array<i64: 64, 128>}, {pipeline_mode = #tpu.pipeline_mode<synchronous>, transform_indices = @transform_2, window_bounds = array<i64: 128, 128>}, {pipeline_mode = #tpu.pipeline_mode<synchronous>, transform_indices = @transform_3, window_bounds = array<i64: 1, 64>}, {pipeline_mode = #tpu.pipeline_mode<synchronous>, transform_indices = @transform_4, window_bounds = array<i64: 1, 64>}, {pipeline_mode = #tpu.pipeline_mode<synchronous>, transform_indices = @transform_5, window_bounds = array<i64: 64, 128>}, {pipeline_mode = #tpu.pipeline_mode<synchronous>, transform_indices = @transform_6, window_bounds = array<i64: 1, 128>}, {pipeline_mode = #tpu.pipeline_mode<synchronous>, transform_indices = @transform_7, window_bounds = array<i64: 64, 64>}, {pipeline_mode = #tpu.pipeline_mode<synchronous>, transform_indices = @transform_8, window_bounds = array<i64: 1, 64>}, {pipeline_mode = #tpu.pipeline_mode<synchronous>, transform_indices = @transform_9, window_bounds = array<i64: 1, 64>}, {pipeline_mode = #tpu.pipeline_mode<synchronous>, transform_indices = @transform_10, window_bounds = array<i64: 1, 128>}, {pipeline_mode = #tpu.pipeline_mode<synchronous>, transform_indices = @transform_11, window_bounds = array<i64: 1, 64>}, {pipeline_mode = #tpu.pipeline_mode<synchronous>, transform_indices = @transform_12, window_bounds = array<i64: 64, 128>}, {pipeline_mode = #tpu.pipeline_mode<synchronous>, transform_indices = @transform_13, window_bounds = array<i64: 1, 128>}, {transform_indices = @transform_14, window_bounds = array<i64: 256, 128>}]} {
    %c0 = arith.constant 0 : index
    %c0_0 = arith.constant 0 : index
    %0 = vector.load %arg1[%c0, %c0_0] : memref<256x1xf32, #tpu.memory_space<vmem>>, vector<256x1xf32>
    %1 = tpu.iota {dimensions = array<i32: 1>} : vector<1x128xi32>
    %c0_1 = arith.constant 0 : index
    %c0_2 = arith.constant 0 : index
    %2 = vector.load %arg5[%c0_1, %c0_2] : memref<1x64xf32, #tpu.memory_space<vmem>>, vector<1x64xf32>
    %c0_3 = arith.constant 0 : index
    %c0_4 = arith.constant 0 : index
    %3 = vector.load %arg4[%c0_3, %c0_4] : memref<1x64xf32, #tpu.memory_space<vmem>>, vector<1x64xf32>
    %4 = vector.broadcast %0 : vector<256x1xf32> to vector<256x64xf32>
    %5 = vector.broadcast %3 : vector<1x64xf32> to vector<256x64xf32>
    %6 = arith.mulf %4, %5 : vector<256x64xf32>
    %7 = vector.broadcast %2 : vector<1x64xf32> to vector<256x64xf32>
    %8 = arith.addf %7, %6 : vector<256x64xf32>
    %cst = arith.constant 0.000000e+00 : f32
    %9 = vector.broadcast %cst : f32 to vector<256x64xf32>
    %10 = arith.maximumf %8, %9 : vector<256x64xf32>
    %11 = arith.truncf %10 : vector<256x64xf32> to vector<256x64xbf16>
    %c0_5 = arith.constant 0 : index
    %c0_6 = arith.constant 0 : index
    %12 = vector.load %arg6[%c0_5, %c0_6] : memref<64x128xbf16, #tpu.memory_space<vmem>>, vector<64x128xbf16>
    %cst_7 = arith.constant dense<0.000000e+00> : vector<256x128xf32>
    %13 = tpu.matmul %11, %12, %cst_7 {dimension_numbers = #tpu.dot_dimension_numbers<[1], [0], [0], [1], [0, 0, 1, 1], [], []>} : vector<256x64xbf16>, vector<64x128xbf16>, vector<256x128xf32> -> vector<256x128xf32>
    %c0_8 = arith.constant 0 : index
    %c0_9 = arith.constant 0 : index
    %14 = vector.load %arg7[%c0_8, %c0_9] : memref<1x128xf32, #tpu.memory_space<vmem>>, vector<1x128xf32>
    %15 = vector.broadcast %14 : vector<1x128xf32> to vector<256x128xf32>
    %16 = arith.addf %13, %15 : vector<256x128xf32>
    %cst_10 = arith.constant 0.000000e+00 : f32
    %17 = vector.broadcast %cst_10 : f32 to vector<256x128xf32>
    %18 = arith.maximumf %16, %17 : vector<256x128xf32>
    %19 = vector.extract_strided_slice %18 {offsets = [0, 0], sizes = [256, 64], strides = [1, 1]} : vector<256x128xf32> to vector<256x64xf32>
    %20 = arith.mulf %19, %19 : vector<256x64xf32>
    %cst_11 = arith.constant dense<0.000000e+00> : vector<256xf32>
    %21 = vector.multi_reduction <add>, %20, %cst_11 [1] : vector<256x64xf32> to vector<256xf32>
    %22 = vector.shape_cast %21 : vector<256xf32> to vector<256x1xf32>
    %cst_12 = arith.constant 0.000000e+00 : f32
    %23 = vector.broadcast %cst_12 : f32 to vector<256x1xf32>
    %24 = arith.cmpf oeq, %22, %23 : vector<256x1xf32>
    %cst_13 = arith.constant 1.000000e+00 : f32
    %25 = vector.broadcast %cst_13 : f32 to vector<256x1xf32>
    %26 = arith.select %24, %25, %22 : vector<256x1xi1>, vector<256x1xf32>
    %27 = math.rsqrt %26 : vector<256x1xf32>
    %28 = vector.broadcast %27 : vector<256x1xf32> to vector<256x64xf32>
    %29 = arith.mulf %19, %28 : vector<256x64xf32>
    %30 = arith.truncf %29 : vector<256x64xf32> to vector<256x64xbf16>
    %c0_14 = arith.constant 0 : index
    %c0_15 = arith.constant 0 : index
    %31 = vector.load %arg2[%c0_14, %c0_15] : memref<64x128xbf16, #tpu.memory_space<vmem>>, vector<64x128xbf16>
    %cst_16 = arith.constant dense<0.000000e+00> : vector<256x128xf32>
    %32 = tpu.matmul %30, %31, %cst_16 {dimension_numbers = #tpu.dot_dimension_numbers<[1], [0], [0], [1], [0, 0, 1, 1], [], []>} : vector<256x64xbf16>, vector<64x128xbf16>, vector<256x128xf32> -> vector<256x128xf32>
    %cst_17 = arith.constant 3.000000e+01 : f32
    %33 = vector.broadcast %cst_17 : f32 to vector<256x128xf32>
    %34 = arith.mulf %33, %32 : vector<256x128xf32>
    %35 = math.exp %34 : vector<256x128xf32>
    %cst_18 = arith.constant 0.000000e+00 : f32
    %36 = vector.broadcast %cst_18 : f32 to vector<256x128xf32>
    %37 = arith.cmpf ogt, %32, %36 : vector<256x128xf32>
    %38 = arith.extui %37 : vector<256x128xi1> to vector<256x128xi32>
    %39 = arith.sitofp %38 : vector<256x128xi32> to vector<256x128xf32>
    %40 = arith.mulf %35, %39 : vector<256x128xf32>
    %cst_19 = arith.constant dense<0.000000e+00> : vector<256xf32>
    %41 = vector.multi_reduction <add>, %40, %cst_19 [1] : vector<256x128xf32> to vector<256xf32>
    %42 = vector.shape_cast %41 : vector<256xf32> to vector<256x1xf32>
    %cst_20 = arith.constant 9.99999996E-13 : f32
    %43 = vector.broadcast %cst_20 : f32 to vector<256x1xf32>
    %44 = arith.maximumf %42, %43 : vector<256x1xf32>
    %45 = vector.broadcast %44 : vector<256x1xf32> to vector<256x128xf32>
    %46 = arith.divf %40, %45 : vector<256x128xf32>
    %47 = arith.truncf %46 : vector<256x128xf32> to vector<256x128xbf16>
    %c0_21 = arith.constant 0 : index
    %c0_22 = arith.constant 0 : index
    %48 = vector.load %arg3[%c0_21, %c0_22] : memref<128x128xbf16, #tpu.memory_space<vmem>>, vector<128x128xbf16>
    %cst_23 = arith.constant dense<0.000000e+00> : vector<256x128xf32>
    %49 = tpu.matmul %47, %48, %cst_23 {dimension_numbers = #tpu.dot_dimension_numbers<[1], [0], [0], [1], [0, 0, 1, 1], [], []>} : vector<256x128xbf16>, vector<128x128xbf16>, vector<256x128xf32> -> vector<256x128xf32>
    %50 = vector.extract_strided_slice %49 {offsets = [0, 0], sizes = [256, 64], strides = [1, 1]} : vector<256x128xf32> to vector<256x64xf32>
    %51 = vector.extract_strided_slice %49 {offsets = [0, 64], sizes = [256, 64], strides = [1, 1]} : vector<256x128xf32> to vector<256x64xf32>
    %c0_24 = arith.constant 0 : index
    %c0_25 = arith.constant 0 : index
    %52 = vector.load %arg12[%c0_24, %c0_25] : memref<1x64xf32, #tpu.memory_space<vmem>>, vector<1x64xf32>
    %53 = vector.broadcast %52 : vector<1x64xf32> to vector<256x64xf32>
    %54 = arith.addf %51, %53 : vector<256x64xf32>
    %cst_26 = arith.constant 0.000000e+00 : f32
    %55 = vector.broadcast %cst_26 : f32 to vector<256x64xf32>
    %56 = arith.maximumf %54, %55 : vector<256x64xf32>
    %57 = arith.truncf %50 : vector<256x64xf32> to vector<256x64xbf16>
    %c0_27 = arith.constant 0 : index
    %c0_28 = arith.constant 0 : index
    %58 = vector.load %arg8[%c0_27, %c0_28] : memref<64x64xbf16, #tpu.memory_space<vmem>>, vector<64x64xbf16>
    %cst_29 = arith.constant dense<0.000000e+00> : vector<256x64xf32>
    %59 = tpu.matmul %57, %58, %cst_29 {dimension_numbers = #tpu.dot_dimension_numbers<[1], [0], [0], [1], [0, 0, 1, 1], [], []>} : vector<256x64xbf16>, vector<64x64xbf16>, vector<256x64xf32> -> vector<256x64xf32>
    %c0_30 = arith.constant 0 : index
    %c0_31 = arith.constant 0 : index
    %60 = vector.load %arg9[%c0_30, %c0_31] : memref<1x64xf32, #tpu.memory_space<vmem>>, vector<1x64xf32>
    %61 = vector.broadcast %60 : vector<1x64xf32> to vector<256x64xf32>
    %62 = arith.addf %59, %61 : vector<256x64xf32>
    %cst_32 = arith.constant 0.000000e+00 : f32
    %63 = vector.broadcast %cst_32 : f32 to vector<256x64xf32>
    %64 = arith.maximumf %62, %63 : vector<256x64xf32>
    %65 = arith.addf %18, %46 : vector<256x128xf32>
    %c0_33 = arith.constant 0 : index
    %c0_34 = arith.constant 0 : index
    %66 = vector.load %arg11[%c0_33, %c0_34] : memref<1x128xf32, #tpu.memory_space<vmem>>, vector<1x128xf32>
    %67 = vector.broadcast %66 : vector<1x128xf32> to vector<256x128xf32>
    %68 = arith.addf %65, %67 : vector<256x128xf32>
    %c0_35 = arith.constant 0 : index
    %c0_36 = arith.constant 0 : index
    %69 = vector.load %arg10[%c0_35, %c0_36] : memref<1x64xf32, #tpu.memory_space<vmem>>, vector<1x64xf32>
    %70 = vector.broadcast %69 : vector<1x64xf32> to vector<256x64xf32>
    %71 = arith.mulf %64, %70 : vector<256x64xf32>
    %cst_37 = arith.constant dense<0.000000e+00> : vector<256xf32>
    %72 = vector.multi_reduction <add>, %71, %cst_37 [1] : vector<256x64xf32> to vector<256xf32>
    %73 = vector.shape_cast %72 : vector<256xf32> to vector<256x1xf32>
    %c64_i32 = arith.constant 64 : i32
    %74 = vector.broadcast %c64_i32 : i32 to vector<1x128xi32>
    %75 = arith.cmpi eq, %1, %74 : vector<1x128xi32>
    %76 = arith.extui %75 : vector<1x128xi1> to vector<1x128xi32>
    %77 = arith.sitofp %76 : vector<1x128xi32> to vector<1x128xf32>
    %78 = vector.broadcast %73 : vector<256x1xf32> to vector<256x128xf32>
    %79 = vector.broadcast %77 : vector<1x128xf32> to vector<256x128xf32>
    %80 = arith.mulf %78, %79 : vector<256x128xf32>
    %81 = arith.addf %68, %80 : vector<256x128xf32>
    %82 = arith.truncf %56 : vector<256x64xf32> to vector<256x64xbf16>
    %c0_38 = arith.constant 0 : index
    %c0_39 = arith.constant 0 : index
    %83 = vector.load %arg13[%c0_38, %c0_39] : memref<64x128xbf16, #tpu.memory_space<vmem>>, vector<64x128xbf16>
    %cst_40 = arith.constant dense<0.000000e+00> : vector<256x128xf32>
    %84 = tpu.matmul %82, %83, %cst_40 {dimension_numbers = #tpu.dot_dimension_numbers<[1], [0], [0], [1], [0, 0, 1, 1], [], []>} : vector<256x64xbf16>, vector<64x128xbf16>, vector<256x128xf32> -> vector<256x128xf32>
    %c0_41 = arith.constant 0 : index
    %c0_42 = arith.constant 0 : index
    %85 = vector.load %arg14[%c0_41, %c0_42] : memref<1x128xf32, #tpu.memory_space<vmem>>, vector<1x128xf32>
    %86 = vector.broadcast %85 : vector<1x128xf32> to vector<256x128xf32>
    %87 = arith.addf %84, %86 : vector<256x128xf32>
    %c77_i32 = arith.constant 77 : i32
    %88 = vector.broadcast %c77_i32 : i32 to vector<1x128xi32>
    %89 = arith.cmpi sge, %1, %88 : vector<1x128xi32>
    %c81_i32 = arith.constant 81 : i32
    %90 = vector.broadcast %c81_i32 : i32 to vector<1x128xi32>
    %91 = arith.cmpi slt, %1, %90 : vector<1x128xi32>
    %92 = arith.andi %89, %91 : vector<1x128xi1>
    %cst_43 = arith.constant -1.000000e+30 : f32
    %93 = vector.shape_cast %92 : vector<1x128xi1> to vector<1x128xi1>
    %94 = vector.broadcast %93 : vector<1x128xi1> to vector<256x128xi1>
    %95 = vector.broadcast %cst_43 : f32 to vector<256x128xf32>
    %96 = arith.select %94, %87, %95 : vector<256x128xi1>, vector<256x128xf32>
    %cst_44 = arith.constant dense<0xFF800000> : vector<256xf32>
    %97 = vector.multi_reduction <maximumf>, %96, %cst_44 [1] : vector<256x128xf32> to vector<256xf32>
    %98 = vector.shape_cast %97 : vector<256xf32> to vector<256x1xf32>
    %99 = vector.broadcast %98 : vector<256x1xf32> to vector<256x128xf32>
    %100 = arith.subf %96, %99 : vector<256x128xf32>
    %101 = math.exp %100 : vector<256x128xf32>
    %cst_45 = arith.constant 0.000000e+00 : f32
    %102 = vector.shape_cast %92 : vector<1x128xi1> to vector<1x128xi1>
    %103 = vector.broadcast %102 : vector<1x128xi1> to vector<256x128xi1>
    %104 = vector.broadcast %cst_45 : f32 to vector<256x128xf32>
    %105 = arith.select %103, %101, %104 : vector<256x128xi1>, vector<256x128xf32>
    %cst_46 = arith.constant dense<0.000000e+00> : vector<256xf32>
    %106 = vector.multi_reduction <add>, %105, %cst_46 [1] : vector<256x128xf32> to vector<256xf32>
    %107 = vector.shape_cast %106 : vector<256xf32> to vector<256x1xf32>
    %108 = vector.broadcast %107 : vector<256x1xf32> to vector<256x128xf32>
    %109 = arith.divf %105, %108 : vector<256x128xf32>
    %110 = arith.addf %81, %109 : vector<256x128xf32>
    %c0_47 = arith.constant 0 : index
    %c0_48 = arith.constant 0 : index
    %111 = vector.load %arg15[%c0_47, %c0_48] : memref<256x128xf32, #tpu.memory_space<vmem>>, vector<256x128xf32>
    tpu.vector_store %arg15[%c0_47, %c0_48], %110 {strides = array<i32>} : memref<256x128xf32, #tpu.memory_space<vmem>>, vector<256x128xf32>,
    return
  }
  func.func @transform_0(%arg0: i32) -> (i32, i32) {
    %c0_i32 = arith.constant 0 : i32
    %c0_i32_0 = arith.constant 0 : i32
    return %arg0, %c0_i32 : i32, i32
  }
  func.func @transform_1(%arg0: i32) -> (i32, i32) {
    %c0_i32 = arith.constant 0 : i32
    %c0_i32_0 = arith.constant 0 : i32
    %c0_i32_1 = arith.constant 0 : i32
    return %c0_i32, %c0_i32_0 : i32, i32
  }
  func.func @transform_2(%arg0: i32) -> (i32, i32) {
    %c0_i32 = arith.constant 0 : i32
    %c0_i32_0 = arith.constant 0 : i32
    %c0_i32_1 = arith.constant 0 : i32
    return %c0_i32, %c0_i32_0 : i32, i32
  }
  func.func @transform_3(%arg0: i32) -> (i32, i32) {
    %c0_i32 = arith.constant 0 : i32
    %c0_i32_0 = arith.constant 0 : i32
    %c0_i32_1 = arith.constant 0 : i32
    return %c0_i32, %c0_i32_0 : i32, i32
  }
  func.func @transform_4(%arg0: i32) -> (i32, i32) {
    %c0_i32 = arith.constant 0 : i32
    %c0_i32_0 = arith.constant 0 : i32
    %c0_i32_1 = arith.constant 0 : i32
    return %c0_i32, %c0_i32_0 : i32, i32
  }
  func.func @transform_5(%arg0: i32) -> (i32, i32) {
    %c0_i32 = arith.constant 0 : i32
    %c0_i32_0 = arith.constant 0 : i32
    %c0_i32_1 = arith.constant 0 : i32
    return %c0_i32, %c0_i32_0 : i32, i32
  }
  func.func @transform_6(%arg0: i32) -> (i32, i32) {
    %c0_i32 = arith.constant 0 : i32
    %c0_i32_0 = arith.constant 0 : i32
    %c0_i32_1 = arith.constant 0 : i32
    return %c0_i32, %c0_i32_0 : i32, i32
  }
  func.func @transform_7(%arg0: i32) -> (i32, i32) {
    %c0_i32 = arith.constant 0 : i32
    %c0_i32_0 = arith.constant 0 : i32
    %c0_i32_1 = arith.constant 0 : i32
    return %c0_i32, %c0_i32_0 : i32, i32
  }
  func.func @transform_8(%arg0: i32) -> (i32, i32) {
    %c0_i32 = arith.constant 0 : i32
    %c0_i32_0 = arith.constant 0 : i32
    %c0_i32_1 = arith.constant 0 : i32
    return %c0_i32, %c0_i32_0 : i32, i32
  }
  func.func @transform_9(%arg0: i32) -> (i32, i32) {
    %c0_i32 = arith.constant 0 : i32
    %c0_i32_0 = arith.constant 0 : i32
    %c0_i32_1 = arith.constant 0 : i32
    return %c0_i32, %c0_i32_0 : i32, i32
  }
  func.func @transform_10(%arg0: i32) -> (i32, i32) {
    %c0_i32 = arith.constant 0 : i32
    %c0_i32_0 = arith.constant 0 : i32
    %c0_i32_1 = arith.constant 0 : i32
    return %c0_i32, %c0_i32_0 : i32, i32
  }
  func.func @transform_11(%arg0: i32) -> (i32, i32) {
    %c0_i32 = arith.constant 0 : i32
    %c0_i32_0 = arith.constant 0 : i32
    %c0_i32_1 = arith.constant 0 : i32
    return %c0_i32, %c0_i32_0 : i32, i32
  }
  func.func @transform_12(%arg0: i32) -> (i32, i32) {
    %c0_i32 = arith.constant 0 : i32
    %c0_i32_0 = arith.constant 0 : i32
    %c0_i32_1 = arith.constant 0 : i32
    return %c0_i32, %c0_i32_0 : i32, i32
  }
  func.func @transform_13(%arg0: i32) -> (i32, i32) {
    %c0_i32 = arith.constant 0 : i32
    %c0_i32_0 = arith.constant 0 : i32
    %c0_i32_1 = arith.constant 0 : i32
    return %c0_i32, %c0_i32_0 : i32, i32
  }
  func.func @transform_14(%arg0: i32) -> (i32, i32) {
    %c0_i32 = arith.constant 0 : i32
    %c0_i32_0 = arith.constant 0 : i32
    return %arg0, %c0_i32 : i32, i32
  }
}

</mosaic_0001>

<bundles_post_ra>
// kernel: tpu_custom_call.1
= control target key start
LH: loop header
LB: loop body
LE: loop exit
PB: predicated region body
PF: predicated region fallthrough
CT: control target
= control target key end

     0   :  { %s6521_s0 = inlined_call_operand.vmem [shape: f32[512,1], index: 0, kind: input, shape index: {}]   ;;  %s6522_s1 = inlined_call_operand.vmem [shape: bf16[64,128], index: 1, kind: input, shape index: {}]   ;;  %s6523_s2 = inlined_call_operand.vmem [shape: bf16[128,128], index: 2, kind: input, shape index: {}]   ;;  %s6524_s3 = inlined_call_operand.vmem [shape: f32[1,64], index: 3, kind: input, shape index: {}]   ;;  %s6525_s4 = inlined_call_operand.vmem [shape: f32[1,64], index: 4, kind: input, shape index: {}]   ;;  %s6526_s5 = inlined_call_operand.vmem [shape: bf16[64,128], index: 5, kind: input, shape index: {}]   ;;  %s6527_s6 = inlined_call_operand.vmem [shape: f32[1,128], index: 6, kind: input, shape index: {}]   ;;  %s6528_s7 = inlined_call_operand.vmem [shape: bf16[64,64], index: 7, kind: input, shape index: {}]   ;;  %s6529_s8 = inlined_call_operand.vmem [shape: f32[1,64], index: 8, kind: input, shape index: {}]   ;;  %s6530_s9 = inlined_call_operand.vmem [shape: f32[1,64], index: 9, kind: input, shape index: {}]   ;;  %s6531_s10 = inlined_call_operand.vmem [shape: f32[1,128], index: 10, kind: input, shape index: {}]   ;;  %s6532_s11 = inlined_call_operand.vmem [shape: f32[1,64], index: 11, kind: input, shape index: {}]   ;;  %s6533_s12 = inlined_call_operand.vmem [shape: bf16[64,128], index: 12, kind: input, shape index: {}]   ;;  %s6534_s13 = inlined_call_operand.vmem [shape: f32[1,128], index: 13, kind: input, shape index: {}]   ;;  %s6535_s14 = inlined_call_operand.hbm [shape: f32[512,128], index: 14, kind: output, shape index: {}]  }
   0x1   :  { %6579 = sst [smem:[#allocation47_spill]] %s6521_s0 }
   0x2   :  { %6580 = sst [smem:[#allocation48_spill]] %s6522_s1 }
   0x3   :  { %6581 = sst [smem:[#allocation49_spill]] %s6523_s2 }
   0x4   :  { %19 = vsyncpa [#allocation3], 0 }
   0x5   :  { %21 = vsyncpa [#allocation3 + $0x1], 0  ;;  %s4659_s29 = smov 0   ;;  %s4661_s30 = smov 0  }
   0x6   :  { %s4663_s15 = smov 0   ;;  %s4665_s16 = smov 0  }
   0x7 LB: > { %s4680_s17 = sadd.s32 4294967295, %s4576_s16   ;;  %s3660_s18 = sadd.s32 4294967294, %s4576_s16   ;;  %s4576_s16 = sphi %s4665_s16, %s6695_s16   ;;  %s4572_s15 = sphi %s4663_s15, %s6694_s15   ;;  %s4568_s30 = sphi %s4661_s30, %s6693_s30   ;;  %s4564_s29 = sphi %s4659_s29, %s6692_s29  }
   0x8   : > { %s4684_s19 = sadd.s32 1, %s4576_s16   ;;  %s333_s20 = sadd.s32 1, %s4572_s15 }
   0x9   : > { %s330_s21 = ssub.s32 %s4576_s16, %s4684_s19  ;;  %p343_p0 = scmp.ne.s32.totalorder %s4572_s15, %s4568_s30 }
   0xa   : > { %p331_p1 = scmp.eq.s32.totalorder %s330_s21, 0  ;;  %p344_p2 = scmp.eq.s32.totalorder %s4680_s17, 1 }
   0xb   : > { %p349_p3 = scmp.ne.s32.totalorder %s4568_s30, %s4564_s29  ;;  %p350_p4 = scmp.eq.s32.totalorder %s3660_s18, 1 }
   0xc   : > { %s4695_s22 = scalar_select %p331_p1, %s4572_s15, %s333_s20  }
   0xd   : > { %p4697_p5 = por %p344_p2, %p343_p0  ;;  %p4701_p6 = por %p350_p4, %p349_p3 }
   0xe   : > { %p3663_p7 = scmp.ge.s32.totalorder %s4576_s16, 1  ;;  %p416_p8 = scmp.lt.s32.totalorder %s4576_s16, 3 }
  0x10   : > { %p417_p9 = pnand %p3663_p7, %p416_p8 }
  0x12   : > { %420 = sbr.rel (%p417_p9) target bundleno = 1904 (0x770), region = 76 }
  0x19   : > { %s3665_s25 = sshll.u32 %s4680_s17, 5  ;;  %v4578_v0 = vmov 0   ;;  %v4168_v1 = vld [vmem:[%s6526_s5] sm:$0xff]   ;;  %s6584_s0 = sld [smem:[#allocation47_spill]]  ;;  %v4169_v10 = vld [vmem:[%s6526_s5 + $0x8] sm:$0xff]   ;;  %v4170_v11 = vld [vmem:[%s6526_s5 + $0x10] sm:$0xff]  }
  0x1a   : > { %4167 = vset.pattern.permute.xlu1 %v4578_v0  ;;  %4166 = vset.pattern.permute.xlu0 %v4578_v0  ;;  %p463_p10 = scmp.lt.s32.totalorder %s3665_s25, 63  ;;  %v4171_v14 = vld [vmem:[%s6526_s5 + $0x18] sm:$0xff]   ;;  %v4760_v37 = vld [vmem:[%s6524_s3] ss:$0 sm:$0xff]  ;;  %vm829_vm0 = vcmask 523264   ;;  %s6585_s1 = sld [smem:[#allocation48_spill]] }
  0x1b   : > { %3906 = vmatprep.subr.bf16.mxu0 %v4168_v1  ;;  %4114 = vmatprep.subr.bf16.mxu1 %v4168_v1  ;;  %v4765_v40 = vld [vmem:[%s6525_s4] ss:$0 sm:$0xff]  ;;  %s6602_s2 = sld [smem:[#allocation49_spill]]  ;;  %s4580_s26 = smov 64  }
  0x1c   : > { %s6697_s25 = smov (!%p463_p10, %s3665_s25), 63  ;;  %3907 = vmatpush3.bf16.msra.mxu0 %v4168_v1  ;;  %4118 = vmatpush3.bf16.msra.mxu1 %v4168_v1  ;;  %s4581_s20 = smov [#allocation2]  }
  0x1d   : > { %s3666_s28 = sshll.u32 %s6697_s25, 3  ;;  %3908 = vmatprep.subr.bf16.mxu0 %v4169_v10  ;;  %4115 = vmatprep.subr.bf16.mxu1 %v4169_v10  ;;  %s3801_s25 = sshll.u32 %s4680_s17, 12 }
  0x1f   : > { %s4714_s21 = scalar_lea.vmem %s6584_s0, %s3666_s28  ;;  %s459_s28 = sand.u32 1, %s4568_s30  }
  0x20   : > { %v472_v2 = vld [vmem:[%s4714_s21 + $0x10] sm:$0xff]  ;;  %v470_v3 = vld [vmem:[%s4714_s21] sm:$0xff]  ;;  %v473_v4 = vld [vmem:[%s4714_s21 + $0x18] sm:$0xff]  ;;  %3909 = vmatpush3.bf16.msra.mxu0 %v4169_v10  ;;  %4119 = vmatpush3.bf16.msra.mxu1 %v4169_v10  ;;  %s6480_s17 = scalar_lea.sflag [#allocation3], %s459_s28 }
  0x21   : > { %518 = vperm.xlu1 %4167, %v472_v2   ;;  %508 = vperm.xlu0 %4166, %v470_v3   ;;  %v471_v5 = vld [vmem:[%s4714_s21 + $0x8] sm:$0xff]  ;;  %v474_v7 = vld [vmem:[%s4714_s21 + $0x20] sm:$0xff]  ;;  %v477_v8 = vld [vmem:[%s4714_s21 + $0x38] sm:$0xff] }
  0x22   : > { %v475_v6 = vld [vmem:[%s4714_s21 + $0x28] sm:$0xff]  ;;  %v476_v9 = vld [vmem:[%s4714_s21 + $0x30] sm:$0xff]  ;;  %v478_v13 = vld [vmem:[%s4714_s21 + $0x40] sm:$0xff]  ;;  %3910 = vmatprep.subr.bf16.mxu0 %v4170_v11  ;;  %4116 = vmatprep.subr.bf16.mxu1 %v4170_v11 }
  0x23   : > { %v479_v12 = vld [vmem:[%s4714_s21 + $0x48] sm:$0xff]  ;;  %v481_v15 = vld [vmem:[%s4714_s21 + $0x58] sm:$0xff]  ;;  %v480_v16 = vld [vmem:[%s4714_s21 + $0x50] sm:$0xff] }
  0x24   : > { %3911 = vmatpush3.bf16.msra.mxu0 %v4170_v11  ;;  %4120 = vmatpush3.bf16.msra.mxu1 %v4170_v11  ;;  %v483_v17 = vld [vmem:[%s4714_s21 + $0x68] sm:$0xff]  ;;  %v482_v18 = vld [vmem:[%s4714_s21 + $0x60] sm:$0xff]  ;;  %v485_v19 = vld [vmem:[%s4714_s21 + $0x78] sm:$0xff] }
  0x25   : > { %523 = vperm.xlu1 %4167, %v473_v4   ;;  %513 = vperm.xlu0 %4166, %v471_v5   ;;  %v484_v20 = vld [vmem:[%s4714_s21 + $0x70] sm:$0xff]  ;;  %v487_v21 = vld [vmem:[%s4714_s21 + $0x88] sm:$0xff]  ;;  %v486_v22 = vld [vmem:[%s4714_s21 + $0x80] sm:$0xff] }
  0x26   : > { %3912 = vmatprep.subr.bf16.mxu0 %v4171_v14  ;;  %4117 = vmatprep.subr.bf16.mxu1 %v4171_v14  ;;  %v489_v23 = vld [vmem:[%s4714_s21 + $0x98] sm:$0xff]  ;;  %v488_v24 = vld [vmem:[%s4714_s21 + $0x90] sm:$0xff]  ;;  %v491_v25 = vld [vmem:[%s4714_s21 + $0xa8] sm:$0xff] }
  0x27   : > { %v490_v26 = vld [vmem:[%s4714_s21 + $0xa0] sm:$0xff]  ;;  %v493_v27 = vld [vmem:[%s4714_s21 + $0xb8] sm:$0xff]  ;;  %v492_v28 = vld [vmem:[%s4714_s21 + $0xb0] sm:$0xff] }
  0x28   : > { %3913 = vmatpush3.bf16.msra.mxu0 %v4171_v14  ;;  %4121 = vmatpush3.bf16.msra.mxu1 %v4171_v14  ;;  %v495_v29 = vld [vmem:[%s4714_s21 + $0xc8] sm:$0xff]  ;;  %v494_v30 = vld [vmem:[%s4714_s21 + $0xc0] sm:$0xff]  ;;  %v497_v31 = vld [vmem:[%s4714_s21 + $0xd8] sm:$0xff] }
  0x29   : > { %533 = vperm.xlu1 %4167, %v475_v6   ;;  %528 = vperm.xlu0 %4166, %v474_v7   ;;  %v496_v32 = vld [vmem:[%s4714_s21 + $0xd0] sm:$0xff]  ;;  %v499_v33 = vld [vmem:[%s4714_s21 + $0xe8] sm:$0xff]  ;;  %v498_v34 = vld [vmem:[%s4714_s21 + $0xe0] sm:$0xff] }
  0x2a   : > { %v501_v35 = vld [vmem:[%s4714_s21 + $0xf8] sm:$0xff]  ;;  %v500_v36 = vld [vmem:[%s4714_s21 + $0xf0] sm:$0xff] }
  0x2d   : > { %543 = vperm.xlu1 %4167, %v477_v8   ;;  %538 = vperm.xlu0 %4166, %v476_v9  }
  0x31   : > { %553 = vperm.xlu1 %4167, %v479_v12   ;;  %548 = vperm.xlu0 %4166, %v478_v13  }
  0x35   : > { %563 = vperm.xlu1 %4167, %v481_v15   ;;  %558 = vperm.xlu0 %4166, %v480_v16  }
  0x39   : > { %573 = vperm.xlu1 %4167, %v483_v17   ;;  %568 = vperm.xlu0 %4166, %v482_v18  }
  0x3d   : > { %583 = vperm.xlu1 %4167, %v485_v19   ;;  %578 = vperm.xlu0 %4166, %v484_v20  }
  0x41   : > { %593 = vperm.xlu1 %4167, %v487_v21   ;;  %588 = vperm.xlu0 %4166, %v486_v22  }
  0x45   : > { %603 = vperm.xlu1 %4167, %v489_v23   ;;  %598 = vperm.xlu0 %4166, %v488_v24  }
  0x49   : > { %613 = vperm.xlu1 %4167, %v491_v25   ;;  %608 = vperm.xlu0 %4166, %v490_v26  }
  0x4d   : > { %623 = vperm.xlu1 %4167, %v493_v27   ;;  %618 = vperm.xlu0 %4166, %v492_v28  }
  0x51   : > { %633 = vperm.xlu1 %4167, %v495_v29   ;;  %628 = vperm.xlu0 %4166, %v494_v30  }
  0x55   : > { %643 = vperm.xlu1 %4167, %v497_v31   ;;  %638 = vperm.xlu0 %4166, %v496_v32  }
  0x59   : > { %653 = vperm.xlu1 %4167, %v499_v33   ;;  %648 = vperm.xlu0 %4166, %v498_v34  }
  0x5d   : > { %663 = vperm.xlu1 %4167, %v501_v35   ;;  %658 = vperm.xlu0 %4166, %v500_v36  }
  0xa0   : > { %v519_v38 = vpop.permute.xlu1 %518  ;;  %v509_v39 = vpop.permute.xlu0 %508 }
  0xa1   : > { %v674_v41 = vmul.f32 %v4760_v37, %v519_v38  ;;  %v672_v42 = vmul.f32 %v4760_v37, %v509_v39 }
  0xa3   : > { %v712_v43 = vadd.f32 %v4765_v40, %v674_v41  ;;  %v710_v44 = vadd.f32 %v4765_v40, %v672_v42 }
  0xa4   : > { %v524_v45 = vpop.permute.xlu1 %523  ;;  %v514_v46 = vpop.permute.xlu0 %513 }
  0xa5   : > { %v675_v47 = vmul.f32 %v4760_v37, %v524_v45  ;;  %v673_v48 = vmul.f32 %v4760_v37, %v514_v46  ;;  %v744_v51 = vmax.f32 %v712_v43, 0.0  ;;  %v742_v54 = vmax.f32 %v710_v44, 0.0 }
  0xa7   : > { %v713_v49 = vadd.f32 %v4765_v40, %v675_v47  ;;  %v711_v50 = vadd.f32 %v4765_v40, %v673_v48 }
  0xa8   : > { %v534_v52 = vpop.permute.xlu1 %533  ;;  %v529_v53 = vpop.permute.xlu0 %528 }
  0xa9   : > { %v745_v55 = vmax.f32 %v713_v49, 0.0  ;;  %v677_v56 = vmul.f32 %v4760_v37, %v534_v52  ;;  %v676_v57 = vmul.f32 %v4760_v37, %v529_v53  ;;  %v743_v58 = vmax.f32 %v711_v50, 0.0 }
  0xab   : > { %v775_v59 = vpack.c.bf16 %v745_v55, %v744_v51  ;;  %v715_v60 = vadd.f32 %v4765_v40, %v677_v56  ;;  %v714_v61 = vadd.f32 %v4765_v40, %v676_v57  ;;  %v774_v62 = vpack.c.bf16 %v743_v58, %v742_v54 }
  0xac   : > { %v544_v63 = vpop.permute.xlu1 %543  ;;  %v539_v0 = vpop.permute.xlu0 %538 }
  0xad   : > { %v747_v1 = vmax.f32 %v715_v60, 0.0  ;;  %v746_v2 = vmax.f32 %v714_v61, 0.0  ;;  %v679_v3 = vmul.f32 %v4760_v37, %v544_v63  ;;  %v678_v4 = vmul.f32 %v4760_v37, %v539_v0  ;;  %3914 = vmatprep.mubr.msk.bf16.mxu0 %vm829_vm0, %v774_v62 }
  0xae   : > { %3915 = vmatmul.mubr.msk.bf16.vlgmr.msra.gmra.mrb[0].mxu0 %vm829_vm0, %v775_v59 }
  0xaf   : > { %v776_v5 = vpack.c.bf16 %v747_v1, %v746_v2  ;;  %v717_v6 = vadd.f32 %v4765_v40, %v679_v3  ;;  %v716_v7 = vadd.f32 %v4765_v40, %v678_v4 }
  0xb0   : > { %v554_v8 = vpop.permute.xlu1 %553  ;;  %v549_v9 = vpop.permute.xlu0 %548 }
  0xb1   : > { %v749_v10 = vmax.f32 %v717_v6, 0.0  ;;  %v748_v11 = vmax.f32 %v716_v7, 0.0  ;;  %v681_v12 = vmul.f32 %v4760_v37, %v554_v8  ;;  %v680_v13 = vmul.f32 %v4760_v37, %v549_v9  ;;  %3918 = vmatprep.mubr.msk.bf16.mxu0 %vm829_vm0, %v776_v5 }
  0xb3   : > { %v777_v14 = vpack.c.bf16 %v749_v10, %v748_v11  ;;  %v719_v15 = vadd.f32 %v4765_v40, %v681_v12  ;;  %v718_v16 = vadd.f32 %v4765_v40, %v680_v13 }
  0xb4   : > { %v564_v17 = vpop.permute.xlu1 %563  ;;  %v559_v18 = vpop.permute.xlu0 %558 }
  0xb5   : > { %v751_v19 = vmax.f32 %v719_v15, 0.0  ;;  %v750_v20 = vmax.f32 %v718_v16, 0.0  ;;  %v683_v21 = vmul.f32 %v4760_v37, %v564_v17  ;;  %v682_v22 = vmul.f32 %v4760_v37, %v559_v18 }
  0xb6   : > { %3919 = vmatmul.mubr.msk.bf16.gmra.mrb[4].mxu0 %vm829_vm0, %v777_v14 }
  0xb7   : > { %v778_v23 = vpack.c.bf16 %v751_v19, %v750_v20  ;;  %v721_v24 = vadd.f32 %v4765_v40, %v683_v21  ;;  %v720_v25 = vadd.f32 %v4765_v40, %v682_v22 }
  0xb8   : > { %v574_v26 = vpop.permute.xlu1 %573  ;;  %v569_v27 = vpop.permute.xlu0 %568 }
  0xb9   : > { %v753_v28 = vmax.f32 %v721_v24, 0.0  ;;  %v752_v29 = vmax.f32 %v720_v25, 0.0  ;;  %v685_v30 = vmul.f32 %v4760_v37, %v574_v26  ;;  %v684_v31 = vmul.f32 %v4760_v37, %v569_v27  ;;  %3922 = vmatprep.mubr.msk.bf16.mxu0 %vm829_vm0, %v778_v23 }
  0xbb   : > { %v779_v32 = vpack.c.bf16 %v753_v28, %v752_v29  ;;  %v723_v33 = vadd.f32 %v4765_v40, %v685_v30  ;;  %v722_v34 = vadd.f32 %v4765_v40, %v684_v31 }
  0xbc   : > { %v584_v35 = vpop.permute.xlu1 %583  ;;  %v579_v36 = vpop.permute.xlu0 %578 }
  0xbd   : > { %v755_v38 = vmax.f32 %v723_v33, 0.0  ;;  %v754_v39 = vmax.f32 %v722_v34, 0.0  ;;  %v687_v41 = vmul.f32 %v4760_v37, %v584_v35  ;;  %v686_v42 = vmul.f32 %v4760_v37, %v579_v36 }
  0xbe   : > { %3923 = vmatmul.mubr.msk.bf16.gmra.mrb[8].mxu0 %vm829_vm0, %v779_v32 }
  0xbf   : > { %v780_v43 = vpack.c.bf16 %v755_v38, %v754_v39  ;;  %v725_v44 = vadd.f32 %v4765_v40, %v687_v41  ;;  %v724_v45 = vadd.f32 %v4765_v40, %v686_v42 }
  0xc0   : > { %v594_v46 = vpop.permute.xlu1 %593  ;;  %v589_v47 = vpop.permute.xlu0 %588 }
  0xc1   : > { %v757_v48 = vmax.f32 %v725_v44, 0.0  ;;  %v756_v49 = vmax.f32 %v724_v45, 0.0  ;;  %v689_v50 = vmul.f32 %v4760_v37, %v594_v46  ;;  %v688_v51 = vmul.f32 %v4760_v37, %v589_v47  ;;  %3926 = vmatprep.mubr.msk.bf16.mxu0 %vm829_vm0, %v780_v43 }
  0xc3   : > { %v781_v52 = vpack.c.bf16 %v757_v48, %v756_v49  ;;  %v727_v53 = vadd.f32 %v4765_v40, %v689_v50  ;;  %v726_v54 = vadd.f32 %v4765_v40, %v688_v51 }
  0xc4   : > { %v604_v55 = vpop.permute.xlu1 %603  ;;  %v599_v56 = vpop.permute.xlu0 %598 }
  0xc5   : > { %v691_v57 = vmul.f32 %v4760_v37, %v604_v55  ;;  %v690_v58 = vmul.f32 %v4760_v37, %v599_v56  ;;  %v758_v59 = vmax.f32 %v726_v54, 0.0  ;;  %v759_v60 = vmax.f32 %v727_v53, 0.0 }
  0xc6   : > { %3927 = vmatmul.mubr.msk.bf16.gmra.mrb[12].mxu0 %vm829_vm0, %v781_v52 }
  0xc7   : > { %v729_v61 = vadd.f32 %v4765_v40, %v691_v57  ;;  %v728_v62 = vadd.f32 %v4765_v40, %v690_v58  ;;  %v782_v63 = vpack.c.bf16 %v759_v60, %v758_v59  ;;  %v4172_v59 = vld [vmem:[%s6585_s1] sm:$0xff]  }
  0xc8   : > { %v614_v0 = vpop.permute.xlu1 %613  ;;  %v609_v1 = vpop.permute.xlu0 %608  ;;  %3946 = vmatprep.subr.bf16.mxu1 %v4172_v59 }
  0xc9   : > { %v761_v2 = vmax.f32 %v729_v61, 0.0  ;;  %v760_v3 = vmax.f32 %v728_v62, 0.0  ;;  %v693_v4 = vmul.f32 %v4760_v37, %v614_v0  ;;  %v692_v5 = vmul.f32 %v4760_v37, %v609_v1  ;;  %3930 = vmatprep.mubr.msk.bf16.mxu1 %vm829_vm0, %v782_v63 }
  0xcb   : > { %v783_v6 = vpack.c.bf16 %v761_v2, %v760_v3  ;;  %v731_v7 = vadd.f32 %v4765_v40, %v693_v4  ;;  %v730_v8 = vadd.f32 %v4765_v40, %v692_v5 }
  0xcc   : > { %v624_v9 = vpop.permute.xlu1 %623  ;;  %v619_v10 = vpop.permute.xlu0 %618 }
  0xcd   : > { %v763_v11 = vmax.f32 %v731_v7, 0.0  ;;  %v762_v12 = vmax.f32 %v730_v8, 0.0  ;;  %v695_v13 = vmul.f32 %v4760_v37, %v624_v9  ;;  %v694_v14 = vmul.f32 %v4760_v37, %v619_v10  ;;  %3931 = vmatmul.mubr.msk.bf16.vlgmr.msra.gmra.mrb[0].mxu1 %vm829_vm0, %v783_v6 }
  0xce   : > { %3947 = vmatpush3.bf16.msra.mxu1 %v4172_v59 }
  0xcf   : > { %v784_v15 = vpack.c.bf16 %v763_v11, %v762_v12  ;;  %v733_v16 = vadd.f32 %v4765_v40, %v695_v13  ;;  %v732_v17 = vadd.f32 %v4765_v40, %v694_v14 }
  0xd0   : > { %v634_v18 = vpop.permute.xlu1 %633  ;;  %v629_v19 = vpop.permute.xlu0 %628 }
  0xd1   : > { %v765_v20 = vmax.f32 %v733_v16, 0.0  ;;  %v764_v21 = vmax.f32 %v732_v17, 0.0  ;;  %v697_v22 = vmul.f32 %v4760_v37, %v634_v18  ;;  %v696_v23 = vmul.f32 %v4760_v37, %v629_v19  ;;  %3934 = vmatprep.mubr.msk.bf16.mxu1 %vm829_vm0, %v784_v15 }
  0xd3   : > { %v785_v24 = vpack.c.bf16 %v765_v20, %v764_v21  ;;  %v735_v25 = vadd.f32 %v4765_v40, %v697_v22  ;;  %v734_v26 = vadd.f32 %v4765_v40, %v696_v23 }
  0xd4   : > { %v644_v27 = vpop.permute.xlu1 %643  ;;  %v639_v28 = vpop.permute.xlu0 %638 }
  0xd5   : > { %v767_v29 = vmax.f32 %v735_v25, 0.0  ;;  %v766_v30 = vmax.f32 %v734_v26, 0.0  ;;  %v699_v31 = vmul.f32 %v4760_v37, %v644_v27  ;;  %v698_v32 = vmul.f32 %v4760_v37, %v639_v28  ;;  %3935 = vmatmul.mubr.msk.bf16.gmra.mrb[4].mxu1 %vm829_vm0, %v785_v24 }
  0xd7   : > { %v786_v33 = vpack.c.bf16 %v767_v29, %v766_v30  ;;  %v737_v34 = vadd.f32 %v4765_v40, %v699_v31  ;;  %v736_v35 = vadd.f32 %v4765_v40, %v698_v32 }
  0xd8   : > { %v654_v36 = vpop.permute.xlu1 %653  ;;  %v649_v38 = vpop.permute.xlu0 %648 }
  0xd9   : > { %v769_v39 = vmax.f32 %v737_v34, 0.0  ;;  %v768_v41 = vmax.f32 %v736_v35, 0.0  ;;  %v701_v42 = vmul.f32 %v4760_v37, %v654_v36  ;;  %v700_v43 = vmul.f32 %v4760_v37, %v649_v38  ;;  %3938 = vmatprep.mubr.msk.bf16.mxu1 %vm829_vm0, %v786_v33 }
  0xdb   : > { %v787_v44 = vpack.c.bf16 %v769_v39, %v768_v41  ;;  %v739_v45 = vadd.f32 %v4765_v40, %v701_v42  ;;  %v738_v46 = vadd.f32 %v4765_v40, %v700_v43 }
  0xdc   : > { %v664_v47 = vpop.permute.xlu1 %663  ;;  %v659_v48 = vpop.permute.xlu0 %658 }
  0xdd   : > { %v771_v49 = vmax.f32 %v739_v45, 0.0  ;;  %v770_v50 = vmax.f32 %v738_v46, 0.0  ;;  %v703_v51 = vmul.f32 %v4760_v37, %v664_v47  ;;  %v702_v52 = vmul.f32 %v4760_v37, %v659_v48  ;;  %3939 = vmatmul.mubr.msk.bf16.gmra.mrb[8].mxu1 %vm829_vm0, %v787_v44  ;;  %v4853_v37 = vld [vmem:[%s6527_s6] ss:$0 sm:$0xff] }
  0xdf   : > { %v788_v53 = vpack.c.bf16 %v771_v49, %v770_v50  ;;  %v741_v54 = vadd.f32 %v4765_v40, %v703_v51  ;;  %v740_v55 = vadd.f32 %v4765_v40, %v702_v52 }
  0xe1   : > { %v773_v56 = vmax.f32 %v741_v54, 0.0  ;;  %v772_v57 = vmax.f32 %v740_v55, 0.0  ;;  %3942 = vmatprep.mubr.msk.bf16.mxu1 %vm829_vm0, %v788_v53 }
  0xe3   : > { %v789_v58 = vpack.c.bf16 %v773_v56, %v772_v57  ;;  %v4173_v56 = vld [vmem:[%s6585_s1 + $0x8] sm:$0xff]  }
  0xe4   : > { %3948 = vmatprep.subr.bf16.mxu1 %v4173_v56 }
  0xe5   : > { %3943 = vmatmul.mubr.msk.bf16.gmra.mrb[12].mxu1 %vm829_vm0, %v789_v58 }
  0xe6   : > { %3949 = vmatpush3.bf16.msra.mxu1 %v4173_v56 }
 0x181   : > { %v3916_v60 = vpop.f32.mrb[0].mxu0 }
 0x182   : > { %v921_v40 = vadd.f32 %v3916_v60, %v4853_v37  ;;  %v912_v61 = vpop.f32.mrb[1].mxu0 }
 0x183   : > { %v913_v62 = vadd.f32 %v4853_v37, %v912_v61  ;;  %v3917_v63 = vpop.f32.mrb[2].mxu0 }
 0x184   : > { %v4857_v0 = vmax.f32 %v921_v40, 0.0  ;;  %v915_v1 = vpop.f32.mrb[3].mxu0  ;;  %v924_v3 = vadd.f32 %v3917_v63, %v4853_v37 }
 0x185   : > { %v4859_v2 = vmax.f32 %v913_v62, 0.0  ;;  %v916_v4 = vadd.f32 %v4853_v37, %v915_v1 }
 0x186   : > { %v1073_v7 = vmul.f32 %v4857_v0, %v4857_v0  ;;  %v4869_v8 = vmax.f32 %v924_v3, 0.0 }
 0x187   : > { %v4863_v5 = vmax.f32 %v916_v4, 0.0  ;;  %v1071_v6 = vmul.f32 %v4859_v2, %v4859_v2 }
 0x188   : > { %v1109_v19 = vsel %vm829_vm0, %v1073_v7, 0.0  ;;  %v1074_v23 = vmul.f32 %v4869_v8, %v4869_v8 }
 0x189   : > { %v3920_v9 = vpop.f32.mrb[4].mxu0  ;;  %v1103_v10 = vsel %vm829_vm0, %v1071_v6, 0.0  ;;  %v1072_v11 = vmul.f32 %v4863_v5, %v4863_v5 }
 0x18a   : > { %v937_v12 = vadd.f32 %v3920_v9, %v4853_v37  ;;  %1104 = vadd.xlane.f32.xlu0 %v1103_v10  ;;  %v928_v13 = vpop.f32.mrb[5].mxu0  ;;  %v1112_v29 = vsel %vm829_vm0, %v1074_v23, 0.0 }
 0x18b   : > { %v929_v14 = vadd.f32 %v4853_v37, %v928_v13  ;;  %v3921_v15 = vpop.f32.mrb[6].mxu0  ;;  %v1106_v16 = vsel %vm829_vm0, %v1072_v11, 0.0 }
 0x18c   : > { %v4877_v17 = vmax.f32 %v937_v12, 0.0  ;;  %1107 = vadd.xlane.f32.xlu1 %v1106_v16  ;;  %v931_v18 = vpop.f32.mrb[7].mxu0  ;;  %v940_v21 = vadd.f32 %v3921_v15, %v4853_v37 }
 0x18d   : > { %v4880_v20 = vmax.f32 %v929_v14, 0.0  ;;  %v932_v22 = vadd.f32 %v4853_v37, %v931_v18 }
 0x18e   : > { %1110 = vadd.xlane.f32.xlu0 %v1109_v19  ;;  %v1077_v26 = vmul.f32 %v4877_v17, %v4877_v17  ;;  %v4892_v27 = vmax.f32 %v940_v21, 0.0 }
 0x18f   : > { %v4886_v24 = vmax.f32 %v932_v22, 0.0  ;;  %v1075_v25 = vmul.f32 %v4880_v20, %v4880_v20 }
 0x190   : > { %v1121_v41 = vsel %vm829_vm0, %v1077_v26, 0.0  ;;  %v1078_v45 = vmul.f32 %v4892_v27, %v4892_v27 }
 0x191   : > { %v3924_v28 = vpop.f32.mrb[8].mxu0  ;;  %v1115_v30 = vsel %vm829_vm0, %v1075_v25, 0.0  ;;  %v1076_v31 = vmul.f32 %v4886_v24, %v4886_v24 }
 0x192   : > { %v953_v32 = vadd.f32 %v3924_v28, %v4853_v37  ;;  %1113 = vadd.xlane.f32.xlu0 %v1112_v29  ;;  %1116 = vadd.xlane.f32.xlu1 %v1115_v30  ;;  %v944_v33 = vpop.f32.mrb[9].mxu0  ;;  %v1124_v51 = vsel %vm829_vm0, %v1078_v45, 0.0 }
 0x193   : > { %v945_v34 = vadd.f32 %v4853_v37, %v944_v33  ;;  %v3925_v35 = vpop.f32.mrb[10].mxu0  ;;  %v1118_v44 = vsel %vm829_vm0, %v1076_v31, 0.0 }
 0x194   : > { %v4900_v36 = vmax.f32 %v953_v32, 0.0  ;;  %v956_v38 = vadd.f32 %v3925_v35, %v4853_v37  ;;  %v947_v39 = vpop.f32.mrb[11].mxu0  ;;  %v4174_v35 = vld [vmem:[%s6585_s1 + $0x10] sm:$0xff]  }
 0x195   : > { %v4904_v42 = vmax.f32 %v945_v34, 0.0  ;;  %v948_v43 = vadd.f32 %v4853_v37, %v947_v39  ;;  %3950 = vmatprep.subr.bf16.mxu1 %v4174_v35 }
 0x196   : > { %1119 = vadd.xlane.f32.xlu0 %v1118_v44  ;;  %1122 = vadd.xlane.f32.xlu1 %v1121_v41  ;;  %v4914_v48 = vmax.f32 %v956_v38, 0.0  ;;  %v1081_v49 = vmul.f32 %v4900_v36, %v4900_v36 }
 0x197   : > { %v4910_v46 = vmax.f32 %v948_v43, 0.0  ;;  %v1079_v47 = vmul.f32 %v4904_v42, %v4904_v42  ;;  %3951 = vmatpush3.bf16.msra.mxu1 %v4174_v35 }
 0x198   : > { %v1133_v40 = vsel %vm829_vm0, %v1081_v49, 0.0  ;;  %v1082_v61 = vmul.f32 %v4914_v48, %v4914_v48 }
 0x199   : > { %v3928_v50 = vpop.f32.mrb[12].mxu0  ;;  %v1127_v52 = vsel %vm829_vm0, %v1079_v47, 0.0  ;;  %v1080_v53 = vmul.f32 %v4910_v46, %v4910_v46 }
 0x19a   : > { %v969_v54 = vadd.f32 %v3928_v50, %v4853_v37  ;;  %1125 = vadd.xlane.f32.xlu0 %v1124_v51  ;;  %1128 = vadd.xlane.f32.xlu1 %v1127_v52  ;;  %v960_v55 = vpop.f32.mrb[13].mxu0  ;;  %v1136_v10 = vsel %vm829_vm0, %v1082_v61, 0.0 }
 0x19b   : > { %v961_v57 = vadd.f32 %v4853_v37, %v960_v55  ;;  %v3929_v58 = vpop.f32.mrb[14].mxu0  ;;  %v1130_v3 = vsel %vm829_vm0, %v1080_v53, 0.0  ;;  %v4175_v53 = vld [vmem:[%s6585_s1 + $0x18] sm:$0xff]   ;;  %s4518_s1 = sshll.u32 %s4581_s20, 4  ;;  %s4519_s1 = int_to_ptr.vmem [resolvable:$false] %s4518_s1 }
 0x19c   : > { %v972_v59 = vadd.f32 %v3929_v58, %v4853_v37  ;;  %v963_v60 = vpop.f32.mrb[15].mxu0  ;;  %v4931_v62 = vmax.f32 %v969_v54, 0.0  ;;  %3952 = vmatprep.subr.bf16.mxu1 %v4175_v53 }
 0x19d   : > { %v4933_v63 = vmax.f32 %v961_v57, 0.0  ;;  %v964_v1 = vadd.f32 %v4853_v37, %v963_v60  ;;  %3953 = vmatpush3.bf16.msra.mxu1 %v4175_v53 }
 0x19e   : > { %1131 = vadd.xlane.f32.xlu0 %v1130_v3  ;;  %1134 = vadd.xlane.f32.xlu1 %v1133_v40  ;;  %v4941_v7 = vmax.f32 %v972_v59, 0.0  ;;  %v1085_v15 = vmul.f32 %v4931_v62, %v4931_v62 }
 0x19f   : > { %6586 = vst [vmem:[#allocation5_spill] sm:$0xff] %v4933_v63  ;;  %v4937_v4 = vmax.f32 %v964_v1, 0.0  ;;  %v1083_v6 = vmul.f32 %v4933_v63, %v4933_v63 }
 0x1a0   : > { %v3932_v9 = vpop.f32.mrb[0].mxu1  ;;  %v1086_v23 = vmul.f32 %v4941_v7, %v4941_v7  ;;  %v1145_v29 = vsel %vm829_vm0, %v1085_v15, 0.0 }
 0x1a1   : > { %6587 = vst [vmem:[#allocation6_spill] sm:$0xff] %v4937_v4  ;;  %v985_v11 = vadd.f32 %v3932_v9, %v4853_v37  ;;  %v976_v12 = vpop.f32.mrb[1].mxu1  ;;  %v1139_v13 = vsel %vm829_vm0, %v1083_v6, 0.0  ;;  %v1084_v14 = vmul.f32 %v4937_v4, %v4937_v4 }
 0x1a2   : > { %v977_v16 = vadd.f32 %v4853_v37, %v976_v12  ;;  %1137 = vadd.xlane.f32.xlu0 %v1136_v10  ;;  %1140 = vadd.xlane.f32.xlu1 %v1139_v13  ;;  %v3933_v18 = vpop.f32.mrb[2].mxu1  ;;  %v1148_v33 = vsel %vm829_vm0, %v1086_v23, 0.0 }
 0x1a3   : > { %v979_v19 = vpop.f32.mrb[3].mxu1  ;;  %v4956_v25 = vmax.f32 %v985_v11, 0.0  ;;  %v988_v26 = vadd.f32 %v3933_v18, %v4853_v37  ;;  %v1142_v28 = vsel %vm829_vm0, %v1084_v14, 0.0 }
 0x1a4   : > { %v4951_v21 = vmax.f32 %v977_v16, 0.0  ;;  %v980_v22 = vadd.f32 %v4853_v37, %v979_v19 }
 0x1a5   : > { %6589 = vst [vmem:[#allocation8_spill] sm:$0xff] %v4956_v25  ;;  %v4970_v38 = vmax.f32 %v988_v26, 0.0  ;;  %v1089_v44 = vmul.f32 %v4956_v25, %v4956_v25 }
 0x1a6   : > { %6588 = vst [vmem:[#allocation7_spill] sm:$0xff] %v4951_v21  ;;  %v4961_v30 = vmax.f32 %v980_v22, 0.0  ;;  %1143 = vadd.xlane.f32.xlu0 %v1142_v28  ;;  %1146 = vadd.xlane.f32.xlu1 %v1145_v29  ;;  %v1087_v31 = vmul.f32 %v4951_v21, %v4951_v21 }
 0x1a7   : > { %6591 = vst [vmem:[#allocation10_spill] sm:$0xff] %v4970_v38  ;;  %v1157_v56 = vsel %vm829_vm0, %v1089_v44, 0.0  ;;  %v1090_v57 = vmul.f32 %v4970_v38, %v4970_v38 }
 0x1a8   : > { %6590 = vst [vmem:[#allocation9_spill] sm:$0xff] %v4961_v30  ;;  %v3936_v32 = vpop.f32.mrb[4].mxu1  ;;  %v1151_v34 = vsel %vm829_vm0, %v1087_v31, 0.0  ;;  %v1088_v43 = vmul.f32 %v4961_v30, %v4961_v30 }
 0x1a9   : > { %v1001_v39 = vadd.f32 %v3936_v32, %v4853_v37  ;;  %v992_v41 = vpop.f32.mrb[5].mxu1  ;;  %v1160_v6 = vsel %vm829_vm0, %v1090_v57, 0.0 }
 0x1aa   : > { %v993_v45 = vadd.f32 %v4853_v37, %v992_v41  ;;  %1149 = vadd.xlane.f32.xlu0 %v1148_v33  ;;  %1152 = vadd.xlane.f32.xlu1 %v1151_v34  ;;  %v3937_v47 = vpop.f32.mrb[6].mxu1  ;;  %v1154_v55 = vsel %vm829_vm0, %v1088_v43, 0.0 }
 0x1ab   : > { %v995_v49 = vpop.f32.mrb[7].mxu1  ;;  %v1004_v51 = vadd.f32 %v3937_v47, %v4853_v37  ;;  %v4985_v54 = vmax.f32 %v1001_v39, 0.0 }
 0x1ac   : > { %v4978_v50 = vmax.f32 %v993_v45, 0.0  ;;  %v996_v52 = vadd.f32 %v4853_v37, %v995_v49 }
 0x1ad   : > { %6593 = vst [vmem:[#allocation12_spill] sm:$0xff] %v4985_v54  ;;  %v4995_v60 = vmax.f32 %v1004_v51, 0.0  ;;  %v1093_v10 = vmul.f32 %v4985_v54, %v4985_v54 }
 0x1ae   : > { %6592 = vst [vmem:[#allocation11_spill] sm:$0xff] %v4978_v50  ;;  %v4991_v58 = vmax.f32 %v996_v52, 0.0  ;;  %1155 = vadd.xlane.f32.xlu0 %v1154_v55  ;;  %1158 = vadd.xlane.f32.xlu1 %v1157_v56  ;;  %v1091_v59 = vmul.f32 %v4978_v50, %v4978_v50 }
 0x1af   : > { %6595 = vst [vmem:[#allocation14_spill] sm:$0xff] %v4995_v60  ;;  %v1094_v16 = vmul.f32 %v4995_v60, %v4995_v60  ;;  %v1169_v23 = vsel %vm829_vm0, %v1093_v10, 0.0 }
 0x1b0   : > { %6594 = vst [vmem:[#allocation13_spill] sm:$0xff] %v4991_v58  ;;  %v3940_v40 = vpop.f32.mrb[8].mxu1  ;;  %v1163_v61 = vsel %vm829_vm0, %v1091_v59, 0.0  ;;  %v1092_v9 = vmul.f32 %v4991_v58, %v4991_v58 }
 0x1b1   : > { %v1017_v1 = vadd.f32 %v3940_v40, %v4853_v37  ;;  %v1008_v3 = vpop.f32.mrb[9].mxu1  ;;  %v1172_v31 = vsel %vm829_vm0, %v1094_v16, 0.0 }
 0x1b2   : > { %v1009_v11 = vadd.f32 %v4853_v37, %v1008_v3  ;;  %1161 = vadd.xlane.f32.xlu0 %v1160_v6  ;;  %1164 = vadd.xlane.f32.xlu1 %v1163_v61  ;;  %v3941_v12 = vpop.f32.mrb[10].mxu1  ;;  %v1166_v22 = vsel %vm829_vm0, %v1092_v9, 0.0 }
 0x1b3   : > { %v1011_v13 = vpop.f32.mrb[11].mxu1  ;;  %v5010_v18 = vmax.f32 %v1017_v1, 0.0  ;;  %v1020_v19 = vadd.f32 %v3941_v12, %v4853_v37 }
 0x1b4   : > { %v5005_v14 = vmax.f32 %v1009_v11, 0.0  ;;  %v1012_v15 = vadd.f32 %v4853_v37, %v1011_v13 }
 0x1b5   : > { %6597 = vst [vmem:[#allocation16_spill] sm:$0xff] %v5010_v18  ;;  %v5021_v33 = vmax.f32 %v1020_v19, 0.0  ;;  %v1097_v41 = vmul.f32 %v5010_v18, %v5010_v18 }
 0x1b6   : > { %6596 = vst [vmem:[#allocation15_spill] sm:$0xff] %v5005_v14  ;;  %v5015_v26 = vmax.f32 %v1012_v15, 0.0  ;;  %1167 = vadd.xlane.f32.xlu0 %v1166_v22  ;;  %1170 = vadd.xlane.f32.xlu1 %v1169_v23  ;;  %v1095_v28 = vmul.f32 %v5005_v14, %v5005_v14 }
 0x1b7   : > { %6599 = vst [vmem:[#allocation18_spill] sm:$0xff] %v5021_v33  ;;  %v1181_v55 = vsel %vm829_vm0, %v1097_v41, 0.0  ;;  %v1098_v56 = vmul.f32 %v5021_v33, %v5021_v33 }
 0x1b8   : > { %6598 = vst [vmem:[#allocation17_spill] sm:$0xff] %v5015_v26  ;;  %v3944_v29 = vpop.f32.mrb[12].mxu1  ;;  %v1175_v32 = vsel %vm829_vm0, %v1095_v28, 0.0  ;;  %v1096_v39 = vmul.f32 %v5015_v26, %v5015_v26 }
 0x1b9   : > { %v1033_v34 = vadd.f32 %v3944_v29, %v4853_v37  ;;  %v1024_v35 = vpop.f32.mrb[13].mxu1 }
 0x1ba   : > { %v1025_v43 = vadd.f32 %v4853_v37, %v1024_v35  ;;  %1173 = vadd.xlane.f32.xlu0 %v1172_v31  ;;  %1176 = vadd.xlane.f32.xlu1 %v1175_v32  ;;  %v3945_v44 = vpop.f32.mrb[14].mxu1  ;;  %v1178_v53 = vsel %vm829_vm0, %v1096_v39, 0.0 }
 0x1bb   : > { %v1036_v45 = vadd.f32 %v3945_v44, %v4853_v37  ;;  %v1027_v47 = vpop.f32.mrb[15].mxu1  ;;  %v5033_v52 = vmax.f32 %v1033_v34, 0.0 }
 0x1bc   : > { %v5030_v49 = vmax.f32 %v1025_v43, 0.0  ;;  %v1028_v51 = vadd.f32 %v4853_v37, %v1027_v47  ;;  %v1184_v37 = vsel %vm829_vm0, %v1098_v56, 0.0 }
 0x1bd   : > { %v5044_v61 = vmax.f32 %v1036_v45, 0.0  ;;  %v1101_v3 = vmul.f32 %v5033_v52, %v5033_v52 }
 0x1be   : > { %6600 = vst [vmem:[#allocation19_spill] sm:$0xff] %v5030_v49  ;;  %v5039_v57 = vmax.f32 %v1028_v51, 0.0  ;;  %1179 = vadd.xlane.f32.xlu0 %v1178_v53  ;;  %1182 = vadd.xlane.f32.xlu1 %v1181_v55  ;;  %v1099_v59 = vmul.f32 %v5030_v49, %v5030_v49 }
 0x1bf   : > { %v1193_v9 = vsel %vm829_vm0, %v1101_v3, 0.0  ;;  %v1102_v10 = vmul.f32 %v5044_v61, %v5044_v61 }
 0x1c0   : > { %6601 = vst [vmem:[#allocation20_spill] sm:$0xff] %v5039_v57  ;;  %v1187_v40 = vsel %vm829_vm0, %v1099_v59, 0.0  ;;  %v1100_v1 = vmul.f32 %v5039_v57, %v5039_v57 }
 0x1c1   : > { %v1196_v11 = vsel %vm829_vm0, %v1102_v10, 0.0 }
 0x1c2   : > { %1185 = vadd.xlane.f32.xlu0 %v1184_v37  ;;  %1188 = vadd.xlane.f32.xlu1 %v1187_v40  ;;  %v1190_v6 = vsel %vm829_vm0, %v1100_v1, 0.0 }
 0x1c6   : > { %1191 = vadd.xlane.f32.xlu0 %v1190_v6  ;;  %1194 = vadd.xlane.f32.xlu1 %v1193_v9 }
 0x1ca   : > { %1197 = vadd.xlane.f32.xlu0 %v1196_v11 }
 0x217   : > { %v1105_v12 = vpop.xlane.xlu0 %1104 }
 0x218   : > { %vm1199_vm1 = vcmp.eq.f32.partialorder %v1105_v12, 0.0 }
 0x219   : > { %v1231_v13 = vsel %vm1199_vm1, 1.0, %v1105_v12  ;;  %v1108_v15 = vpop.xlane.xlu1 %1107 }
 0x21a   : > { %4192 = vrsqrt.f32 %v1231_v13  ;;  %vm1200_vm2 = vcmp.eq.f32.partialorder %v1108_v15, 0.0 }
 0x21b   : > { %v1232_v16 = vsel %vm1200_vm2, 1.0, %v1108_v15  ;;  %v1111_v19 = vpop.xlane.xlu0 %1110 }
 0x21c   : > { %4194 = vrsqrt.f32 %v1232_v16  ;;  %vm1201_vm3 = vcmp.eq.f32.partialorder %v1111_v19, 0.0 }
 0x21d   : > { %v1233_v22 = vsel %vm1201_vm3, 1.0, %v1111_v19 }
 0x21e   : > { %4196 = vrsqrt.f32 %v1233_v22 }
 0x21f   : > { %v1117_v23 = vpop.xlane.xlu1 %1116  ;;  %v1114_v28 = vpop.xlane.xlu0 %1113 }
 0x220   : > { %vm1203_vm4 = vcmp.eq.f32.partialorder %v1117_v23, 0.0  ;;  %vm1202_vm5 = vcmp.eq.f32.partialorder %v1114_v28, 0.0 }
 0x221   : > { %v1234_v29 = vsel %vm1202_vm5, 1.0, %v1114_v28  ;;  %v1235_v31 = vsel %vm1203_vm4, 1.0, %v1117_v23 }
 0x222   : > { %4198 = vrsqrt.f32 %v1234_v29 }
 0x223   : > { %v1123_v32 = vpop.xlane.xlu1 %1122  ;;  %v1120_v34 = vpop.xlane.xlu0 %1119  ;;  %4200 = vrsqrt.f32 %v1235_v31 }
 0x224   : > { %v4193_v35 = vpop.eup %4192  ;;  %vm1205_vm6 = vcmp.eq.f32.partialorder %v1123_v32, 0.0  ;;  %vm1204_vm7 = vcmp.eq.f32.partialorder %v1120_v34, 0.0 }
 0x225   : > { %v1236_v39 = vsel %vm1204_vm7, 1.0, %v1120_v34  ;;  %v1237_v43 = vsel %vm1205_vm6, 1.0, %v1123_v32  ;;  %v1295_v47 = vmul.f32 %v4193_v35, %v4859_v2 }
 0x226   : > { %v4195_v41 = vpop.eup %4194  ;;  %4202 = vrsqrt.f32 %v1236_v39 }
 0x227   : > { %v1129_v44 = vpop.xlane.xlu1 %1128  ;;  %v1126_v45 = vpop.xlane.xlu0 %1125  ;;  %v1296_v51 = vmul.f32 %v4195_v41, %v4863_v5  ;;  %4204 = vrsqrt.f32 %v1237_v43 }
 0x228   : > { %vm1207_vm8 = vcmp.eq.f32.partialorder %v1129_v44, 0.0  ;;  %vm1206_vm9 = vcmp.eq.f32.partialorder %v1126_v45, 0.0  ;;  %v4197_v59 = vpop.eup %4196 }
 0x229   : > { %v1238_v53 = vsel %vm1206_vm9, 1.0, %v1126_v45  ;;  %v1327_v55 = vpack.c.bf16 %v1296_v51, %v1295_v47  ;;  %v1239_v56 = vsel %vm1207_vm8, 1.0, %v1129_v44  ;;  %v1297_v6 = vmul.f32 %v4197_v59, %v4857_v0 }
 0x22a   : > { %4206 = vrsqrt.f32 %v1238_v53 }
 0x22b   : > { %v1135_v40 = vpop.xlane.xlu1 %1134  ;;  %3954 = vmatprep.mubr.msk.bf16.mxu1 %vm829_vm0, %v1327_v55  ;;  %v1132_v37 = vpop.xlane.xlu0 %1131  ;;  %4208 = vrsqrt.f32 %v1239_v56 }
 0x22c   : > { %vm1209_vm10 = vcmp.eq.f32.partialorder %v1135_v40, 0.0  ;;  %vm1208_vm11 = vcmp.eq.f32.partialorder %v1132_v37, 0.0  ;;  %v4199_v1 = vpop.eup %4198 }
 0x22d   : > { %v1240_v3 = vsel %vm1208_vm11, 1.0, %v1132_v37  ;;  %v1298_v9 = vmul.f32 %v4199_v1, %v4869_v8  ;;  %v1241_v10 = vsel %vm1209_vm10, 1.0, %v1135_v40  ;;  %v4201_v11 = vpop.eup %4200 }
 0x22e   : > { %4210 = vrsqrt.f32 %v1240_v3  ;;  %v1299_v23 = vmul.f32 %v4201_v11, %v4880_v20 }
 0x22f   : > { %v1141_v12 = vpop.xlane.xlu1 %1140  ;;  %v1138_v13 = vpop.xlane.xlu0 %1137  ;;  %v1328_v15 = vpack.c.bf16 %v1298_v9, %v1297_v6  ;;  %4212 = vrsqrt.f32 %v1241_v10 }
 0x230   : > { %vm1211_vm12 = vcmp.eq.f32.partialorder %v1141_v12, 0.0  ;;  %vm1210_vm13 = vcmp.eq.f32.partialorder %v1138_v13, 0.0  ;;  %v4203_v16 = vpop.eup %4202 }
 0x231   : > { %v1242_v19 = vsel %vm1210_vm13, 1.0, %v1138_v13  ;;  %v1243_v22 = vsel %vm1211_vm12, 1.0, %v1141_v12  ;;  %3955 = vmatmul.mubr.msk.bf16.vlgmr.msra.gmra.mrb[16].mxu1 %vm829_vm0, %v1328_v15  ;;  %v1300_v28 = vmul.f32 %v4203_v16, %v4886_v24  ;;  %v4205_v29 = vpop.eup %4204 }
 0x232   : > { %4214 = vrsqrt.f32 %v1242_v19  ;;  %v1301_v43 = vmul.f32 %v4205_v29, %v4877_v17 }
 0x233   : > { %v1147_v31 = vpop.xlane.xlu1 %1146  ;;  %v1144_v32 = vpop.xlane.xlu0 %1143  ;;  %v1329_v34 = vpack.c.bf16 %v1300_v28, %v1299_v23  ;;  %4216 = vrsqrt.f32 %v1243_v22 }
 0x234   : > { %vm1213_vm14 = vcmp.eq.f32.partialorder %v1147_v31, 0.0  ;;  %vm1212_vm15 = vcmp.eq.f32.partialorder %v1144_v32, 0.0  ;;  %v4207_v35 = vpop.eup %4206 }
 0x235   : > { %v1244_v39 = vsel %vm1212_vm15, 1.0, %v1144_v32  ;;  %v1245_v41 = vsel %vm1213_vm14, 1.0, %v1147_v31  ;;  %3958 = vmatprep.mubr.msk.bf16.mxu1 %vm829_vm0, %v1329_v34  ;;  %v1302_v44 = vmul.f32 %v4207_v35, %v4892_v27  ;;  %v4209_v45 = vpop.eup %4208 }
 0x236   : > { %4218 = vrsqrt.f32 %v1244_v39  ;;  %v1303_v40 = vmul.f32 %v4209_v45, %v4904_v42 }
 0x237   : > { %v1153_v47 = vpop.xlane.xlu1 %1152  ;;  %v1150_v51 = vpop.xlane.xlu0 %1149  ;;  %v1330_v53 = vpack.c.bf16 %v1302_v44, %v1301_v43  ;;  %4220 = vrsqrt.f32 %v1245_v41 }
 0x238   : > { %vm1215_vm1 = vcmp.eq.f32.partialorder %v1153_v47, 0.0  ;;  %vm1214_vm2 = vcmp.eq.f32.partialorder %v1150_v51, 0.0  ;;  %v4211_v55 = vpop.eup %4210 }
 0x239   : > { %v1246_v56 = vsel %vm1214_vm2, 1.0, %v1150_v51  ;;  %v1247_v59 = vsel %vm1215_vm1, 1.0, %v1153_v47  ;;  %3959 = vmatmul.mubr.msk.bf16.gmra.mrb[20].mxu1 %vm829_vm0, %v1330_v53  ;;  %v1304_v37 = vmul.f32 %v4211_v55, %v4910_v46  ;;  %v4213_v1 = vpop.eup %4212 }
 0x23a   : > { %4222 = vrsqrt.f32 %v1246_v56  ;;  %v1305_v13 = vmul.f32 %v4213_v1, %v4900_v36 }
 0x23b   : > { %v1159_v3 = vpop.xlane.xlu1 %1158  ;;  %v1156_v6 = vpop.xlane.xlu0 %1155  ;;  %v1331_v9 = vpack.c.bf16 %v1304_v37, %v1303_v40  ;;  %4224 = vrsqrt.f32 %v1247_v59 }
 0x23c   : > { %vm1217_vm3 = vcmp.eq.f32.partialorder %v1159_v3, 0.0  ;;  %vm1216_vm4 = vcmp.eq.f32.partialorder %v1156_v6, 0.0  ;;  %v4215_v10 = vpop.eup %4214 }
 0x23d   : > { %v1248_v11 = vsel %vm1216_vm4, 1.0, %v1156_v6  ;;  %v1249_v12 = vsel %vm1217_vm3, 1.0, %v1159_v3  ;;  %3962 = vmatprep.mubr.msk.bf16.mxu1 %vm829_vm0, %v1331_v9  ;;  %v1306_v15 = vmul.f32 %v4215_v10, %v4914_v48  ;;  %v4217_v16 = vpop.eup %4216 }
 0x23e   : > { %4226 = vrsqrt.f32 %v1248_v11  ;;  %v1307_v32 = vmul.f32 %v4217_v16, %v4933_v63 }
 0x23f   : > { %v1165_v19 = vpop.xlane.xlu1 %1164  ;;  %v1162_v22 = vpop.xlane.xlu0 %1161  ;;  %v1332_v23 = vpack.c.bf16 %v1306_v15, %v1305_v13  ;;  %4228 = vrsqrt.f32 %v1249_v12 }
 0x240   : > { %vm1219_vm5 = vcmp.eq.f32.partialorder %v1165_v19, 0.0  ;;  %vm1218_vm6 = vcmp.eq.f32.partialorder %v1162_v22, 0.0  ;;  %v4219_v28 = vpop.eup %4218 }
 0x241   : > { %v1250_v29 = vsel %vm1218_vm6, 1.0, %v1162_v22  ;;  %v1251_v31 = vsel %vm1219_vm5, 1.0, %v1165_v19  ;;  %3963 = vmatmul.mubr.msk.bf16.gmra.mrb[24].mxu1 %vm829_vm0, %v1332_v23  ;;  %v1308_v34 = vmul.f32 %v4219_v28, %v4937_v4  ;;  %v4221_v35 = vpop.eup %4220 }
 0x242   : > { %4230 = vrsqrt.f32 %v1250_v29  ;;  %v1309_v51 = vmul.f32 %v4221_v35, %v4931_v62 }
 0x243   : > { %v1171_v39 = vpop.xlane.xlu1 %1170  ;;  %v1168_v41 = vpop.xlane.xlu0 %1167  ;;  %v1333_v43 = vpack.c.bf16 %v1308_v34, %v1307_v32  ;;  %4232 = vrsqrt.f32 %v1251_v31 }
 0x244   : > { %vm1221_vm7 = vcmp.eq.f32.partialorder %v1171_v39, 0.0  ;;  %vm1220_vm8 = vcmp.eq.f32.partialorder %v1168_v41, 0.0  ;;  %v4223_v44 = vpop.eup %4222 }
 0x245   : > { %v1252_v45 = vsel %vm1220_vm8, 1.0, %v1168_v41  ;;  %v1253_v47 = vsel %vm1221_vm7, 1.0, %v1171_v39  ;;  %3966 = vmatprep.mubr.msk.bf16.mxu1 %vm829_vm0, %v1333_v43  ;;  %v1310_v53 = vmul.f32 %v4223_v44, %v4941_v7  ;;  %v4225_v55 = vpop.eup %4224 }
 0x246   : > { %4234 = vrsqrt.f32 %v1252_v45  ;;  %v1311_v6 = vmul.f32 %v4225_v55, %v4951_v21 }
 0x247   : > { %v1177_v56 = vpop.xlane.xlu1 %1176  ;;  %v1174_v59 = vpop.xlane.xlu0 %1173  ;;  %v1334_v40 = vpack.c.bf16 %v1310_v53, %v1309_v51  ;;  %4236 = vrsqrt.f32 %v1253_v47 }
 0x248   : > { %vm1223_vm9 = vcmp.eq.f32.partialorder %v1177_v56, 0.0  ;;  %vm1222_vm10 = vcmp.eq.f32.partialorder %v1174_v59, 0.0  ;;  %v4227_v37 = vpop.eup %4226 }
 0x249   : > { %v1254_v1 = vsel %vm1222_vm10, 1.0, %v1174_v59  ;;  %v1255_v3 = vsel %vm1223_vm9, 1.0, %v1177_v56  ;;  %3967 = vmatmul.mubr.msk.bf16.gmra.mrb[28].mxu1 %vm829_vm0, %v1334_v40  ;;  %v1312_v9 = vmul.f32 %v4227_v37, %v4961_v30  ;;  %v4229_v10 = vpop.eup %4228 }
 0x24a   : > { %4238 = vrsqrt.f32 %v1254_v1  ;;  %v1313_v22 = vmul.f32 %v4229_v10, %v4956_v25 }
 0x24b   : > { %v1183_v11 = vpop.xlane.xlu1 %1182  ;;  %v1180_v12 = vpop.xlane.xlu0 %1179  ;;  %v1335_v13 = vpack.c.bf16 %v1312_v9, %v1311_v6  ;;  %4240 = vrsqrt.f32 %v1255_v3 }
 0x24c   : > { %vm1225_vm11 = vcmp.eq.f32.partialorder %v1183_v11, 0.0  ;;  %vm1224_vm12 = vcmp.eq.f32.partialorder %v1180_v12, 0.0  ;;  %v4231_v15 = vpop.eup %4230 }
 0x24d   : > { %v1256_v16 = vsel %vm1224_vm12, 1.0, %v1180_v12  ;;  %v1257_v19 = vsel %vm1225_vm11, 1.0, %v1183_v11  ;;  %3970 = vmatprep.mubr.msk.bf16.mxu1 %vm829_vm0, %v1335_v13  ;;  %v1314_v23 = vmul.f32 %v4231_v15, %v4970_v38  ;;  %v4233_v28 = vpop.eup %4232 }
 0x24e   : > { %4242 = vrsqrt.f32 %v1256_v16  ;;  %v1315_v41 = vmul.f32 %v4233_v28, %v4978_v50 }
 0x24f   : > { %v1189_v29 = vpop.xlane.xlu1 %1188  ;;  %v1186_v31 = vpop.xlane.xlu0 %1185  ;;  %v1336_v32 = vpack.c.bf16 %v1314_v23, %v1313_v22  ;;  %4244 = vrsqrt.f32 %v1257_v19 }
 0x250   : > { %vm1227_vm13 = vcmp.eq.f32.partialorder %v1189_v29, 0.0  ;;  %vm1226_vm14 = vcmp.eq.f32.partialorder %v1186_v31, 0.0  ;;  %v4235_v34 = vpop.eup %4234 }
 0x251   : > { %v1258_v35 = vsel %vm1226_vm14, 1.0, %v1186_v31  ;;  %v1259_v39 = vsel %vm1227_vm13, 1.0, %v1189_v29  ;;  %3971 = vmatmul.mubr.msk.bf16.gmra.mrb[32].mxu1 %vm829_vm0, %v1336_v32  ;;  %v1316_v43 = vmul.f32 %v4235_v34, %v4991_v58  ;;  %v4237_v44 = vpop.eup %4236 }
 0x252   : > { %4246 = vrsqrt.f32 %v1258_v35  ;;  %v1317_v59 = vmul.f32 %v4237_v44, %v4985_v54  ;;  %v4176_v44 = vld [vmem:[%s6602_s2] sm:$0xff]  }
 0x253   : > { %v1195_v45 = vpop.xlane.xlu1 %1194  ;;  %v1192_v47 = vpop.xlane.xlu0 %1191  ;;  %v1337_v51 = vpack.c.bf16 %v1316_v43, %v1315_v41  ;;  %4248 = vrsqrt.f32 %v1259_v39  ;;  %3986 = vmatprep.subr.bf16.mxu0 %v4176_v44 }
 0x254   : > { %vm1229_vm15 = vcmp.eq.f32.partialorder %v1195_v45, 0.0  ;;  %vm1228_vm1 = vcmp.eq.f32.partialorder %v1192_v47, 0.0  ;;  %v4239_v53 = vpop.eup %4238  ;;  %3987 = vmatpush3.bf16.msra.mxu0 %v4176_v44 }
 0x255   : > { %v1261_v55 = vsel %vm1229_vm15, 1.0, %v1195_v45  ;;  %v1260_v56 = vsel %vm1228_vm1, 1.0, %v1192_v47  ;;  %3974 = vmatprep.mubr.msk.bf16.mxu1 %vm829_vm0, %v1337_v51  ;;  %v1318_v40 = vmul.f32 %v4239_v53, %v4995_v60  ;;  %v4241_v37 = vpop.eup %4240  ;;  %v4177_v45 = vld [vmem:[%s6602_s2 + $0x8] sm:$0xff]   ;;  %v4178_v47 = vld [vmem:[%s6602_s2 + $0x10] sm:$0xff]  }
 0x256   : > { %4250 = vrsqrt.f32 %v1260_v56  ;;  %v1319_v10 = vmul.f32 %v4241_v37, %v5005_v14  ;;  %3988 = vmatprep.subr.bf16.mxu0 %v4177_v45 }
 0x257   : > { %v1198_v1 = vpop.xlane.xlu0 %1197  ;;  %4252 = vrsqrt.f32 %v1261_v55  ;;  %v1338_v3 = vpack.c.bf16 %v1318_v40, %v1317_v59 }
 0x258   : > { %vm1230_vm2 = vcmp.eq.f32.partialorder %v1198_v1, 0.0  ;;  %v4243_v6 = vpop.eup %4242  ;;  %3989 = vmatpush3.bf16.msra.mxu0 %v4177_v45 }
 0x259   : > { %v1262_v9 = vsel %vm1230_vm2, 1.0, %v1198_v1  ;;  %3975 = vmatmul.mubr.msk.bf16.gmra.mrb[36].mxu1 %vm829_vm0, %v1338_v3  ;;  %v1320_v11 = vmul.f32 %v4243_v6, %v5015_v26  ;;  %v4245_v12 = vpop.eup %4244  ;;  %3990 = vmatprep.subr.bf16.mxu0 %v4178_v47 }
 0x25a   : > { %4254 = vrsqrt.f32 %v1262_v9  ;;  %v1321_v16 = vmul.f32 %v4245_v12, %v5010_v18 }
 0x25b   : > { %v1339_v13 = vpack.c.bf16 %v1320_v11, %v1319_v10 }
 0x25c   : > { %v4247_v15 = vpop.eup %4246  ;;  %3991 = vmatpush3.bf16.msra.mxu0 %v4178_v47 }
 0x25d   : > { %3978 = vmatprep.mubr.msk.bf16.mxu1 %vm829_vm0, %v1339_v13  ;;  %v1322_v19 = vmul.f32 %v4247_v15, %v5021_v33  ;;  %v4249_v22 = vpop.eup %4248 }
 0x25e   : > { %v1323_v31 = vmul.f32 %v4249_v22, %v5030_v49 }
 0x25f   : > { %v1340_v23 = vpack.c.bf16 %v1322_v19, %v1321_v16 }
 0x260   : > { %v4251_v28 = vpop.eup %4250 }
 0x261   : > { %v4253_v29 = vpop.eup %4252  ;;  %3979 = vmatmul.mubr.msk.bf16.gmra.mrb[40].mxu1 %vm829_vm0, %v1340_v23  ;;  %v1324_v32 = vmul.f32 %v4251_v28, %v5039_v57 }
 0x262   : > { %v1325_v39 = vmul.f32 %v4253_v29, %v5033_v52 }
 0x263   : > { %v1341_v35 = vpack.c.bf16 %v1324_v32, %v1323_v31 }
 0x264   : > { %v4255_v34 = vpop.eup %4254 }
 0x265   : > { %v1326_v41 = vmul.f32 %v4255_v34, %v5044_v61  ;;  %3982 = vmatprep.mubr.msk.bf16.mxu1 %vm829_vm0, %v1341_v35 }
 0x267   : > { %v1342_v43 = vpack.c.bf16 %v1326_v41, %v1325_v39  ;;  %v6550_v39 = vmov 0.0  }
 0x269   : > { %3983 = vmatmul.mubr.msk.bf16.gmra.mrb[44].mxu1 %vm829_vm0, %v1342_v43 }
 0x304   : > { %v3956_v51 = vpop.f32.mrb[16].mxu1 }
 0x305   : > { %v1586_v53 = vmul.f32 30.0, %v3956_v51  ;;  %v1457_v55 = vpop.f32.mrb[17].mxu1  ;;  %vm1682_vm5 = vcmp.gt.f32.partialorder %v3956_v51, 0.0 }
 0x306   : > { %v1584_v56 = vmul.f32 30.0, %v1457_v55  ;;  %v3957_v59 = vpop.f32.mrb[18].mxu1  ;;  %vm1680_vm3 = vcmp.gt.f32.partialorder %v1457_v55, 0.0 }
 0x307   : > { %v1620_v40 = vmul.f32 1.442695, %v1586_v53  ;;  %v1587_v37 = vmul.f32 30.0, %v3957_v59  ;;  %v1460_v1 = vpop.f32.mrb[19].mxu1  ;;  %v3710_v41 = vsel %vm1680_vm3, 1.0, %v6550_v39  ;;  %vm1683_vm6 = vcmp.gt.f32.partialorder %v3957_v59, 0.0 }
 0x308   : > { %v1616_v3 = vmul.f32 1.442695, %v1584_v56  ;;  %v1585_v6 = vmul.f32 30.0, %v1460_v1  ;;  %vm1681_vm4 = vcmp.gt.f32.partialorder %v1460_v1, 0.0 }
 0x309   : > { %v1622_v9 = vmul.f32 1.442695, %v1587_v37 }
 0x30a   : > { %4256 = vpow2.f32 %v1616_v3  ;;  %v1618_v10 = vmul.f32 1.442695, %v1585_v6 }
 0x30b   : > { %4258 = vpow2.f32 %v1620_v40  ;;  %v3711_v40 = vsel %vm1681_vm4, 1.0, %v6550_v39 }
 0x30c   : > { %4260 = vpow2.f32 %v1618_v10  ;;  %v5113_v11 = vpop.f32.mrb[20].mxu1 }
 0x30d   : > { %v1590_v12 = vmul.f32 30.0, %v5113_v11  ;;  %v1473_v13 = vpop.f32.mrb[21].mxu1  ;;  %4262 = vpow2.f32 %v1622_v9  ;;  %vm1686_vm9 = vcmp.gt.f32.partialorder %v5113_v11, 0.0 }
 0x30e   : > { %v1588_v15 = vmul.f32 30.0, %v1473_v13  ;;  %v5116_v16 = vpop.f32.mrb[22].mxu1  ;;  %vm1684_vm7 = vcmp.gt.f32.partialorder %v1473_v13, 0.0 }
 0x30f   : > { %v1628_v19 = vmul.f32 1.442695, %v1590_v12  ;;  %v1591_v22 = vmul.f32 30.0, %v5116_v16  ;;  %v1476_v23 = vpop.f32.mrb[23].mxu1  ;;  %v3714_v13 = vsel %vm1684_vm7, 1.0, %v6550_v39  ;;  %vm1687_vm10 = vcmp.gt.f32.partialorder %v5116_v16, 0.0 }
 0x310   : > { %v1624_v28 = vmul.f32 1.442695, %v1588_v15  ;;  %v1589_v29 = vmul.f32 30.0, %v1476_v23  ;;  %vm1685_vm8 = vcmp.gt.f32.partialorder %v1476_v23, 0.0  ;;  %v3716_v23 = vsel %vm1686_vm9, 1.0, %v6550_v39 }
 0x311   : > { %v1630_v31 = vmul.f32 1.442695, %v1591_v22 }
 0x312   : > { %4264 = vpow2.f32 %v1624_v28  ;;  %v1626_v32 = vmul.f32 1.442695, %v1589_v29  ;;  %v3713_v29 = vsel %vm1683_vm6, 1.0, %v6550_v39 }
 0x313   : > { %4266 = vpow2.f32 %v1628_v19  ;;  %v3712_v19 = vsel %vm1682_vm5, 1.0, %v6550_v39 }
 0x314   : > { %v4257_v34 = vpop.eup %4256  ;;  %4268 = vpow2.f32 %v1626_v32  ;;  %v5119_v35 = vpop.f32.mrb[24].mxu1 }
 0x315   : > { %v4259_v43 = vpop.eup %4258  ;;  %v1594_v44 = vmul.f32 30.0, %v5119_v35  ;;  %v5123_v45 = vpop.f32.mrb[25].mxu1  ;;  %v5125_v47 = vmul.f32 %v4257_v34, %v3710_v41  ;;  %4270 = vpow2.f32 %v1630_v31  ;;  %vm1690_vm13 = vcmp.gt.f32.partialorder %v5119_v35, 0.0 }
 0x316   : > { %v4261_v53 = vpop.eup %4260  ;;  %v1592_v55 = vmul.f32 30.0, %v5123_v45  ;;  %v5128_v56 = vpop.f32.mrb[26].mxu1  ;;  %v5142_v1 = vmul.f32 %v4259_v43, %v3712_v19  ;;  %vm1688_vm11 = vcmp.gt.f32.partialorder %v5123_v45, 0.0 }
 0x317   : > { %v1636_v37 = vmul.f32 1.442695, %v1594_v44  ;;  %v1595_v3 = vmul.f32 30.0, %v5128_v56  ;;  %1808 = vadd.xlane.f32.xlu1 %v5125_v47  ;;  %v5134_v6 = vpop.f32.mrb[27].mxu1  ;;  %v5136_v9 = vmul.f32 %v4261_v53, %v3711_v40  ;;  %v4263_v10 = vpop.eup %4262  ;;  %v3715_v40 = vsel %vm1685_vm8, 1.0, %v6550_v39 }
 0x318   : > { %v1632_v12 = vmul.f32 1.442695, %v1592_v55  ;;  %v1593_v15 = vmul.f32 30.0, %v5134_v6  ;;  %v5147_v31 = vmul.f32 %v4263_v10, %v3713_v29  ;;  %vm1689_vm12 = vcmp.gt.f32.partialorder %v5134_v6, 0.0 }
 0x319   : > { %1810 = vadd.xlane.f32.xlu0 %v5136_v9  ;;  %v1638_v22 = vmul.f32 1.442695, %v1595_v3  ;;  %vm1691_vm14 = vcmp.gt.f32.partialorder %v5128_v56, 0.0 }
 0x31a   : > { %4272 = vpow2.f32 %v1632_v12  ;;  %v1634_v28 = vmul.f32 1.442695, %v1593_v15 }
 0x31b   : > { %4274 = vpow2.f32 %v1636_v37  ;;  %1812 = vadd.xlane.f32.xlu1 %v5142_v1 }
 0x31c   : > { %v4265_v32 = vpop.eup %4264  ;;  %4276 = vpow2.f32 %v1634_v28  ;;  %v5149_v51 = vpop.f32.mrb[28].mxu1 }
 0x31d   : > { %v4267_v34 = vpop.eup %4266  ;;  %v1598_v41 = vmul.f32 30.0, %v5149_v51  ;;  %1814 = vadd.xlane.f32.xlu0 %v5147_v31  ;;  %v5155_v59 = vpop.f32.mrb[29].mxu1  ;;  %v5157_v43 = vmul.f32 %v4265_v32, %v3714_v13  ;;  %4278 = vpow2.f32 %v1638_v22  ;;  %v3717_v13 = vsel %vm1687_vm10, 1.0, %v6550_v39 }
 0x31e   : > { %v4269_v44 = vpop.eup %4268  ;;  %v1596_v53 = vmul.f32 30.0, %v5155_v59  ;;  %v5160_v55 = vpop.f32.mrb[30].mxu1  ;;  %v5177_v28 = vmul.f32 %v4267_v34, %v3716_v23  ;;  %v3718_v34 = vsel %vm1688_vm11, 1.0, %v6550_v39  ;;  %vm1692_vm15 = vcmp.gt.f32.partialorder %v5155_v59, 0.0 }
 0x31f   : > { %v1644_v37 = vmul.f32 1.442695, %v1598_v41  ;;  %v1599_v3 = vmul.f32 30.0, %v5160_v55  ;;  %1816 = vadd.xlane.f32.xlu1 %v5157_v43  ;;  %v5167_v10 = vpop.f32.mrb[31].mxu1  ;;  %v5169_v12 = vmul.f32 %v4269_v44, %v3715_v40  ;;  %v4271_v15 = vpop.eup %4270  ;;  %v3722_v56 = vsel %vm1692_vm15, 1.0, %v6550_v39 }
 0x320   : > { %v1640_v19 = vmul.f32 1.442695, %v1596_v53  ;;  %v1597_v22 = vmul.f32 30.0, %v5167_v10  ;;  %v5184_v11 = vmul.f32 %v4271_v15, %v3717_v13  ;;  %vm1693_vm1 = vcmp.gt.f32.partialorder %v5167_v10, 0.0 }
 0x321   : > { %1818 = vadd.xlane.f32.xlu0 %v5169_v12  ;;  %v1646_v29 = vmul.f32 1.442695, %v1599_v3  ;;  %vm1694_vm2 = vcmp.gt.f32.partialorder %v5149_v51, 0.0  ;;  %v3723_v59 = vsel %vm1693_vm1, 1.0, %v6550_v39  ;;  %vm1695_vm3 = vcmp.gt.f32.partialorder %v5160_v55, 0.0 }
 0x322   : > { %4280 = vpow2.f32 %v1640_v19  ;;  %v1642_v32 = vmul.f32 1.442695, %v1597_v22  ;;  %v3719_v19 = vsel %vm1689_vm12, 1.0, %v6550_v39 }
 0x323   : > { %4282 = vpow2.f32 %v1644_v37  ;;  %1820 = vadd.xlane.f32.xlu1 %v5177_v28 }
 0x324   : > { %v4273_v41 = vpop.eup %4272  ;;  %4284 = vpow2.f32 %v1642_v32  ;;  %v5186_v45 = vpop.f32.mrb[32].mxu1 }
 0x325   : > { %v4275_v44 = vpop.eup %4274  ;;  %v1602_v53 = vmul.f32 30.0, %v5186_v45  ;;  %1822 = vadd.xlane.f32.xlu0 %v5184_v11  ;;  %v5192_v16 = vpop.f32.mrb[33].mxu1  ;;  %v5194_v40 = vmul.f32 %v4273_v41, %v3718_v34  ;;  %4286 = vpow2.f32 %v1646_v29  ;;  %v4179_v29 = vld [vmem:[%s6602_s2 + $0x18] sm:$0xff]   ;;  %vm1698_vm6 = vcmp.gt.f32.partialorder %v5186_v45, 0.0 }
 0x326   : > { %v4277_v37 = vpop.eup %4276  ;;  %v1600_v3 = vmul.f32 30.0, %v5192_v16  ;;  %v5197_v15 = vpop.f32.mrb[34].mxu1  ;;  %3992 = vmatprep.subr.bf16.mxu0 %v4179_v29  ;;  %vm1696_vm4 = vcmp.gt.f32.partialorder %v5192_v16, 0.0 }
 0x327   : > { %v1652_v22 = vmul.f32 1.442695, %v1602_v53  ;;  %v1603_v23 = vmul.f32 30.0, %v5197_v15  ;;  %1824 = vadd.xlane.f32.xlu1 %v5194_v40  ;;  %v5205_v32 = vpop.f32.mrb[35].mxu1  ;;  %v5207_v13 = vmul.f32 %v4277_v37, %v3719_v19  ;;  %v4279_v41 = vpop.eup %4278  ;;  %v3720_v53 = vsel %vm1690_vm13, 1.0, %v6550_v39  ;;  %3993 = vmatpush3.bf16.msra.mxu0 %v4179_v29 }
 0x328   : > { %v1648_v34 = vmul.f32 1.442695, %v1600_v3  ;;  %v1601_v6 = vmul.f32 30.0, %v5205_v32  ;;  %v5218_v30 = vmul.f32 %v4275_v44, %v3720_v53  ;;  %v3721_v3 = vsel %vm1691_vm14, 1.0, %v6550_v39  ;;  %v4180_v44 = vld [vmem:[%s6602_s2 + $0x20] sm:$0xff]  }
 0x329   : > { %1826 = vadd.xlane.f32.xlu0 %v5207_v13  ;;  %v1654_v37 = vmul.f32 1.442695, %v1603_v23  ;;  %v5225_v35 = vmul.f32 %v4279_v41, %v3721_v3  ;;  %3994 = vmatprep.subr.bf16.mxu0 %v4180_v44  ;;  %vm1697_vm5 = vcmp.gt.f32.partialorder %v5205_v32, 0.0  ;;  %vm1699_vm7 = vcmp.gt.f32.partialorder %v5197_v15, 0.0 }
 0x32a   : > { %4288 = vpow2.f32 %v1648_v34  ;;  %v1650_v19 = vmul.f32 1.442695, %v1601_v6  ;;  %v3727_v16 = vsel %vm1697_vm5, 1.0, %v6550_v39 }
 0x32b   : > { %4290 = vpow2.f32 %v1652_v22  ;;  %1828 = vadd.xlane.f32.xlu1 %v5218_v30  ;;  %3995 = vmatpush3.bf16.msra.mxu0 %v4180_v44  ;;  %v3724_v44 = vsel %vm1694_vm2, 1.0, %v6550_v39 }
 0x32c   : > { %v4281_v53 = vpop.eup %4280  ;;  %4292 = vpow2.f32 %v1650_v19  ;;  %v5230_v23 = vpop.f32.mrb[36].mxu1 }
 0x32d   : > { %v4283_v29 = vpop.eup %4282  ;;  %v1606_v22 = vmul.f32 30.0, %v5230_v23  ;;  %1830 = vadd.xlane.f32.xlu0 %v5225_v35  ;;  %v5238_v41 = vpop.f32.mrb[37].mxu1  ;;  %v5240_v34 = vmul.f32 %v4281_v53, %v3722_v56  ;;  %4294 = vpow2.f32 %v1654_v37  ;;  %v4181_v37 = vld [vmem:[%s6602_s2 + $0x28] sm:$0xff]   ;;  %vm1702_vm10 = vcmp.gt.f32.partialorder %v5230_v23, 0.0 }
 0x32e   : > { %v4285_v6 = vpop.eup %4284  ;;  %v1604_v19 = vmul.f32 30.0, %v5238_v41  ;;  %v5243_v3 = vpop.f32.mrb[38].mxu1  ;;  %3996 = vmatprep.subr.bf16.mxu0 %v4181_v37  ;;  %vm1700_vm8 = vcmp.gt.f32.partialorder %v5238_v41, 0.0 }
 0x32f   : > { %v1660_v21 = vmul.f32 1.442695, %v1606_v22  ;;  %v1607_v57 = vmul.f32 30.0, %v5243_v3  ;;  %1832 = vadd.xlane.f32.xlu1 %v5240_v34  ;;  %v5251_v53 = vpop.f32.mrb[39].mxu1  ;;  %v5253_v56 = vmul.f32 %v4285_v6, %v3723_v59  ;;  %v4287_v49 = vpop.eup %4286  ;;  %v5264_v22 = vmul.f32 %v4283_v29, %v3724_v44  ;;  %3997 = vmatpush3.bf16.msra.mxu0 %v4181_v37  ;;  %v4182_v29 = vld [vmem:[%s6602_s2 + $0x30] sm:$0xff]  }
 0x330   : > { %v1656_v33 = vmul.f32 1.442695, %v1604_v19  ;;  %v1605_v10 = vmul.f32 30.0, %v5251_v53  ;;  %v3725_v19 = vsel %vm1695_vm3, 1.0, %v6550_v39  ;;  %3998 = vmatprep.subr.bf16.mxu0 %v4182_v29  ;;  %vm1701_vm9 = vcmp.gt.f32.partialorder %v5251_v53, 0.0 }
 0x331   : > { %1834 = vadd.xlane.f32.xlu0 %v5253_v56  ;;  %v1662_v6 = vmul.f32 1.442695, %v1607_v57  ;;  %v5271_v51 = vmul.f32 %v4287_v49, %v3725_v19  ;;  %v3726_v57 = vsel %vm1696_vm4, 1.0, %v6550_v39  ;;  %vm1703_vm11 = vcmp.gt.f32.partialorder %v5243_v3, 0.0 }
 0x332   : > { %4296 = vpow2.f32 %v1656_v33  ;;  %v1658_v59 = vmul.f32 1.442695, %v1605_v10 }
 0x333   : > { %4298 = vpow2.f32 %v1660_v21  ;;  %1836 = vadd.xlane.f32.xlu1 %v5264_v22  ;;  %3999 = vmatpush3.bf16.msra.mxu0 %v4182_v29  ;;  %v3728_v29 = vsel %vm1698_vm6, 1.0, %v6550_v39 }
 0x334   : > { %v4289_v44 = vpop.eup %4288  ;;  %4300 = vpow2.f32 %v1658_v59  ;;  %v5276_v33 = vpop.f32.mrb[40].mxu1 }
 0x335   : > { %v4291_v55 = vpop.eup %4290  ;;  %v1610_v21 = vmul.f32 30.0, %v5276_v33  ;;  %1838 = vadd.xlane.f32.xlu0 %v5271_v51  ;;  %v5284_v49 = vpop.f32.mrb[41].mxu1  ;;  %v5286_v37 = vmul.f32 %v4289_v44, %v3726_v57  ;;  %4302 = vpow2.f32 %v1662_v6  ;;  %v4183_v6 = vld [vmem:[%s6602_s2 + $0x38] sm:$0xff]   ;;  %vm1706_vm14 = vcmp.gt.f32.partialorder %v5276_v33, 0.0 }
 0x336   : > { %v4293_v10 = vpop.eup %4292  ;;  %v1608_v59 = vmul.f32 30.0, %v5284_v49  ;;  %v5289_v19 = vpop.f32.mrb[42].mxu1  ;;  %4000 = vmatprep.subr.bf16.mxu0 %v4183_v6  ;;  %vm1704_vm12 = vcmp.gt.f32.partialorder %v5284_v49, 0.0 }
 0x337   : > { %v1668_v18 = vmul.f32 1.442695, %v1610_v21  ;;  %v1611_v26 = vmul.f32 30.0, %v5289_v19  ;;  %1840 = vadd.xlane.f32.xlu1 %v5286_v37  ;;  %v5297_v44 = vpop.f32.mrb[43].mxu1  ;;  %v5299_v57 = vmul.f32 %v4293_v10, %v3727_v16  ;;  %v4295_v14 = vpop.eup %4294  ;;  %v5310_v21 = vmul.f32 %v4291_v55, %v3728_v29  ;;  %4001 = vmatpush3.bf16.msra.mxu0 %v4183_v6 }
 0x338   : > { %v1664_v60 = vmul.f32 1.442695, %v1608_v59  ;;  %v1609_v32 = vmul.f32 30.0, %v5297_v44  ;;  %v3729_v59 = vsel %vm1699_vm7, 1.0, %v6550_v39  ;;  %vm1705_vm13 = vcmp.gt.f32.partialorder %v5297_v44, 0.0 }
 0x339   : > { %1842 = vadd.xlane.f32.xlu0 %v5299_v57  ;;  %v1670_v10 = vmul.f32 1.442695, %v1611_v26  ;;  %v5317_v45 = vmul.f32 %v4295_v14, %v3729_v59  ;;  %v3734_v49 = vsel %vm1704_vm12, 1.0, %v6550_v39  ;;  %v3735_v44 = vsel %vm1705_vm13, 1.0, %v6550_v39 }
 0x33a   : > { %4304 = vpow2.f32 %v1664_v60  ;;  %v1666_v16 = vmul.f32 1.442695, %v1609_v32  ;;  %v3730_v60 = vsel %vm1700_vm8, 1.0, %v6550_v39  ;;  %vm1707_vm15 = vcmp.gt.f32.partialorder %v5289_v19, 0.0 }
 0x33b   : > { %4306 = vpow2.f32 %v1668_v18  ;;  %1844 = vadd.xlane.f32.xlu1 %v5310_v21 }
 0x33c   : > { %v4297_v54 = vpop.eup %4296  ;;  %4308 = vpow2.f32 %v1666_v16  ;;  %v5319_v55 = vpop.f32.mrb[44].mxu1  ;;  %v3731_v16 = vsel %vm1701_vm9, 1.0, %v6550_v39 }
 0x33d   : > { %v4299_v26 = vpop.eup %4298  ;;  %v1614_v15 = vmul.f32 30.0, %v5319_v55  ;;  %1846 = vadd.xlane.f32.xlu0 %v5317_v45  ;;  %v1569_v18 = vpop.f32.mrb[45].mxu1  ;;  %v5327_v6 = vmul.f32 %v4297_v54, %v3730_v60  ;;  %4310 = vpow2.f32 %v1670_v10  ;;  %v3732_v10 = vsel %vm1702_vm10, 1.0, %v6550_v39 }
 0x33e   : > { %v4301_v14 = vpop.eup %4300  ;;  %v1612_v32 = vmul.f32 30.0, %v1569_v18  ;;  %v3985_v29 = vpop.f32.mrb[46].mxu1  ;;  %v5341_v53 = vmul.f32 %v4299_v26, %v3732_v10  ;;  %vm1708_vm1 = vcmp.gt.f32.partialorder %v1569_v18, 0.0  ;;  %vm1710_vm3 = vcmp.gt.f32.partialorder %v5319_v55, 0.0 }
 0x33f   : > { %v1676_v41 = vmul.f32 1.442695, %v1614_v15  ;;  %v1615_v59 = vmul.f32 30.0, %v3985_v29  ;;  %1848 = vadd.xlane.f32.xlu1 %v5327_v6  ;;  %v1572_v58 = vpop.f32.mrb[47].mxu1  ;;  %v5334_v50 = vmul.f32 %v4301_v14, %v3731_v16  ;;  %v4303_v38 = vpop.eup %4302  ;;  %v3733_v14 = vsel %vm1703_vm11, 1.0, %v6550_v39 }
 0x340   : > { %v1672_v54 = vmul.f32 1.442695, %v1612_v32  ;;  %v1613_v60 = vmul.f32 30.0, %v1572_v58  ;;  %v5348_v23 = vmul.f32 %v4303_v38, %v3733_v14  ;;  %vm1709_vm2 = vcmp.gt.f32.partialorder %v1572_v58, 0.0 }
 0x341   : > { %1850 = vadd.xlane.f32.xlu0 %v5334_v50  ;;  %v1678_v15 = vmul.f32 1.442695, %v1615_v59  ;;  %v3737_v59 = vsel %vm1707_vm15, 1.0, %v6550_v39  ;;  %v3739_v14 = vsel %vm1709_vm2, 1.0, %v6550_v39  ;;  %vm1711_vm4 = vcmp.gt.f32.partialorder %v3985_v29, 0.0 }
 0x342   : > { %4312 = vpow2.f32 %v1672_v54  ;;  %v1674_v25 = vmul.f32 1.442695, %v1613_v60  ;;  %v3738_v60 = vsel %vm1708_vm1, 1.0, %v6550_v39  ;;  %v3741_v55 = vsel %vm1711_vm4, 1.0, %v6550_v39  ;;  %v3750_v29 = vld [vmem:[%s6532_s11] ss:$0 sm:$0xff] }
 0x343   : > { %4314 = vpow2.f32 %v1676_v41  ;;  %1852 = vadd.xlane.f32.xlu1 %v5341_v53  ;;  %v3736_v41 = vsel %vm1706_vm14, 1.0, %v6550_v39 }
 0x344   : > { %v4305_v32 = vpop.eup %4304  ;;  %4316 = vpow2.f32 %v1674_v25 }
 0x345   : > { %v4307_v26 = vpop.eup %4306  ;;  %1854 = vadd.xlane.f32.xlu0 %v5348_v23  ;;  %v5353_v16 = vmul.f32 %v4305_v32, %v3734_v49  ;;  %4318 = vpow2.f32 %v1678_v15  ;;  %v3740_v49 = vsel %vm1710_vm3, 1.0, %v6550_v39 }
 0x346   : > { %v4309_v3 = vpop.eup %4308  ;;  %v5362_v33 = vmul.f32 %v4307_v26, %v3736_v41  ;;  %v4186_v41 = vld [vmem:[%s6528_s7 + $0x10] sm:$0xff]  }
 0x347   : > { %1856 = vadd.xlane.f32.xlu1 %v5353_v16  ;;  %v5358_v38 = vmul.f32 %v4309_v3, %v3735_v44  ;;  %v4311_v25 = vpop.eup %4310  ;;  %v4184_v44 = vld [vmem:[%s6528_s7] sm:$0xff]  }
 0x348   : > { %v5366_v54 = vmul.f32 %v4311_v25, %v3737_v59  ;;  %v4185_v25 = vld [vmem:[%s6528_s7 + $0x8] sm:$0xff]   ;;  %4034 = vmatprep.subr.bf16.mxu1 %v4184_v44 }
 0x349   : > { %1858 = vadd.xlane.f32.xlu0 %v5358_v38  ;;  %4035 = vmatpush3.bf16.msra.mxu1 %v4184_v44 }
 0x34a   : > { %4036 = vmatprep.subr.bf16.mxu1 %v4185_v25 }
 0x34b   : > { %1860 = vadd.xlane.f32.xlu1 %v5362_v33 }
 0x34c   : > { %v4313_v19 = vpop.eup %4312 }
 0x34d   : > { %v4315_v10 = vpop.eup %4314  ;;  %1862 = vadd.xlane.f32.xlu0 %v5366_v54  ;;  %v5371_v18 = vmul.f32 %v4313_v19, %v3738_v60  ;;  %4037 = vmatpush3.bf16.msra.mxu1 %v4185_v25 }
 0x34e   : > { %v4317_v15 = vpop.eup %4316  ;;  %v5379_v26 = vmul.f32 %v4315_v10, %v3740_v49  ;;  %4038 = vmatprep.subr.bf16.mxu1 %v4186_v41 }
 0x34f   : > { %1864 = vadd.xlane.f32.xlu1 %v5371_v18  ;;  %v5375_v58 = vmul.f32 %v4317_v15, %v3739_v14  ;;  %v4319_v32 = vpop.eup %4318 }
 0x350   : > { %v5383_v3 = vmul.f32 %v4319_v32, %v3741_v55 }
 0x351   : > { %1866 = vadd.xlane.f32.xlu0 %v5375_v58  ;;  %4039 = vmatpush3.bf16.msra.mxu1 %v4186_v41 }
 0x353   : > { %1868 = vadd.xlane.f32.xlu1 %v5379_v26 }
 0x355   : > { %1870 = vadd.xlane.f32.xlu0 %v5383_v3 }
 0x364   : > { %2215 = vrot.lane.b32.xlu1 %v3750_v29, %s4580_s26 }
 0x3a4   : > { %v1809_v59 = vpop.xlane.xlu1 %1808 }
 0x3a5   : > { %v1872_v19 = vmax.f32 %v1809_v59, 1e-12 }
 0x3a6   : > { %v1811_v60 = vpop.xlane.xlu0 %1810 }
 0x3a7   : > { %4320 = vrcp.f32 %v1872_v19  ;;  %v1873_v10 = vmax.f32 %v1811_v60, 1e-12 }
 0x3a8   : > { %v1813_v15 = vpop.xlane.xlu1 %1812 }
 0x3a9   : > { %4322 = vrcp.f32 %v1873_v10  ;;  %v1874_v14 = vmax.f32 %v1813_v15, 1e-12 }
 0x3aa   : > { %v1815_v32 = vpop.xlane.xlu0 %1814 }
 0x3ab   : > { %4324 = vrcp.f32 %v1874_v14  ;;  %v1875_v49 = vmax.f32 %v1815_v32, 1e-12 }
 0x3ac   : > { %v1817_v55 = vpop.xlane.xlu1 %1816 }
 0x3ad   : > { %4326 = vrcp.f32 %v1875_v49  ;;  %v1876_v29 = vmax.f32 %v1817_v55, 1e-12 }
 0x3ae   : > { %v1819_v44 = vpop.xlane.xlu0 %1818 }
 0x3af   : > { %4328 = vrcp.f32 %v1876_v29  ;;  %v1877_v39 = vmax.f32 %v1819_v44, 1e-12 }
 0x3b0   : > { %v1821_v25 = vpop.xlane.xlu1 %1820 }
 0x3b1   : > { %v4321_v4 = vpop.eup %4320  ;;  %4330 = vrcp.f32 %v1877_v39  ;;  %v1878_v41 = vmax.f32 %v1821_v25, 1e-12 }
 0x3b2   : > { %v1823_v59 = vpop.xlane.xlu0 %1822  ;;  %v5400_v10 = vmul.f32 %v4321_v4, %v5125_v47 }
 0x3b3   : > { %v4323_v63 = vpop.eup %4322  ;;  %4332 = vrcp.f32 %v1878_v41  ;;  %v1879_v19 = vmax.f32 %v1823_v59, 1e-12 }
 0x3b4   : > { %v1825_v60 = vpop.xlane.xlu1 %1824  ;;  %v5403_v15 = vmul.f32 %v4323_v63, %v5136_v9 }
 0x3b5   : > { %v4325_v14 = vpop.eup %4324  ;;  %4334 = vrcp.f32 %v1879_v19  ;;  %v1880_v32 = vmax.f32 %v1825_v60, 1e-12 }
 0x3b6   : > { %v1827_v49 = vpop.xlane.xlu0 %1826  ;;  %v1968_v55 = vpack.c.bf16 %v5403_v15, %v5400_v10  ;;  %v5408_v44 = vmul.f32 %v4325_v14, %v5142_v1 }
 0x3b7   : > { %v4327_v39 = vpop.eup %4326  ;;  %4336 = vrcp.f32 %v1880_v32  ;;  %v1881_v29 = vmax.f32 %v1827_v49, 1e-12 }
 0x3b8   : > { %v5411_v25 = vmul.f32 %v4327_v39, %v5147_v31  ;;  %v1829_v4 = vpop.xlane.xlu1 %1828  ;;  %4002 = vmatprep.mubr.bf16.mxu0 %v1968_v55 }
 0x3b9   : > { %v4329_v63 = vpop.eup %4328  ;;  %4338 = vrcp.f32 %v1881_v29  ;;  %v1882_v47 = vmax.f32 %v1829_v4, 1e-12 }
 0x3ba   : > { %v1831_v9 = vpop.xlane.xlu0 %1830  ;;  %v1969_v41 = vpack.c.bf16 %v5411_v25, %v5408_v44  ;;  %v5416_v1 = vmul.f32 %v4329_v63, %v5157_v43 }
 0x3bb   : > { %v4331_v59 = vpop.eup %4330  ;;  %4340 = vrcp.f32 %v1882_v47  ;;  %v1883_v19 = vmax.f32 %v1831_v9, 1e-12 }
 0x3bc   : > { %v1833_v60 = vpop.xlane.xlu1 %1832  ;;  %4003 = vmatmul.mubr.bf16.vlgmr.msra.gmra.mrb[16].mxu0 %v1969_v41  ;;  %v5419_v31 = vmul.f32 %v4331_v59, %v5169_v12 }
 0x3bd   : > { %v4333_v14 = vpop.eup %4332  ;;  %4342 = vrcp.f32 %v1883_v19  ;;  %v1884_v32 = vmax.f32 %v1833_v60, 1e-12 }
 0x3be   : > { %v1835_v49 = vpop.xlane.xlu0 %1834  ;;  %v1970_v55 = vpack.c.bf16 %v5419_v31, %v5416_v1  ;;  %v5424_v47 = vmul.f32 %v4333_v14, %v5177_v28 }
 0x3bf   : > { %v4335_v39 = vpop.eup %4334  ;;  %4344 = vrcp.f32 %v1884_v32  ;;  %v1885_v29 = vmax.f32 %v1835_v49, 1e-12 }
 0x3c0   : > { %v1837_v4 = vpop.xlane.xlu1 %1836  ;;  %4006 = vmatprep.mubr.bf16.mxu0 %v1970_v55  ;;  %v5427_v43 = vmul.f32 %v4335_v39, %v5184_v11 }
 0x3c1   : > { %v4337_v12 = vpop.eup %4336  ;;  %4346 = vrcp.f32 %v1885_v29  ;;  %v1886_v63 = vmax.f32 %v1837_v4, 1e-12 }
 0x3c2   : > { %v1839_v9 = vpop.xlane.xlu0 %1838  ;;  %v1971_v41 = vpack.c.bf16 %v5427_v43, %v5424_v47  ;;  %v5432_v32 = vmul.f32 %v4337_v12, %v5194_v40 }
 0x3c3   : > { %v4339_v59 = vpop.eup %4338  ;;  %4348 = vrcp.f32 %v1886_v63  ;;  %v1887_v19 = vmax.f32 %v1839_v9, 1e-12 }
 0x3c4   : > { %v1841_v60 = vpop.xlane.xlu1 %1840  ;;  %4007 = vmatmul.mubr.bf16.gmra.mrb[20].mxu0 %v1971_v41  ;;  %v5435_v28 = vmul.f32 %v4339_v59, %v5207_v13 }
 0x3c5   : > { %v4341_v11 = vpop.eup %4340  ;;  %4350 = vrcp.f32 %v1887_v19  ;;  %v1888_v14 = vmax.f32 %v1841_v60, 1e-12 }
 0x3c6   : > { %v1843_v49 = vpop.xlane.xlu0 %1842  ;;  %v1972_v55 = vpack.c.bf16 %v5435_v28, %v5432_v32  ;;  %v5440_v63 = vmul.f32 %v4341_v11, %v5218_v30 }
 0x3c7   : > { %v4343_v39 = vpop.eup %4342  ;;  %4352 = vrcp.f32 %v1888_v14  ;;  %v1889_v29 = vmax.f32 %v1843_v49, 1e-12 }
 0x3c8   : > { %v1845_v4 = vpop.xlane.xlu1 %1844  ;;  %4010 = vmatprep.mubr.bf16.mxu0 %v1972_v55  ;;  %v5443_v40 = vmul.f32 %v4343_v39, %v5225_v35 }
 0x3c9   : > { %v4345_v13 = vpop.eup %4344  ;;  %4354 = vrcp.f32 %v1889_v29  ;;  %v1890_v12 = vmax.f32 %v1845_v4, 1e-12 }
 0x3ca   : > { %v1847_v9 = vpop.xlane.xlu0 %1846  ;;  %v1973_v41 = vpack.c.bf16 %v5443_v40, %v5440_v63  ;;  %v5448_v14 = vmul.f32 %v4345_v13, %v5240_v34 }
 0x3cb   : > { %v4347_v59 = vpop.eup %4346  ;;  %4356 = vrcp.f32 %v1890_v12  ;;  %v1891_v19 = vmax.f32 %v1847_v9, 1e-12 }
 0x3cc   : > { %v1849_v60 = vpop.xlane.xlu1 %1848  ;;  %4011 = vmatmul.mubr.bf16.gmra.mrb[24].mxu0 %v1973_v41  ;;  %v5451_v30 = vmul.f32 %v4347_v59, %v5253_v56 }
 0x3cd   : > { %v4349_v35 = vpop.eup %4348  ;;  %4358 = vrcp.f32 %v1891_v19  ;;  %v1892_v11 = vmax.f32 %v1849_v60, 1e-12 }
 0x3ce   : > { %v1851_v49 = vpop.xlane.xlu0 %1850  ;;  %v1974_v55 = vpack.c.bf16 %v5451_v30, %v5448_v14  ;;  %v5456_v12 = vmul.f32 %v4349_v35, %v5264_v22 }
 0x3cf   : > { %v4351_v39 = vpop.eup %4350  ;;  %4360 = vrcp.f32 %v1892_v11  ;;  %v1893_v29 = vmax.f32 %v1851_v49, 1e-12 }
 0x3d0   : > { %v1853_v4 = vpop.xlane.xlu1 %1852  ;;  %4014 = vmatprep.mubr.bf16.mxu0 %v1974_v55  ;;  %v5459_v34 = vmul.f32 %v4351_v39, %v5271_v51 }
 0x3d1   : > { %v4353_v56 = vpop.eup %4352  ;;  %4362 = vrcp.f32 %v1893_v29  ;;  %v1894_v13 = vmax.f32 %v1853_v4, 1e-12 }
 0x3d2   : > { %v1855_v9 = vpop.xlane.xlu0 %1854  ;;  %v1975_v41 = vpack.c.bf16 %v5459_v34, %v5456_v12  ;;  %v5464_v11 = vmul.f32 %v4353_v56, %v5286_v37 }
 0x3d3   : > { %v4355_v59 = vpop.eup %4354  ;;  %4364 = vrcp.f32 %v1894_v13  ;;  %v1895_v19 = vmax.f32 %v1855_v9, 1e-12 }
 0x3d4   : > { %v1857_v60 = vpop.xlane.xlu1 %1856  ;;  %4015 = vmatmul.mubr.bf16.gmra.mrb[28].mxu0 %v1975_v41  ;;  %6603 = vst [vmem:[#allocation21_spill] sm:$0xff] %v5464_v11  ;;  %v5467_v22 = vmul.f32 %v4355_v59, %v5299_v57 }
 0x3d5   : > { %v4357_v51 = vpop.eup %4356  ;;  %4366 = vrcp.f32 %v1895_v19  ;;  %v1896_v35 = vmax.f32 %v1857_v60, 1e-12 }
 0x3d6   : > { %6604 = vst [vmem:[#allocation22_spill] sm:$0xff] %v5467_v22  ;;  %v1859_v49 = vpop.xlane.xlu0 %1858  ;;  %v1976_v55 = vpack.c.bf16 %v5467_v22, %v5464_v11  ;;  %v5472_v13 = vmul.f32 %v4357_v51, %v5310_v21 }
 0x3d7   : > { %v4359_v39 = vpop.eup %4358  ;;  %4368 = vrcp.f32 %v1896_v35  ;;  %v1897_v29 = vmax.f32 %v1859_v49, 1e-12 }
 0x3d8   : > { %v1861_v4 = vpop.xlane.xlu1 %1860  ;;  %4018 = vmatprep.mubr.bf16.mxu0 %v1976_v55  ;;  %v5475_v37 = vmul.f32 %v4359_v39, %v5317_v45 }
 0x3d9   : > { %v4361_v57 = vpop.eup %4360  ;;  %4370 = vrcp.f32 %v1897_v29  ;;  %v1898_v56 = vmax.f32 %v1861_v4, 1e-12 }
 0x3da   : > { %v1863_v9 = vpop.xlane.xlu0 %1862  ;;  %v1977_v41 = vpack.c.bf16 %v5475_v37, %v5472_v13  ;;  %v5480_v35 = vmul.f32 %v4361_v57, %v5327_v6 }
 0x3db   : > { %v4363_v59 = vpop.eup %4362  ;;  %4372 = vrcp.f32 %v1898_v56  ;;  %v1899_v19 = vmax.f32 %v1863_v9, 1e-12 }
 0x3dc   : > { %v1865_v60 = vpop.xlane.xlu1 %1864  ;;  %4019 = vmatmul.mubr.bf16.gmra.mrb[32].mxu0 %v1977_v41  ;;  %6605 = vst [vmem:[#allocation23_spill] sm:$0xff] %v5480_v35  ;;  %v5483_v21 = vmul.f32 %v4363_v59, %v5334_v50 }
 0x3dd   : > { %v4365_v45 = vpop.eup %4364  ;;  %4374 = vrcp.f32 %v1899_v19  ;;  %v1900_v51 = vmax.f32 %v1865_v60, 1e-12 }
 0x3de   : > { %6606 = vst [vmem:[#allocation24_spill] sm:$0xff] %v5483_v21  ;;  %v1867_v49 = vpop.xlane.xlu0 %1866  ;;  %v1978_v55 = vpack.c.bf16 %v5483_v21, %v5480_v35  ;;  %v5488_v56 = vmul.f32 %v4365_v45, %v5341_v53 }
 0x3df   : > { %v4367_v39 = vpop.eup %4366  ;;  %4376 = vrcp.f32 %v1900_v51  ;;  %v1901_v29 = vmax.f32 %v1867_v49, 1e-12 }
 0x3e0   : > { %v1869_v4 = vpop.xlane.xlu1 %1868  ;;  %4022 = vmatprep.mubr.bf16.mxu0 %v1978_v55  ;;  %6607 = vst [vmem:[#allocation25_spill] sm:$0xff] %v5488_v56  ;;  %v5491_v6 = vmul.f32 %v4367_v39, %v5348_v23 }
 0x3e1   : > { %v4369_v50 = vpop.eup %4368  ;;  %4378 = vrcp.f32 %v1901_v29  ;;  %v1902_v57 = vmax.f32 %v1869_v4, 1e-12 }
 0x3e2   : > { %6608 = vst [vmem:[#allocation26_spill] sm:$0xff] %v5491_v6  ;;  %v1871_v9 = vpop.xlane.xlu0 %1870  ;;  %v1979_v41 = vpack.c.bf16 %v5491_v6, %v5488_v56  ;;  %v5496_v60 = vmul.f32 %v4369_v50, %v5353_v16 }
 0x3e3   : > { %v4371_v59 = vpop.eup %4370  ;;  %4380 = vrcp.f32 %v1902_v57  ;;  %v1903_v19 = vmax.f32 %v1871_v9, 1e-12 }
 0x3e4   : > { %4023 = vmatmul.mubr.bf16.gmra.mrb[36].mxu0 %v1979_v41  ;;  %6609 = vst [vmem:[#allocation27_spill] sm:$0xff] %v5496_v60  ;;  %v5499_v53 = vmul.f32 %v4371_v59, %v5358_v38 }
 0x3e5   : > { %v4373_v45 = vpop.eup %4372  ;;  %4382 = vrcp.f32 %v1903_v19 }
 0x3e6   : > { %6610 = vst [vmem:[#allocation28_spill] sm:$0xff] %v5499_v53  ;;  %v1980_v23 = vpack.c.bf16 %v5499_v53, %v5496_v60  ;;  %v5504_v49 = vmul.f32 %v4373_v45, %v5362_v33  ;;  %v4189_v45 = vld [vmem:[%s6533_s12 + $0x8] sm:$0xff]  }
 0x3e7   : > { %v4375_v51 = vpop.eup %4374 }
 0x3e8   : > { %4026 = vmatprep.mubr.bf16.mxu0 %v1980_v23  ;;  %6611 = vst [vmem:[#allocation29_spill] sm:$0xff] %v5504_v49  ;;  %v5507_v55 = vmul.f32 %v4375_v51, %v5366_v54  ;;  %v4191_v23 = vld [vmem:[%s6533_s12 + $0x18] sm:$0xff]   ;;  %v5549_v51 = vpop.permute.xlu1 %2215 }
 0x3e9   : > { %v4377_v39 = vpop.eup %4376 }
 0x3ea   : > { %6612 = vst [vmem:[#allocation30_spill] sm:$0xff] %v5507_v55  ;;  %v1981_v16 = vpack.c.bf16 %v5507_v55, %v5504_v49  ;;  %v5512_v38 = vmul.f32 %v4377_v39, %v5371_v18  ;;  %v5525_v18 = vld [vmem:[%s6531_s10] ss:$0 sm:$0xff] }
 0x3eb   : > { %v4379_v29 = vpop.eup %4378 }
 0x3ec   : > { %4027 = vmatmul.mubr.bf16.gmra.mrb[40].mxu0 %v1981_v16  ;;  %6613 = vst [vmem:[#allocation31_spill] sm:$0xff] %v5512_v38  ;;  %v5515_v4 = vmul.f32 %v4379_v29, %v5375_v58 }
 0x3ed   : > { %v4381_v50 = vpop.eup %4380 }
 0x3ee   : > { %6614 = vst [vmem:[#allocation32_spill] sm:$0xff] %v5515_v4  ;;  %v1982_v33 = vpack.c.bf16 %v5515_v4, %v5512_v38  ;;  %v1965_v57 = vmul.f32 %v4381_v50, %v5379_v26 }
 0x3ef   : > { %v4383_v54 = vpop.eup %4382 }
 0x3f0   : > { %4030 = vmatprep.mubr.bf16.mxu0 %v1982_v33  ;;  %v1967_v9 = vmul.f32 %v4383_v54, %v5383_v3  ;;  %v2608_v41 = vadd.f32 %v1965_v57, %v5033_v52  ;;  %v4187_v3 = vld [vmem:[%s6528_s7 + $0x18] sm:$0xff]   ;;  %v4188_v52 = vld [vmem:[%s6533_s12] sm:$0xff]  }
 0x3f1   : > { %4040 = vmatprep.subr.bf16.mxu1 %v4187_v3  ;;  %4074 = vmatprep.subr.bf16.mxu0 %v4188_v52 }
 0x3f2   : > { %v1983_v59 = vpack.c.bf16 %v1967_v9, %v1965_v57  ;;  %v5528_v58 = vadd.f32 %v5525_v18, %v2608_v41  ;;  %v2609_v19 = vadd.f32 %v1967_v9, %v5044_v61  ;;  %4041 = vmatpush3.bf16.msra.mxu1 %v4187_v3  ;;  %4075 = vmatpush3.bf16.msra.mxu0 %v4188_v52  ;;  %v4190_v61 = vld [vmem:[%s6533_s12 + $0x10] sm:$0xff]  }
 0x3f3   : > { %4076 = vmatprep.subr.bf16.mxu0 %v4189_v45 }
 0x3f4   : > { %6615 = vst [vmem:[#allocation33_spill] sm:$0xff] %v5528_v58  ;;  %4031 = vmatmul.mubr.bf16.gmra.mrb[44].mxu0 %v1983_v59  ;;  %v5532_v26 = vadd.f32 %v5525_v18, %v2609_v19 }
 0x3f6   : > { %6616 = vst [vmem:[#allocation34_spill] sm:$0xff] %v5532_v26  ;;  %4077 = vmatpush3.bf16.msra.mxu0 %v4189_v45 }
 0x3f7   : > { %4078 = vmatprep.subr.bf16.mxu0 %v4190_v61 }
 0x3fa   : > { %4079 = vmatpush3.bf16.msra.mxu0 %v4190_v61 }
 0x3fb   : > { %4080 = vmatprep.subr.bf16.mxu0 %v4191_v23 }
 0x3fe   : > { %4081 = vmatpush3.bf16.msra.mxu0 %v4191_v23 }
 0x48f   : > { %v4004_v39 = vpop.f32.mrb[16].mxu0 }
 0x490   : > { %v2220_v16 = vadd.f32 %v4004_v39, %v5549_v51  ;;  %v2082_v29 = vpop.f32.mrb[17].mxu0 }
 0x491   : > { %v2218_v50 = vadd.f32 %v5549_v51, %v2082_v29  ;;  %v4005_v33 = vpop.f32.mrb[18].mxu0 }
 0x492   : > { %v2221_v57 = vadd.f32 %v4005_v33, %v5549_v51  ;;  %v2283_v54 = vpack.c.bf16 %v4005_v33, %v4004_v39  ;;  %v2085_v9 = vpop.f32.mrb[19].mxu0  ;;  %v2252_v19 = vmax.f32 %v2220_v16, 0.0 }
 0x493   : > { %v2219_v41 = vadd.f32 %v5549_v51, %v2085_v9  ;;  %v2282_v59 = vpack.c.bf16 %v2085_v9, %v2082_v29  ;;  %v2250_v52 = vmax.f32 %v2218_v50, 0.0 }
 0x494   : > { %v2253_v3 = vmax.f32 %v2221_v57, 0.0 }
 0x495   : > { %v2251_v45 = vmax.f32 %v2219_v41, 0.0  ;;  %4042 = vmatprep.mubr.msk.bf16.mxu1 %vm829_vm0, %v2282_v59 }
 0x496   : > { %4043 = vmatmul.mubr.msk.bf16.vlgmr.msra.gmra.mrb[48].mxu1 %vm829_vm0, %v2283_v54  ;;  %v2852_v61 = vpack.c.bf16 %v2253_v3, %v2252_v19 }
 0x497   : > { %v2851_v23 = vpack.c.bf16 %v2251_v45, %v2250_v52  ;;  %v4008_v26 = vpop.f32.mrb[20].mxu0 }
 0x498   : > { %v2224_v58 = vadd.f32 %v4008_v26, %v5549_v51  ;;  %2900 = vrot.lane.b32.xlu1 %v2852_v61, %s4580_s26  ;;  %v2098_v39 = vpop.f32.mrb[21].mxu0 }
 0x499   : > { %v2222_v33 = vadd.f32 %v5549_v51, %v2098_v39  ;;  %2898 = vrot.lane.b32.xlu0 %v2851_v23, %s4580_s26  ;;  %v4009_v16 = vpop.f32.mrb[22].mxu0 }
 0x49a   : > { %v2225_v29 = vadd.f32 %v4009_v16, %v5549_v51  ;;  %v2285_v50 = vpack.c.bf16 %v4009_v16, %v4008_v26  ;;  %v2101_v57 = vpop.f32.mrb[23].mxu0  ;;  %v2256_v41 = vmax.f32 %v2224_v58, 0.0 }
 0x49b   : > { %v2223_v9 = vadd.f32 %v5549_v51, %v2101_v57  ;;  %v2284_v54 = vpack.c.bf16 %v2101_v57, %v2098_v39  ;;  %v2254_v19 = vmax.f32 %v2222_v33, 0.0 }
 0x49c   : > { %v2257_v59 = vmax.f32 %v2225_v29, 0.0 }
 0x49d   : > { %v2255_v3 = vmax.f32 %v2223_v9, 0.0  ;;  %4046 = vmatprep.mubr.msk.bf16.mxu1 %vm829_vm0, %v2284_v54 }
 0x49e   : > { %v2854_v52 = vpack.c.bf16 %v2257_v59, %v2256_v41  ;;  %4047 = vmatmul.mubr.msk.bf16.gmra.mrb[52].mxu1 %vm829_vm0, %v2285_v50 }
 0x49f   : > { %v2853_v45 = vpack.c.bf16 %v2255_v3, %v2254_v19  ;;  %v4012_v61 = vpop.f32.mrb[24].mxu0 }
 0x4a0   : > { %v2228_v23 = vadd.f32 %v4012_v61, %v5549_v51  ;;  %2904 = vrot.lane.b32.xlu0 %v2854_v52, %s4580_s26  ;;  %v2114_v26 = vpop.f32.mrb[25].mxu0 }
 0x4a1   : > { %v2226_v16 = vadd.f32 %v5549_v51, %v2114_v26  ;;  %2902 = vrot.lane.b32.xlu1 %v2853_v45, %s4580_s26  ;;  %v4013_v58 = vpop.f32.mrb[26].mxu0 }
 0x4a2   : > { %v2229_v39 = vadd.f32 %v4013_v58, %v5549_v51  ;;  %v2287_v33 = vpack.c.bf16 %v4013_v58, %v4012_v61  ;;  %v2117_v29 = vpop.f32.mrb[27].mxu0  ;;  %v2260_v50 = vmax.f32 %v2228_v23, 0.0 }
 0x4a3   : > { %v2227_v57 = vadd.f32 %v5549_v51, %v2117_v29  ;;  %v2286_v9 = vpack.c.bf16 %v2117_v29, %v2114_v26  ;;  %v2258_v41 = vmax.f32 %v2226_v16, 0.0 }
 0x4a4   : > { %v2261_v54 = vmax.f32 %v2229_v39, 0.0 }
 0x4a5   : > { %v2259_v59 = vmax.f32 %v2227_v57, 0.0  ;;  %4050 = vmatprep.mubr.msk.bf16.mxu1 %vm829_vm0, %v2286_v9 }
 0x4a6   : > { %v2856_v19 = vpack.c.bf16 %v2261_v54, %v2260_v50  ;;  %4051 = vmatmul.mubr.msk.bf16.gmra.mrb[56].mxu1 %vm829_vm0, %v2287_v33 }
 0x4a7   : > { %v2855_v3 = vpack.c.bf16 %v2259_v59, %v2258_v41  ;;  %v4016_v52 = vpop.f32.mrb[28].mxu0 }
 0x4a8   : > { %v2232_v45 = vadd.f32 %v4016_v52, %v5549_v51  ;;  %2908 = vrot.lane.b32.xlu0 %v2856_v19, %s4580_s26  ;;  %v2130_v61 = vpop.f32.mrb[29].mxu0 }
 0x4a9   : > { %v2230_v58 = vadd.f32 %v5549_v51, %v2130_v61  ;;  %2906 = vrot.lane.b32.xlu1 %v2855_v3, %s4580_s26  ;;  %v4017_v23 = vpop.f32.mrb[30].mxu0 }
 0x4aa   : > { %v2233_v26 = vadd.f32 %v4017_v23, %v5549_v51  ;;  %v2289_v16 = vpack.c.bf16 %v4017_v23, %v4016_v52  ;;  %v2133_v39 = vpop.f32.mrb[31].mxu0  ;;  %v2264_v33 = vmax.f32 %v2232_v45, 0.0 }
 0x4ab   : > { %v2231_v29 = vadd.f32 %v5549_v51, %v2133_v39  ;;  %v2288_v57 = vpack.c.bf16 %v2133_v39, %v2130_v61  ;;  %v2262_v50 = vmax.f32 %v2230_v58, 0.0 }
 0x4ac   : > { %v2265_v9 = vmax.f32 %v2233_v26, 0.0 }
 0x4ad   : > { %v2263_v54 = vmax.f32 %v2231_v29, 0.0  ;;  %4054 = vmatprep.mubr.msk.bf16.mxu1 %vm829_vm0, %v2288_v57 }
 0x4ae   : > { %v2858_v41 = vpack.c.bf16 %v2265_v9, %v2264_v33  ;;  %4055 = vmatmul.mubr.msk.bf16.gmra.mrb[60].mxu1 %vm829_vm0, %v2289_v16 }
 0x4af   : > { %v2857_v59 = vpack.c.bf16 %v2263_v54, %v2262_v50  ;;  %v4020_v19 = vpop.f32.mrb[32].mxu0 }
 0x4b0   : > { %v2236_v3 = vadd.f32 %v4020_v19, %v5549_v51  ;;  %2912 = vrot.lane.b32.xlu0 %v2858_v41, %s4580_s26  ;;  %v2146_v52 = vpop.f32.mrb[33].mxu0 }
 0x4b1   : > { %v2234_v23 = vadd.f32 %v5549_v51, %v2146_v52  ;;  %2910 = vrot.lane.b32.xlu1 %v2857_v59, %s4580_s26  ;;  %v4021_v45 = vpop.f32.mrb[34].mxu0 }
 0x4b2   : > { %v2237_v61 = vadd.f32 %v4021_v45, %v5549_v51  ;;  %v2291_v58 = vpack.c.bf16 %v4021_v45, %v4020_v19  ;;  %v2149_v26 = vpop.f32.mrb[35].mxu0  ;;  %v2268_v16 = vmax.f32 %v2236_v3, 0.0 }
 0x4b3   : > { %v2235_v39 = vadd.f32 %v5549_v51, %v2149_v26  ;;  %v2290_v29 = vpack.c.bf16 %v2149_v26, %v2146_v52  ;;  %v2266_v33 = vmax.f32 %v2234_v23, 0.0 }
 0x4b4   : > { %v2269_v57 = vmax.f32 %v2237_v61, 0.0 }
 0x4b5   : > { %v2267_v9 = vmax.f32 %v2235_v39, 0.0  ;;  %4058 = vmatprep.mubr.msk.bf16.mxu1 %vm829_vm0, %v2290_v29 }
 0x4b6   : > { %v2860_v50 = vpack.c.bf16 %v2269_v57, %v2268_v16  ;;  %4059 = vmatmul.mubr.msk.bf16.gmra.mrb[64].mxu1 %vm829_vm0, %v2291_v58 }
 0x4b7   : > { %v2859_v54 = vpack.c.bf16 %v2267_v9, %v2266_v33  ;;  %v4024_v41 = vpop.f32.mrb[36].mxu0 }
 0x4b8   : > { %v2240_v59 = vadd.f32 %v4024_v41, %v5549_v51  ;;  %2916 = vrot.lane.b32.xlu0 %v2860_v50, %s4580_s26  ;;  %v2162_v19 = vpop.f32.mrb[37].mxu0 }
 0x4b9   : > { %v2238_v45 = vadd.f32 %v5549_v51, %v2162_v19  ;;  %2914 = vrot.lane.b32.xlu1 %v2859_v54, %s4580_s26  ;;  %v4025_v3 = vpop.f32.mrb[38].mxu0 }
 0x4ba   : > { %v2241_v52 = vadd.f32 %v4025_v3, %v5549_v51  ;;  %v2293_v23 = vpack.c.bf16 %v4025_v3, %v4024_v41  ;;  %v2165_v61 = vpop.f32.mrb[39].mxu0  ;;  %v2272_v58 = vmax.f32 %v2240_v59, 0.0 }
 0x4bb   : > { %v2239_v26 = vadd.f32 %v5549_v51, %v2165_v61  ;;  %v2292_v39 = vpack.c.bf16 %v2165_v61, %v2162_v19  ;;  %v2270_v16 = vmax.f32 %v2238_v45, 0.0 }
 0x4bc   : > { %v2273_v29 = vmax.f32 %v2241_v52, 0.0 }
 0x4bd   : > { %v2271_v57 = vmax.f32 %v2239_v26, 0.0  ;;  %4062 = vmatprep.mubr.msk.bf16.mxu1 %vm829_vm0, %v2292_v39 }
 0x4be   : > { %v2862_v33 = vpack.c.bf16 %v2273_v29, %v2272_v58  ;;  %4063 = vmatmul.mubr.msk.bf16.gmra.mrb[68].mxu1 %vm829_vm0, %v2293_v23 }
 0x4bf   : > { %v2861_v9 = vpack.c.bf16 %v2271_v57, %v2270_v16  ;;  %v4028_v50 = vpop.f32.mrb[40].mxu0 }
 0x4c0   : > { %v2244_v54 = vadd.f32 %v4028_v50, %v5549_v51  ;;  %2920 = vrot.lane.b32.xlu0 %v2862_v33, %s4580_s26  ;;  %v2178_v41 = vpop.f32.mrb[41].mxu0 }
 0x4c1   : > { %v2242_v3 = vadd.f32 %v5549_v51, %v2178_v41  ;;  %2918 = vrot.lane.b32.xlu1 %v2861_v9, %s4580_s26  ;;  %v4029_v59 = vpop.f32.mrb[42].mxu0 }
 0x4c2   : > { %v2245_v19 = vadd.f32 %v4029_v59, %v5549_v51  ;;  %v2295_v45 = vpack.c.bf16 %v4029_v59, %v4028_v50  ;;  %v2181_v52 = vpop.f32.mrb[43].mxu0  ;;  %v2276_v23 = vmax.f32 %v2244_v54, 0.0 }
 0x4c3   : > { %v2243_v61 = vadd.f32 %v5549_v51, %v2181_v52  ;;  %v2294_v26 = vpack.c.bf16 %v2181_v52, %v2178_v41  ;;  %v2274_v58 = vmax.f32 %v2242_v3, 0.0 }
 0x4c4   : > { %v2277_v39 = vmax.f32 %v2245_v19, 0.0 }
 0x4c5   : > { %v2275_v29 = vmax.f32 %v2243_v61, 0.0  ;;  %4066 = vmatprep.mubr.msk.bf16.mxu1 %vm829_vm0, %v2294_v26 }
 0x4c6   : > { %v2864_v16 = vpack.c.bf16 %v2277_v39, %v2276_v23  ;;  %4067 = vmatmul.mubr.msk.bf16.gmra.mrb[72].mxu1 %vm829_vm0, %v2295_v45 }
 0x4c7   : > { %v2863_v57 = vpack.c.bf16 %v2275_v29, %v2274_v58  ;;  %v4032_v33 = vpop.f32.mrb[44].mxu0 }
 0x4c8   : > { %v2248_v9 = vadd.f32 %v4032_v33, %v5549_v51  ;;  %2924 = vrot.lane.b32.xlu0 %v2864_v16, %s4580_s26  ;;  %v2194_v50 = vpop.f32.mrb[45].mxu0 }
 0x4c9   : > { %v2246_v59 = vadd.f32 %v5549_v51, %v2194_v50  ;;  %2922 = vrot.lane.b32.xlu1 %v2863_v57, %s4580_s26  ;;  %v4033_v54 = vpop.f32.mrb[46].mxu0 }
 0x4ca   : > { %v2249_v41 = vadd.f32 %v4033_v54, %v5549_v51  ;;  %v2297_v3 = vpack.c.bf16 %v4033_v54, %v4032_v33  ;;  %v2197_v19 = vpop.f32.mrb[47].mxu0  ;;  %v2280_v45 = vmax.f32 %v2248_v9, 0.0 }
 0x4cb   : > { %v2247_v52 = vadd.f32 %v5549_v51, %v2197_v19  ;;  %v2296_v61 = vpack.c.bf16 %v2197_v19, %v2194_v50  ;;  %v2278_v23 = vmax.f32 %v2246_v59, 0.0 }
 0x4cc   : > { %v2281_v26 = vmax.f32 %v2249_v41, 0.0 }
 0x4cd   : > { %v2279_v39 = vmax.f32 %v2247_v52, 0.0  ;;  %4070 = vmatprep.mubr.msk.bf16.mxu1 %vm829_vm0, %v2296_v61 }
 0x4ce   : > { %v2866_v58 = vpack.c.bf16 %v2281_v26, %v2280_v45  ;;  %4071 = vmatmul.mubr.msk.bf16.gmra.mrb[76].mxu1 %vm829_vm0, %v2297_v3 }
 0x4cf   : > { %v2865_v29 = vpack.c.bf16 %v2279_v39, %v2278_v23  ;;  %v5634_v39 = vld [vmem:[%s6529_s8] ss:$0 sm:$0xff] }
 0x4d0   : > { %2928 = vrot.lane.b32.xlu0 %v2866_v58, %s4580_s26 }
 0x4d1   : > { %2926 = vrot.lane.b32.xlu1 %v2865_v29, %s4580_s26  ;;  %s3664_s26 = sshll.u32 %s459_s28, 8 }
 0x4d2   : > { %s6361_s21 = scalar_lea.vmem [#allocation2], %s3664_s26  ;;  %s6472_s26 = scalar_lea.hbm %s6535_s14, %s3801_s25 }
 0x4d3   : > { %s3598_s0 = sshll.u32 %s6361_s21, 4  ;;  %s4520_s25 = scalar_lea.vmem %s4519_s1, 8192  ;;  %s6474_s0 = int_to_ptr.vmem [resolvable:$true] %s3598_s0 }
 0x4d4   : > { %s4514_s18 = scalar_lea.vmem %s6474_s0, 4096  ;;  %p4521_p0 = scmp.lt.s32.totalorder %s6474_s0, %s4519_s1 }
 0x4d5   : > { %p4515_p11 = scmp.ne.s32.totalorder %s6474_s0, %s4514_s18  ;;  %p4522_p1 = scmp.lt.s32.totalorder %s4520_s25, %s4514_s18 }
 0x4d7   : > { %p4516_p12 = pnand %p4515_p11, %p4697_p5  ;;  %p4523_p2 = por %p4522_p1, %p4521_p0 }
 0x4d9   : > { %p4517_p13 = pneg %p4516_p12 }
 0x4db   : > { %p4524_p3 = pnand %p4523_p2, %p4517_p13 }
 0x50a   : > { %v2901_v57 = vpop.permute.xlu1 %2900 }
 0x50b   : > { %v2899_v16 = vpop.permute.xlu0 %2898 }
 0x50c   : > { %4082 = vmatprep.mubr.msk.bf16.mxu0 %vm829_vm0, %v2899_v16 }
 0x50d   : > { %4083 = vmatmul.mubr.msk.bf16.vlgmr.msra.gmra.mrb[48].mxu0 %vm829_vm0, %v2901_v57  ;;  %v5640_v57 = vld [vmem:[%s6530_s9] ss:$0 sm:$0xff] }
 0x512   : > { %v2905_v33 = vpop.permute.xlu0 %2904 }
 0x513   : > { %v2903_v51 = vpop.permute.xlu1 %2902 }
 0x514   : > { %4086 = vmatprep.mubr.msk.bf16.mxu0 %vm829_vm0, %v2903_v51 }
 0x515   : > { %4087 = vmatmul.mubr.msk.bf16.gmra.mrb[52].mxu0 %vm829_vm0, %v2905_v33 }
 0x51a   : > { %v2909_v50 = vpop.permute.xlu0 %2908 }
 0x51b   : > { %v2907_v9 = vpop.permute.xlu1 %2906 }
 0x51c   : > { %4090 = vmatprep.mubr.msk.bf16.mxu0 %vm829_vm0, %v2907_v9 }
 0x51d   : > { %4091 = vmatmul.mubr.msk.bf16.gmra.mrb[56].mxu0 %vm829_vm0, %v2909_v50 }
 0x522   : > { %v2913_v54 = vpop.permute.xlu0 %2912 }
 0x523   : > { %v2911_v59 = vpop.permute.xlu1 %2910 }
 0x524   : > { %4094 = vmatprep.mubr.msk.bf16.mxu0 %vm829_vm0, %v2911_v59 }
 0x525   : > { %4095 = vmatmul.mubr.msk.bf16.gmra.mrb[60].mxu0 %vm829_vm0, %v2913_v54 }
 0x52a   : > { %v2917_v3 = vpop.permute.xlu0 %2916 }
 0x52b   : > { %v2915_v41 = vpop.permute.xlu1 %2914 }
 0x52c   : > { %4098 = vmatprep.mubr.msk.bf16.mxu0 %vm829_vm0, %v2915_v41 }
 0x52d   : > { %4099 = vmatmul.mubr.msk.bf16.gmra.mrb[64].mxu0 %vm829_vm0, %v2917_v3 }
 0x532   : > { %v2921_v52 = vpop.permute.xlu0 %2920 }
 0x533   : > { %v2919_v19 = vpop.permute.xlu1 %2918 }
 0x534   : > { %4102 = vmatprep.mubr.msk.bf16.mxu0 %vm829_vm0, %v2919_v19 }
 0x535   : > { %4103 = vmatmul.mubr.msk.bf16.gmra.mrb[68].mxu0 %vm829_vm0, %v2921_v52 }
 0x53a   : > { %v2925_v45 = vpop.permute.xlu0 %2924 }
 0x53b   : > { %v2923_v61 = vpop.permute.xlu1 %2922 }
 0x53c   : > { %4106 = vmatprep.mubr.msk.bf16.mxu0 %vm829_vm0, %v2923_v61 }
 0x53d   : > { %4107 = vmatmul.mubr.msk.bf16.gmra.mrb[72].mxu0 %vm829_vm0, %v2925_v45 }
 0x542   : > { %v2929_v23 = vpop.permute.xlu0 %2928 }
 0x543   : > { %v2927_v26 = vpop.permute.xlu1 %2926 }
 0x544   : > { %4110 = vmatprep.mubr.msk.bf16.mxu0 %vm829_vm0, %v2927_v26 }
 0x545   : > { %4111 = vmatmul.mubr.msk.bf16.gmra.mrb[76].mxu0 %vm829_vm0, %v2929_v23 }
 0x569   : > { %v4044_v58 = vpop.f32.mrb[48].mxu1 }
 0x56a   : > { %v2428_v29 = vadd.f32 %v4044_v58, %v5634_v39  ;;  %v2419_v16 = vpop.f32.mrb[49].mxu1 }
 0x56b   : > { %v2420_v51 = vadd.f32 %v5634_v39, %v2419_v16  ;;  %v4045_v33 = vpop.f32.mrb[50].mxu1 }
 0x56c   : > { %v2548_v9 = vmax.f32 %v2428_v29, 0.0  ;;  %v2431_v50 = vadd.f32 %v4045_v33, %v5634_v39  ;;  %v2422_v59 = vpop.f32.mrb[51].mxu1 }
 0x56d   : > { %v2546_v54 = vmax.f32 %v2420_v51, 0.0  ;;  %v2423_v41 = vadd.f32 %v5634_v39, %v2422_v59 }
 0x56e   : > { %v2658_v3 = vmul.f32 %v5640_v57, %v2548_v9  ;;  %v2549_v19 = vmax.f32 %v2431_v50, 0.0 }
 0x56f   : > { %v2656_v52 = vmul.f32 %v5640_v57, %v2546_v54  ;;  %v2547_v61 = vmax.f32 %v2423_v41, 0.0 }
 0x570   : > { %v2694_v45 = vsel %vm829_vm0, %v2658_v3, 0.0  ;;  %v2659_v26 = vmul.f32 %v5640_v57, %v2549_v19 }
 0x571   : > { %v2657_v23 = vmul.f32 %v5640_v57, %v2547_v61  ;;  %v4048_v58 = vpop.f32.mrb[52].mxu1  ;;  %2695 = vadd.xlane.f32.xlu0 %v2694_v45  ;;  %v2688_v29 = vsel %vm829_vm0, %v2656_v52, 0.0 }
 0x572   : > { %v2444_v16 = vadd.f32 %v4048_v58, %v5634_v39  ;;  %v2435_v51 = vpop.f32.mrb[53].mxu1  ;;  %2689 = vadd.xlane.f32.xlu1 %v2688_v29  ;;  %v2697_v61 = vsel %vm829_vm0, %v2659_v26, 0.0 }
 0x573   : > { %v2436_v33 = vadd.f32 %v5634_v39, %v2435_v51  ;;  %v4049_v9 = vpop.f32.mrb[54].mxu1  ;;  %v2691_v50 = vsel %vm829_vm0, %v2657_v23, 0.0 }
 0x574   : > { %v2552_v59 = vmax.f32 %v2444_v16, 0.0  ;;  %v2447_v54 = vadd.f32 %v4049_v9, %v5634_v39  ;;  %v2438_v41 = vpop.f32.mrb[55].mxu1 }
 0x575   : > { %v2550_v3 = vmax.f32 %v2436_v33, 0.0  ;;  %v2439_v19 = vadd.f32 %v5634_v39, %v2438_v41  ;;  %2692 = vadd.xlane.f32.xlu0 %v2691_v50 }
 0x576   : > { %v2662_v52 = vmul.f32 %v5640_v57, %v2552_v59  ;;  %v2553_v45 = vmax.f32 %v2447_v54, 0.0  ;;  %2698 = vadd.xlane.f32.xlu1 %v2697_v61 }
 0x577   : > { %v2551_v58 = vmax.f32 %v2439_v19, 0.0  ;;  %v2660_v29 = vmul.f32 %v5640_v57, %v2550_v3 }
 0x578   : > { %v2663_v51 = vmul.f32 %v5640_v57, %v2553_v45  ;;  %v2706_v23 = vsel %vm829_vm0, %v2662_v52, 0.0 }
 0x579   : > { %v4052_v16 = vpop.f32.mrb[56].mxu1  ;;  %2707 = vadd.xlane.f32.xlu0 %v2706_v23  ;;  %v2661_v33 = vmul.f32 %v5640_v57, %v2551_v58  ;;  %v2700_v61 = vsel %vm829_vm0, %v2660_v29, 0.0 }
 0x57a   : > { %v2460_v9 = vadd.f32 %v4052_v16, %v5634_v39  ;;  %v2451_v50 = vpop.f32.mrb[57].mxu1  ;;  %v2709_v26 = vsel %vm829_vm0, %v2663_v51, 0.0 }
 0x57b   : > { %v2452_v59 = vadd.f32 %v5634_v39, %v2451_v50  ;;  %v4053_v54 = vpop.f32.mrb[58].mxu1  ;;  %2710 = vadd.xlane.f32.xlu1 %v2709_v26  ;;  %v2703_v16 = vsel %vm829_vm0, %v2661_v33, 0.0 }
 0x57c   : > { %v2556_v41 = vmax.f32 %v2460_v9, 0.0  ;;  %v2463_v3 = vadd.f32 %v4053_v54, %v5634_v39  ;;  %v2454_v19 = vpop.f32.mrb[59].mxu1 }
 0x57d   : > { %v2554_v52 = vmax.f32 %v2452_v59, 0.0  ;;  %v2455_v45 = vadd.f32 %v5634_v39, %v2454_v19  ;;  %2701 = vadd.xlane.f32.xlu0 %v2700_v61 }
 0x57e   : > { %v2666_v58 = vmul.f32 %v5640_v57, %v2556_v41  ;;  %v2557_v23 = vmax.f32 %v2463_v3, 0.0 }
 0x57f   : > { %v2555_v51 = vmax.f32 %v2455_v45, 0.0  ;;  %2704 = vadd.xlane.f32.xlu1 %v2703_v16  ;;  %v2664_v50 = vmul.f32 %v5640_v57, %v2554_v52 }
 0x580   : > { %v2667_v9 = vmul.f32 %v5640_v57, %v2557_v23  ;;  %v2718_v26 = vsel %vm829_vm0, %v2666_v58, 0.0 }
 0x581   : > { %v4056_v54 = vpop.f32.mrb[60].mxu1  ;;  %2719 = vadd.xlane.f32.xlu0 %v2718_v26  ;;  %v2665_v29 = vmul.f32 %v5640_v57, %v2555_v51  ;;  %v2712_v23 = vsel %vm829_vm0, %v2664_v50, 0.0 }
 0x582   : > { %v2476_v59 = vadd.f32 %v4056_v54, %v5634_v39  ;;  %v2467_v19 = vpop.f32.mrb[61].mxu1  ;;  %v2721_v41 = vsel %vm829_vm0, %v2667_v9, 0.0 }
 0x583   : > { %v2468_v3 = vadd.f32 %v5634_v39, %v2467_v19  ;;  %v4057_v33 = vpop.f32.mrb[62].mxu1  ;;  %2722 = vadd.xlane.f32.xlu1 %v2721_v41  ;;  %v2715_v54 = vsel %vm829_vm0, %v2665_v29, 0.0 }
 0x584   : > { %v2560_v61 = vmax.f32 %v2476_v59, 0.0  ;;  %v2479_v52 = vadd.f32 %v4057_v33, %v5634_v39  ;;  %v2470_v45 = vpop.f32.mrb[63].mxu1 }
 0x585   : > { %v2558_v58 = vmax.f32 %v2468_v3, 0.0  ;;  %v2471_v16 = vadd.f32 %v5634_v39, %v2470_v45  ;;  %2713 = vadd.xlane.f32.xlu0 %v2712_v23 }
 0x586   : > { %v2670_v51 = vmul.f32 %v5640_v57, %v2560_v61  ;;  %v2561_v26 = vmax.f32 %v2479_v52, 0.0 }
 0x587   : > { %v2559_v9 = vmax.f32 %v2471_v16, 0.0  ;;  %2716 = vadd.xlane.f32.xlu1 %v2715_v54  ;;  %v2668_v19 = vmul.f32 %v5640_v57, %v2558_v58 }
 0x588   : > { %v2671_v59 = vmul.f32 %v5640_v57, %v2561_v26  ;;  %v2730_v41 = vsel %vm829_vm0, %v2670_v51, 0.0 }
 0x589   : > { %v4060_v33 = vpop.f32.mrb[64].mxu1  ;;  %2731 = vadd.xlane.f32.xlu0 %v2730_v41  ;;  %v2669_v50 = vmul.f32 %v5640_v57, %v2559_v9  ;;  %v2724_v26 = vsel %vm829_vm0, %v2668_v19, 0.0 }
 0x58a   : > { %v2492_v3 = vadd.f32 %v4060_v33, %v5634_v39  ;;  %v2483_v45 = vpop.f32.mrb[65].mxu1  ;;  %v2733_v61 = vsel %vm829_vm0, %v2671_v59, 0.0 }
 0x58b   : > { %v2484_v52 = vadd.f32 %v5634_v39, %v2483_v45  ;;  %v4061_v29 = vpop.f32.mrb[66].mxu1  ;;  %2734 = vadd.xlane.f32.xlu1 %v2733_v61  ;;  %v2727_v33 = vsel %vm829_vm0, %v2669_v50, 0.0 }
 0x58c   : > { %v2564_v23 = vmax.f32 %v2492_v3, 0.0  ;;  %v2495_v58 = vadd.f32 %v4061_v29, %v5634_v39  ;;  %v2486_v16 = vpop.f32.mrb[67].mxu1 }
 0x58d   : > { %v2562_v51 = vmax.f32 %v2484_v52, 0.0  ;;  %v2487_v54 = vadd.f32 %v5634_v39, %v2486_v16  ;;  %2725 = vadd.xlane.f32.xlu0 %v2724_v26 }
 0x58e   : > { %v2674_v9 = vmul.f32 %v5640_v57, %v2564_v23  ;;  %v2565_v41 = vmax.f32 %v2495_v58, 0.0 }
 0x58f   : > { %v2563_v59 = vmax.f32 %v2487_v54, 0.0  ;;  %2728 = vadd.xlane.f32.xlu1 %v2727_v33  ;;  %v2672_v45 = vmul.f32 %v5640_v57, %v2562_v51 }
 0x590   : > { %v2675_v3 = vmul.f32 %v5640_v57, %v2565_v41  ;;  %v2742_v61 = vsel %vm829_vm0, %v2674_v9, 0.0 }
 0x591   : > { %v4064_v29 = vpop.f32.mrb[68].mxu1  ;;  %2743 = vadd.xlane.f32.xlu0 %v2742_v61  ;;  %v2673_v19 = vmul.f32 %v5640_v57, %v2563_v59  ;;  %v2736_v41 = vsel %vm829_vm0, %v2672_v45, 0.0 }
 0x592   : > { %v2508_v52 = vadd.f32 %v4064_v29, %v5634_v39  ;;  %v2499_v16 = vpop.f32.mrb[69].mxu1  ;;  %v2745_v23 = vsel %vm829_vm0, %v2675_v3, 0.0 }
 0x593   : > { %v2500_v58 = vadd.f32 %v5634_v39, %v2499_v16  ;;  %v4065_v50 = vpop.f32.mrb[70].mxu1  ;;  %2746 = vadd.xlane.f32.xlu1 %v2745_v23  ;;  %v2739_v3 = vsel %vm829_vm0, %v2673_v19, 0.0 }
 0x594   : > { %v2568_v26 = vmax.f32 %v2508_v52, 0.0  ;;  %v2511_v51 = vadd.f32 %v4065_v50, %v5634_v39  ;;  %v2502_v54 = vpop.f32.mrb[71].mxu1 }
 0x595   : > { %v2566_v9 = vmax.f32 %v2500_v58, 0.0  ;;  %v2503_v33 = vadd.f32 %v5634_v39, %v2502_v54  ;;  %2737 = vadd.xlane.f32.xlu0 %v2736_v41 }
 0x596   : > { %v5705_v59 = vmul.f32 %v5640_v57, %v2568_v26  ;;  %v2569_v61 = vmax.f32 %v2511_v51, 0.0 }
 0x597   : > { %v5709_v29 = vmul.f32 %v5640_v57, %v2566_v9  ;;  %v2567_v16 = vmax.f32 %v2503_v33, 0.0  ;;  %2740 = vadd.xlane.f32.xlu1 %v2739_v3 }
 0x598   : > { %v5712_v52 = vmul.f32 %v5640_v57, %v2569_v61 }
 0x599   : > { %v5715_v45 = vmul.f32 %v5640_v57, %v2567_v16  ;;  %v4068_v23 = vpop.f32.mrb[72].mxu1 }
 0x59a   : > { %v2524_v58 = vadd.f32 %v4068_v23, %v5634_v39  ;;  %v2515_v50 = vpop.f32.mrb[73].mxu1 }
 0x59b   : > { %v2516_v26 = vadd.f32 %v5634_v39, %v2515_v50  ;;  %v4069_v51 = vpop.f32.mrb[74].mxu1 }
 0x59c   : > { %v2572_v54 = vmax.f32 %v2524_v58, 0.0  ;;  %v2527_v19 = vadd.f32 %v4069_v51, %v5634_v39  ;;  %v2518_v41 = vpop.f32.mrb[75].mxu1 }
 0x59d   : > { %v2570_v9 = vmax.f32 %v2516_v26, 0.0  ;;  %v2519_v33 = vadd.f32 %v5634_v39, %v2518_v41 }
 0x59e   : > { %v5722_v61 = vmul.f32 %v5640_v57, %v2572_v54  ;;  %v2573_v3 = vmax.f32 %v2527_v19, 0.0 }
 0x59f   : > { %v5725_v16 = vmul.f32 %v5640_v57, %v2570_v9  ;;  %v2571_v22 = vmax.f32 %v2519_v33, 0.0 }
 0x5a0   : > { %v5728_v23 = vmul.f32 %v5640_v57, %v2573_v3 }
 0x5a1   : > { %v5731_v50 = vmul.f32 %v5640_v57, %v2571_v22  ;;  %v4072_v58 = vpop.f32.mrb[76].mxu1 }
 0x5a2   : > { %v2540_v51 = vadd.f32 %v4072_v58, %v5634_v39  ;;  %v2531_v26 = vpop.f32.mrb[77].mxu1 }
 0x5a3   : > { %v2532_v41 = vadd.f32 %v5634_v39, %v2531_v26  ;;  %v4073_v11 = vpop.f32.mrb[78].mxu1 }
 0x5a4   : > { %v2576_v54 = vmax.f32 %v2540_v51, 0.0  ;;  %v2543_v19 = vadd.f32 %v4073_v11, %v5634_v39  ;;  %v2534_v4 = vpop.f32.mrb[79].mxu1  ;;  %v502_v51 = vlaneseq }
 0x5a5   : > { %v2574_v9 = vmax.f32 %v2532_v41, 0.0  ;;  %v2535_v33 = vadd.f32 %v5634_v39, %v2534_v4  ;;  %v5756_v4 = vld [vmem:[%s6534_s13] ss:$0 sm:$0xff] }
 0x5a6   : > { %v5738_v3 = vmul.f32 %v5640_v57, %v2576_v54  ;;  %v2577_v38 = vmax.f32 %v2543_v19, 0.0  ;;  %v5749_v11 = vand.u32 127, %v502_v51 }
 0x5a7   : > { %v5741_v22 = vmul.f32 %v5640_v57, %v2574_v9  ;;  %v2575_v55 = vmax.f32 %v2535_v33, 0.0 }
 0x5a8   : > { %v5744_v58 = vmul.f32 %v5640_v57, %v2577_v38  ;;  %vm3163_vm5 = vcmp.ge.s32.totalorder %v5749_v11, 77  ;;  %vm3164_vm6 = vcmp.lt.s32.totalorder %v5749_v11, 81  ;;  %vm2784_vm8 = vcmp.eq.s32.totalorder %v5749_v11, 64 }
 0x5a9   : > { %v5747_v26 = vmul.f32 %v5640_v57, %v2575_v55  ;;  %vm5758_vm7 = vmand %vm3163_vm5, %vm3164_vm6  ;;  %v2578_v11 = vadd.f32 %v5400_v10, %v4859_v2 }
 0x5ab   : > { %v2617_v10 = vadd.f32 %v5525_v18, %v2578_v11 }
 0x5e0   : > { %v4084_v39 = vpop.f32.mrb[48].mxu0 }
 0x5e1   : > { %v3045_v55 = vadd.f32 %v4084_v39, %v5756_v4  ;;  %v3036_v38 = vpop.f32.mrb[49].mxu0 }
 0x5e2   : > { %v4085_v57 = vpop.f32.mrb[50].mxu0  ;;  %v3037_v54 = vadd.f32 %v5756_v4, %v3036_v38 }
 0x5e3   : > { %v3048_v19 = vadd.f32 %v4085_v57, %v5756_v4  ;;  %v3039_v9 = vpop.f32.mrb[51].mxu0  ;;  %v5767_v33 = vsel %vm5758_vm7, %v3045_v55, -1e+30 }
 0x5e4   : > { %3204 = vmax.xlane.f32.xlu0 %v5767_v33  ;;  %v3040_v51 = vadd.f32 %v5756_v4, %v3039_v9  ;;  %v5778_v39 = vsel %vm5758_vm7, %v3037_v54, -1e+30 }
 0x5e5   : > { %v5773_v49 = vsel %vm5758_vm7, %v3048_v19, -1e+30 }
 0x5e6   : > { %3206 = vmax.xlane.f32.xlu1 %v5773_v49  ;;  %v5784_v53 = vsel %vm5758_vm7, %v3040_v51, -1e+30 }
 0x5e8   : > { %3200 = vmax.xlane.f32.xlu0 %v5778_v39  ;;  %v4088_v38 = vpop.f32.mrb[52].mxu0 }
 0x5e9   : > { %v3061_v55 = vadd.f32 %v4088_v38, %v5756_v4  ;;  %v3052_v57 = vpop.f32.mrb[53].mxu0 }
 0x5ea   : > { %3202 = vmax.xlane.f32.xlu1 %v5784_v53  ;;  %v4089_v19 = vpop.f32.mrb[54].mxu0  ;;  %v3053_v9 = vadd.f32 %v5756_v4, %v3052_v57 }
 0x5eb   : > { %v3064_v60 = vadd.f32 %v4089_v19, %v5756_v4  ;;  %v3055_v6 = vpop.f32.mrb[55].mxu0  ;;  %v5791_v54 = vsel %vm5758_vm7, %v3061_v55, -1e+30 }
 0x5ec   : > { %3212 = vmax.xlane.f32.xlu0 %v5791_v54  ;;  %v3056_v38 = vadd.f32 %v5756_v4, %v3055_v6  ;;  %v5802_v57 = vsel %vm5758_vm7, %v3053_v9, -1e+30 }
 0x5ed   : > { %v5797_v51 = vsel %vm5758_vm7, %v3064_v60, -1e+30  ;;  %6620 = vst [vmem:[#allocation36_spill] sm:$0xff] %v5802_v57 }
 0x5ee   : > { %6619 = vst [vmem:[#allocation35_spill] sm:$0xff] %v5797_v51  ;;  %3214 = vmax.xlane.f32.xlu1 %v5797_v51  ;;  %v5808_v21 = vsel %vm5758_vm7, %v3056_v38, -1e+30 }
 0x5ef   : > { %6621 = vst [vmem:[#allocation37_spill] sm:$0xff] %v5808_v21 }
 0x5f0   : > { %3208 = vmax.xlane.f32.xlu0 %v5802_v57  ;;  %v4092_v19 = vpop.f32.mrb[56].mxu0 }
 0x5f1   : > { %v3077_v55 = vadd.f32 %v4092_v19, %v5756_v4  ;;  %v3068_v56 = vpop.f32.mrb[57].mxu0 }
 0x5f2   : > { %3210 = vmax.xlane.f32.xlu1 %v5808_v21  ;;  %v4093_v6 = vpop.f32.mrb[58].mxu0  ;;  %v3069_v60 = vadd.f32 %v5756_v4, %v3068_v56 }
 0x5f3   : > { %v3080_v35 = vadd.f32 %v4093_v6, %v5756_v4  ;;  %v3071_v51 = vpop.f32.mrb[59].mxu0  ;;  %v5815_v9 = vsel %vm5758_vm7, %v3077_v55, -1e+30 }
 0x5f4   : > { %6622 = vst [vmem:[#allocation38_spill] sm:$0xff] %v5815_v9  ;;  %3220 = vmax.xlane.f32.xlu0 %v5815_v9  ;;  %v3072_v19 = vadd.f32 %v5756_v4, %v3071_v51  ;;  %v5826_v56 = vsel %vm5758_vm7, %v3069_v60, -1e+30 }
 0x5f5   : > { %v5821_v38 = vsel %vm5758_vm7, %v3080_v35, -1e+30  ;;  %6624 = vst [vmem:[#allocation40_spill] sm:$0xff] %v5826_v56 }
 0x5f6   : > { %6623 = vst [vmem:[#allocation39_spill] sm:$0xff] %v5821_v38  ;;  %3222 = vmax.xlane.f32.xlu1 %v5821_v38  ;;  %v5832_v9 = vsel %vm5758_vm7, %v3072_v19, -1e+30  ;;  %v6626_v19 = vmov 0.0  }
 0x5f7   : > { %v5846_v57 = vsel %vm2784_vm8, 1.0, %v6626_v19 }
 0x5f8   : > { %3216 = vmax.xlane.f32.xlu0 %v5826_v56  ;;  %v4096_v6 = vpop.f32.mrb[60].mxu0 }
 0x5f9   : > { %v3093_v55 = vadd.f32 %v4096_v6, %v5756_v4  ;;  %v3084_v21 = vpop.f32.mrb[61].mxu0  ;;  %v2580_v6 = vadd.f32 %v5408_v44, %v4857_v0  ;;  %v2579_v0 = vadd.f32 %v5403_v15, %v4863_v5 }
 0x5fa   : > { %3218 = vmax.xlane.f32.xlu1 %v5832_v9  ;;  %v4097_v35 = vpop.f32.mrb[62].mxu0  ;;  %v3085_v51 = vadd.f32 %v5756_v4, %v3084_v21 }
 0x5fb   : > { %v3096_v60 = vadd.f32 %v4097_v35, %v5756_v4  ;;  %v3087_v38 = vpop.f32.mrb[63].mxu0  ;;  %v5840_v56 = vsel %vm5758_vm7, %v3093_v55, -1e+30  ;;  %v2619_v44 = vadd.f32 %v5525_v18, %v2580_v6  ;;  %v2618_v11 = vadd.f32 %v5525_v18, %v2579_v0 }
 0x5fc   : > { %6625 = vst [vmem:[#allocation41_spill] sm:$0xff] %v5840_v56  ;;  %3228 = vmax.xlane.f32.xlu0 %v5840_v56  ;;  %v3088_v21 = vadd.f32 %v5756_v4, %v3087_v38  ;;  %v5862_v2 = vsel %vm5758_vm7, %v3085_v51, -1e+30 }
 0x5fd   : > { %v5853_v35 = vsel %vm5758_vm7, %v3096_v60, -1e+30  ;;  %6628 = vst [vmem:[#allocation43_spill] sm:$0xff] %v5862_v2 }
 0x5fe   : > { %6627 = vst [vmem:[#allocation42_spill] sm:$0xff] %v5853_v35  ;;  %3230 = vmax.xlane.f32.xlu1 %v5853_v35  ;;  %v2696_v55 = vpop.xlane.xlu0 %2695  ;;  %v2581_v35 = vadd.f32 %v5411_v25, %v4869_v8  ;;  %v2584_v8 = vadd.f32 %v5424_v47, %v4877_v17  ;;  %v2585_v17 = vadd.f32 %v5427_v43, %v4892_v27 }
 0x5ff   : > { %v2789_v19 = vmul.f32 %v5846_v57, %v2696_v55  ;;  %v2690_v56 = vpop.xlane.xlu1 %2689  ;;  %v5874_v55 = vsel %vm5758_vm7, %v3088_v21, -1e+30 }
 0x600   : > { %v2787_v38 = vmul.f32 %v5846_v57, %v2690_v56  ;;  %3224 = vmax.xlane.f32.xlu0 %v5862_v2  ;;  %v4100_v60 = vpop.f32.mrb[64].mxu0 }
 0x601   : > { %v5869_v5 = vadd.f32 %v2789_v19, %v2619_v44  ;;  %v3109_v15 = vadd.f32 %v4100_v60, %v5756_v4  ;;  %v3100_v6 = vpop.f32.mrb[65].mxu0 }
 0x602   : > { %v5876_v51 = vadd.f32 %v2787_v38, %v2617_v10  ;;  %3226 = vmax.xlane.f32.xlu1 %v5874_v55  ;;  %v4101_v56 = vpop.f32.mrb[66].mxu0  ;;  %v2693_v2 = vpop.xlane.xlu0 %2692  ;;  %v3101_v25 = vadd.f32 %v5756_v4, %v3100_v6  ;;  %v2620_v38 = vadd.f32 %v5525_v18, %v2581_v35 }
 0x603   : > { %v3112_v44 = vadd.f32 %v4101_v56, %v5756_v4  ;;  %v2788_v19 = vmul.f32 %v5846_v57, %v2693_v2  ;;  %v2699_v60 = vpop.xlane.xlu1 %2698  ;;  %v3103_v21 = vpop.f32.mrb[67].mxu0  ;;  %v5887_v10 = vsel %vm5758_vm7, %v3109_v15, -1e+30  ;;  %v2582_v15 = vadd.f32 %v5416_v1, %v4880_v20 }
 0x604   : > { %v2790_v0 = vmul.f32 %v5846_v57, %v2699_v60  ;;  %3236 = vmax.xlane.f32.xlu0 %v5887_v10  ;;  %v3104_v6 = vadd.f32 %v5756_v4, %v3103_v21  ;;  %v2623_v60 = vadd.f32 %v5525_v18, %v2584_v8  ;;  %v5910_v43 = vsel %vm5758_vm7, %v3101_v25, -1e+30 }
 0x605   : > { %v5894_v47 = vadd.f32 %v2788_v19, %v2618_v11  ;;  %v5899_v2 = vsel %vm5758_vm7, %v3112_v44, -1e+30  ;;  %v2624_v11 = vadd.f32 %v5525_v18, %v2585_v17  ;;  %v2583_v21 = vadd.f32 %v5419_v31, %v4886_v24 }
 0x606   : > { %v5901_v56 = vadd.f32 %v2790_v0, %v2620_v38  ;;  %3238 = vmax.xlane.f32.xlu1 %v5899_v2  ;;  %v2708_v35 = vpop.xlane.xlu0 %2707  ;;  %v5922_v25 = vsel %vm5758_vm7, %v3104_v6, -1e+30  ;;  %v2588_v24 = vadd.f32 %v5440_v63, %v4900_v36  ;;  %v2589_v36 = vadd.f32 %v5443_v40, %v4914_v48 }
 0x607   : > { %6629 = vst [vmem:[#allocation44_spill] sm:$0xff] %v5894_v47  ;;  %v2793_v27 = vmul.f32 %v5846_v57, %v2708_v35  ;;  %v2621_v35 = vadd.f32 %v5525_v18, %v2582_v15 }
 0x608   : > { %v2711_v44 = vpop.xlane.xlu1 %2710  ;;  %3232 = vmax.xlane.f32.xlu0 %v5910_v43  ;;  %v4104_v19 = vpop.f32.mrb[68].mxu0 }
 0x609   : > { %v5916_v38 = vadd.f32 %v2793_v27, %v2623_v60  ;;  %v2794_v20 = vmul.f32 %v5846_v57, %v2711_v44  ;;  %v3125_v1 = vadd.f32 %v4104_v19, %v5756_v4  ;;  %v3116_v8 = vpop.f32.mrb[69].mxu0  ;;  %v5940_v19 = vld [vmem:[%s6531_s10] ss:$0 sm:$0xff] }
 0x60a   : > { %v3117_v0 = vadd.f32 %v5756_v4, %v3116_v8  ;;  %3234 = vmax.xlane.f32.xlu1 %v5922_v25  ;;  %v4105_v17 = vpop.f32.mrb[70].mxu0  ;;  %v2702_v47 = vpop.xlane.xlu0 %2701  ;;  %v2622_v18 = vadd.f32 %v5940_v19, %v2583_v21  ;;  %v2586_v21 = vadd.f32 %v5432_v32, %v4904_v42  ;;  %v2627_v48 = vadd.f32 %v5940_v19, %v2588_v24 }
 0x60b   : > { %v5929_v31 = vadd.f32 %v2794_v20, %v2624_v11  ;;  %v3128_v60 = vadd.f32 %v4105_v17, %v5756_v4  ;;  %v2791_v27 = vmul.f32 %v5846_v57, %v2702_v47  ;;  %v3119_v44 = vpop.f32.mrb[71].mxu0  ;;  %v5935_v6 = vsel %vm5758_vm7, %v3125_v1, -1e+30 }
 0x60c   : > { %v2705_v15 = vpop.xlane.xlu1 %2704  ;;  %3244 = vmax.xlane.f32.xlu0 %v5935_v6  ;;  %v3120_v47 = vadd.f32 %v5756_v4, %v3119_v44  ;;  %v5963_v17 = vsel %vm5758_vm7, %v3117_v0, -1e+30  ;;  %v2587_v44 = vadd.f32 %v5435_v28, %v4910_v46  ;;  %v2592_v46 = vadd.f32 %v5456_v12, %v4931_v62 }
 0x60d   : > { %v5946_v63 = vadd.f32 %v2791_v27, %v2621_v35  ;;  %v2792_v11 = vmul.f32 %v5846_v57, %v2705_v15  ;;  %v5952_v20 = vsel %vm5758_vm7, %v3128_v60, -1e+30  ;;  %v2628_v35 = vadd.f32 %v5940_v19, %v2589_v36 }
 0x60e   : > { %3246 = vmax.xlane.f32.xlu1 %v5952_v20  ;;  %v2720_v1 = vpop.xlane.xlu0 %2719  ;;  %v5975_v0 = vsel %vm5758_vm7, %v3120_v47, -1e+30 }
 0x60f   : > { %v5957_v8 = vadd.f32 %v2792_v11, %v2622_v18  ;;  %v2797_v40 = vmul.f32 %v5846_v57, %v2720_v1  ;;  %v2625_v11 = vadd.f32 %v5940_v19, %v2586_v21  ;;  %v2593_v21 = vadd.f32 %v5459_v34, %v4941_v7 }
 0x610   : > { %v2723_v60 = vpop.xlane.xlu1 %2722  ;;  %3240 = vmax.xlane.f32.xlu0 %v5963_v17  ;;  %v4108_v27 = vpop.f32.mrb[72].mxu0  ;;  %v2631_v7 = vadd.f32 %v5940_v19, %v2592_v46 }
 0x611   : > { %v5969_v42 = vadd.f32 %v2797_v40, %v2627_v48  ;;  %v2798_v32 = vmul.f32 %v5846_v57, %v2723_v60  ;;  %v3141_v24 = vadd.f32 %v4108_v27, %v5756_v4  ;;  %v3132_v18 = vpop.f32.mrb[73].mxu0  ;;  %v2626_v27 = vadd.f32 %v5940_v19, %v2587_v44  ;;  %v6632_v44 = vld [vmem:[#allocation5_spill] sm:$0xff] }
 0x612   : > { %v3133_v15 = vadd.f32 %v5756_v4, %v3132_v18  ;;  %3242 = vmax.xlane.f32.xlu1 %v5975_v0  ;;  %v4109_v36 = vpop.f32.mrb[74].mxu0  ;;  %v2714_v1 = vpop.xlane.xlu0 %2713 }
 0x613   : > { %v5982_v28 = vadd.f32 %v2798_v32, %v2628_v35  ;;  %v3144_v48 = vadd.f32 %v4109_v36, %v5756_v4  ;;  %v2795_v40 = vmul.f32 %v5846_v57, %v2714_v1  ;;  %v3135_v60 = vpop.f32.mrb[75].mxu0  ;;  %v5988_v47 = vsel %vm5758_vm7, %v3141_v24, -1e+30 }
 0x614   : > { %v2717_v18 = vpop.xlane.xlu1 %2716  ;;  %3252 = vmax.xlane.f32.xlu0 %v5988_v47  ;;  %v3136_v12 = vadd.f32 %v5756_v4, %v3135_v60  ;;  %v2590_v36 = vadd.f32 %v5448_v14, %v6632_v44 }
 0x615   : > { %6630 = vst [vmem:[#allocation45_spill] sm:$0xff] %v5982_v28  ;;  %v5994_v62 = vadd.f32 %v2795_v40, %v2625_v11  ;;  %v2796_v35 = vmul.f32 %v5846_v57, %v2717_v18  ;;  %v6000_v32 = vsel %vm5758_vm7, %v3144_v48, -1e+30  ;;  %v6011_v11 = vsel %vm5758_vm7, %v3133_v15, -1e+30  ;;  %v6634_v18 = vld [vmem:[#allocation6_spill] sm:$0xff] }
 0x616   : > { %3254 = vmax.xlane.f32.xlu1 %v6000_v32  ;;  %v2732_v24 = vpop.xlane.xlu0 %2731  ;;  %v2632_v40 = vadd.f32 %v5940_v19, %v2593_v21  ;;  %v6023_v15 = vsel %vm5758_vm7, %v3136_v12, -1e+30  ;;  %v2629_v44 = vadd.f32 %v5940_v19, %v2590_v36  ;;  %v6637_v36 = vld [vmem:[#allocation10_spill] sm:$0xff] }
 0x617   : > { %6631 = vst [vmem:[#allocation46_spill] sm:$0xff] %v5994_v62  ;;  %v6005_v1 = vadd.f32 %v2796_v35, %v2626_v27  ;;  %v2801_v34 = vmul.f32 %v5846_v57, %v2732_v24  ;;  %v2591_v62 = vadd.f32 %v5451_v30, %v6634_v18  ;;  %v6636_v30 = vld [vmem:[#allocation8_spill] sm:$0xff]  ;;  %v2597_v28 = vadd.f32 %v5475_v37, %v6637_v36 }
 0x618   : > { %v2735_v48 = vpop.xlane.xlu1 %2734  ;;  %3248 = vmax.xlane.f32.xlu0 %v6011_v11  ;;  %v4112_v60 = vpop.f32.mrb[76].mxu0  ;;  %v2760_v36 = vsel %vm829_vm0, %v5725_v16, 0.0  ;;  %v2775_v16 = vsel %vm829_vm0, %v5747_v26, 0.0 }
 0x619   : > { %6633 = vst [vmem:[#allocation5_spill] sm:$0xff] %v6005_v1  ;;  %v6017_v14 = vadd.f32 %v2801_v34, %v2631_v7  ;;  %v2802_v27 = vmul.f32 %v5846_v57, %v2735_v48  ;;  %v3157_v46 = vadd.f32 %v4112_v60, %v5756_v4  ;;  %v3148_v35 = vpop.f32.mrb[77].mxu0  ;;  %v2596_v7 = vadd.f32 %v5472_v13, %v6636_v30 }
 0x61a   : > { %v3149_v21 = vadd.f32 %v5756_v4, %v3148_v35  ;;  %3250 = vmax.xlane.f32.xlu1 %v6023_v15  ;;  %v4113_v24 = vpop.f32.mrb[78].mxu0  ;;  %v2726_v1 = vpop.xlane.xlu0 %2725  ;;  %v2630_v35 = vadd.f32 %v5940_v19, %v2591_v62 }
 0x61b   : > { %6635 = vst [vmem:[#allocation6_spill] sm:$0xff] %v6017_v14  ;;  %v6030_v34 = vadd.f32 %v2802_v27, %v2632_v40  ;;  %v3160_v48 = vadd.f32 %v4113_v24, %v5756_v4  ;;  %v2799_v60 = vmul.f32 %v5846_v57, %v2726_v1  ;;  %v3151_v18 = vpop.f32.mrb[79].mxu0  ;;  %v6036_v12 = vsel %vm5758_vm7, %v3157_v46, -1e+30 }
 0x61c   : > { %v2729_v14 = vpop.xlane.xlu1 %2728  ;;  %3260 = vmax.xlane.f32.xlu0 %v6036_v12  ;;  %v3152_v40 = vadd.f32 %v5756_v4, %v3151_v18  ;;  %v2635_v24 = vadd.f32 %v5940_v19, %v2596_v7  ;;  %v6057_v37 = vsel %vm5758_vm7, %v3149_v21, -1e+30  ;;  %v2748_v21 = vsel %vm829_vm0, %v5709_v29, 0.0 }
 0x61d   : > { %v6042_v13 = vadd.f32 %v2799_v60, %v2629_v44  ;;  %v2800_v27 = vmul.f32 %v5846_v57, %v2729_v14  ;;  %v6048_v1 = vsel %vm5758_vm7, %v3160_v48, -1e+30  ;;  %v2636_v44 = vadd.f32 %v5940_v19, %v2597_v28 }
 0x61e   : > { %3262 = vmax.xlane.f32.xlu1 %v6048_v1  ;;  %v2744_v46 = vpop.xlane.xlu0 %2743  ;;  %v6066_v60 = vsel %vm5758_vm7, %v3152_v40, -1e+30  ;;  %v2751_v18 = vsel %vm829_vm0, %v5715_v45, 0.0  ;;  %v2754_v28 = vsel %vm829_vm0, %v5705_v59, 0.0  ;;  %v2763_v29 = vsel %vm829_vm0, %v5731_v50, 0.0 }
 0x61f   : > { %v6051_v62 = vadd.f32 %v2800_v27, %v2630_v35  ;;  %v2805_v30 = vmul.f32 %v5846_v57, %v2744_v46  ;;  %v2757_v35 = vsel %vm829_vm0, %v5712_v52, 0.0  ;;  %v2766_v45 = vsel %vm829_vm0, %v5722_v61, 0.0 }
 0x620   : > { %v2747_v4 = vpop.xlane.xlu1 %2746  ;;  %3256 = vmax.xlane.f32.xlu0 %v6057_v37  ;;  %v2769_v59 = vsel %vm829_vm0, %v5728_v23, 0.0  ;;  %v2772_v52 = vsel %vm829_vm0, %v5741_v22, 0.0  ;;  %v2778_v50 = vsel %vm829_vm0, %v5738_v3, 0.0  ;;  %v2781_v61 = vsel %vm829_vm0, %v5744_v58, 0.0 }
 0x621   : > { %v6060_v14 = vadd.f32 %v2805_v30, %v2635_v24  ;;  %v2806_v48 = vmul.f32 %v5846_v57, %v2747_v4 }
 0x622   : > { %3258 = vmax.xlane.f32.xlu1 %v6066_v60  ;;  %v6095_v40 = vpop.xlane.xlu0 %2737 }
 0x623   : > { %v6069_v7 = vadd.f32 %v2806_v48, %v2636_v44 }
 0x624   : > { %2749 = vadd.xlane.f32.xlu0 %v2748_v21  ;;  %v6097_v23 = vpop.xlane.xlu1 %2740 }
 0x626   : > { %2752 = vadd.xlane.f32.xlu1 %v2751_v18 }
 0x628   : > { %2755 = vadd.xlane.f32.xlu0 %v2754_v28 }
 0x62a   : > { %2758 = vadd.xlane.f32.xlu1 %v2757_v35 }
 0x62c   : > { %2761 = vadd.xlane.f32.xlu0 %v2760_v36  ;;  %v6638_v36 = vld [vmem:[#allocation35_spill] sm:$0xff] }
 0x62e   : > { %2764 = vadd.xlane.f32.xlu1 %v2763_v29 }
 0x630   : > { %2767 = vadd.xlane.f32.xlu0 %v2766_v45 }
 0x632   : > { %2770 = vadd.xlane.f32.xlu1 %v2769_v59  ;;  %v6639_v59 = vld [vmem:[#allocation36_spill] sm:$0xff] }
 0x634   : > { %2773 = vadd.xlane.f32.xlu0 %v2772_v52 }
 0x636   : > { %2776 = vadd.xlane.f32.xlu1 %v2775_v16 }
 0x638   : > { %2779 = vadd.xlane.f32.xlu0 %v2778_v50 }
 0x63a   : > { %2782 = vadd.xlane.f32.xlu1 %v2781_v61 }
 0x671   : > { %v3205_v27 = vpop.xlane.xlu0 %3204 }
 0x672   : > { %v3266_v22 = vsub.f32 %v5767_v33, %v3205_v27 }
 0x673   : > { %v3207_v46 = vpop.xlane.xlu1 %3206 }
 0x674   : > { %v3300_v24 = vmul.f32 1.442695, %v3266_v22  ;;  %v3267_v26 = vsub.f32 %v5773_v49, %v3207_v46 }
 0x675   : > { %v3201_v30 = vpop.xlane.xlu0 %3200 }
 0x676   : > { %4384 = vpow2.f32 %v3300_v24  ;;  %v3302_v4 = vmul.f32 1.442695, %v3267_v26  ;;  %v3264_v3 = vsub.f32 %v5778_v39, %v3201_v30  ;;  %v6641_v24 = vld [vmem:[#allocation38_spill] sm:$0xff] }
 0x677   : > { %v3203_v44 = vpop.xlane.xlu1 %3202 }
 0x678   : > { %4386 = vpow2.f32 %v3302_v4  ;;  %v3296_v58 = vmul.f32 1.442695, %v3264_v3  ;;  %v3265_v48 = vsub.f32 %v5784_v53, %v3203_v44  ;;  %v6640_v53 = vld [vmem:[#allocation37_spill] sm:$0xff] }
 0x679   : > { %v3213_v21 = vpop.xlane.xlu0 %3212 }
 0x67a   : > { %4388 = vpow2.f32 %v3296_v58  ;;  %v3298_v18 = vmul.f32 1.442695, %v3265_v48  ;;  %v3270_v28 = vsub.f32 %v5791_v54, %v3213_v21  ;;  %v6642_v58 = vld [vmem:[#allocation39_spill] sm:$0xff] }
 0x67b   : > { %v3215_v33 = vpop.xlane.xlu1 %3214 }
 0x67c   : > { %4390 = vpow2.f32 %v3298_v18  ;;  %v3308_v35 = vmul.f32 1.442695, %v3270_v28  ;;  %v3271_v49 = vsub.f32 %v6638_v36, %v3215_v33 }
 0x67d   : > { %v3209_v29 = vpop.xlane.xlu0 %3208 }
 0x67e   : > { %4392 = vpow2.f32 %v3308_v35  ;;  %v3310_v45 = vmul.f32 1.442695, %v3271_v49  ;;  %v3268_v39 = vsub.f32 %v6639_v59, %v3209_v29  ;;  %v6643_v35 = vld [vmem:[#allocation40_spill] sm:$0xff] }
 0x67f   : > { %v3211_v52 = vpop.xlane.xlu1 %3210 }
 0x680   : > { %v4385_v16 = vpop.eup %4384  ;;  %4394 = vpow2.f32 %v3310_v45  ;;  %v3304_v50 = vmul.f32 1.442695, %v3268_v39  ;;  %v3269_v61 = vsub.f32 %v6640_v53, %v3211_v52 }
 0x681   : > { %v3221_v27 = vpop.xlane.xlu0 %3220  ;;  %v6109_v54 = vsel %vm5758_vm7, %v4385_v16, 0.0 }
 0x682   : > { %v4387_v22 = vpop.eup %4386  ;;  %4396 = vpow2.f32 %v3304_v50  ;;  %v3306_v46 = vmul.f32 1.442695, %v3269_v61  ;;  %v3274_v26 = vsub.f32 %v6641_v24, %v3221_v27  ;;  %3396 = vadd.xlane.f32.xlu0 %v6109_v54  ;;  %v6644_v61 = vld [vmem:[#allocation41_spill] sm:$0xff] }
 0x683   : > { %v3223_v30 = vpop.xlane.xlu1 %3222  ;;  %v6115_v4 = vsel %vm5758_vm7, %v4387_v22, 0.0 }
 0x684   : > { %v4389_v3 = vpop.eup %4388  ;;  %4398 = vpow2.f32 %v3306_v46  ;;  %v3316_v44 = vmul.f32 1.442695, %v3274_v26  ;;  %v3275_v48 = vsub.f32 %v6642_v58, %v3223_v30  ;;  %3398 = vadd.xlane.f32.xlu1 %v6115_v4  ;;  %v6645_v26 = vld [vmem:[#allocation42_spill] sm:$0xff] }
 0x685   : > { %v3217_v21 = vpop.xlane.xlu0 %3216  ;;  %v6121_v18 = vsel %vm5758_vm7, %v4389_v3, 0.0 }
 0x686   : > { %v4391_v28 = vpop.eup %4390  ;;  %4400 = vpow2.f32 %v3316_v44  ;;  %v3318_v33 = vmul.f32 1.442695, %v3275_v48  ;;  %v3272_v36 = vsub.f32 %v6643_v35, %v3217_v21  ;;  %3392 = vadd.xlane.f32.xlu0 %v6121_v18  ;;  %v6646_v21 = vld [vmem:[#allocation43_spill] sm:$0xff] }
 0x687   : > { %v3219_v49 = vpop.xlane.xlu1 %3218  ;;  %v6127_v29 = vsel %vm5758_vm7, %v4391_v28, 0.0 }
 0x688   : > { %v4393_v45 = vpop.eup %4392  ;;  %4402 = vpow2.f32 %v3318_v33  ;;  %v3312_v59 = vmul.f32 1.442695, %v3272_v36  ;;  %v3273_v39 = vsub.f32 %v5832_v9, %v3219_v49  ;;  %3394 = vadd.xlane.f32.xlu1 %v6127_v29 }
 0x689   : > { %v3229_v52 = vpop.xlane.xlu0 %3228  ;;  %v6133_v16 = vsel %vm5758_vm7, %v4393_v45, 0.0 }
 0x68a   : > { %v4395_v50 = vpop.eup %4394  ;;  %4404 = vpow2.f32 %v3312_v59  ;;  %v3314_v53 = vmul.f32 1.442695, %v3273_v39  ;;  %v3278_v27 = vsub.f32 %v6644_v61, %v3229_v52  ;;  %3404 = vadd.xlane.f32.xlu0 %v6133_v16 }
 0x68b   : > { %v3231_v22 = vpop.xlane.xlu1 %3230  ;;  %v6139_v46 = vsel %vm5758_vm7, %v4395_v50, 0.0 }
 0x68c   : > { %v4397_v9 = vpop.eup %4396  ;;  %4406 = vpow2.f32 %v3314_v53  ;;  %v3324_v24 = vmul.f32 1.442695, %v3278_v27  ;;  %v3279_v30 = vsub.f32 %v6645_v26, %v3231_v22  ;;  %3406 = vadd.xlane.f32.xlu1 %v6139_v46 }
 0x68d   : > { %v3225_v3 = vpop.xlane.xlu0 %3224  ;;  %v6145_v44 = vsel %vm5758_vm7, %v4397_v9, 0.0 }
 0x68e   : > { %v4399_v58 = vpop.eup %4398  ;;  %4408 = vpow2.f32 %v3324_v24  ;;  %v3326_v48 = vmul.f32 1.442695, %v3279_v30  ;;  %v3276_v28 = vsub.f32 %v6646_v21, %v3225_v3  ;;  %3400 = vadd.xlane.f32.xlu0 %v6145_v44 }
 0x68f   : > { %v3227_v33 = vpop.xlane.xlu1 %3226  ;;  %v6151_v35 = vsel %vm5758_vm7, %v4399_v58, 0.0 }
 0x690   : > { %v4401_v36 = vpop.eup %4400  ;;  %4410 = vpow2.f32 %v3326_v48  ;;  %v3320_v49 = vmul.f32 1.442695, %v3276_v28  ;;  %v3277_v45 = vsub.f32 %v5874_v55, %v3227_v33  ;;  %3402 = vadd.xlane.f32.xlu1 %v6151_v35 }
 0x691   : > { %v3237_v59 = vpop.xlane.xlu0 %3236  ;;  %v6157_v39 = vsel %vm5758_vm7, %v4401_v36, 0.0 }
 0x692   : > { %v4403_v52 = vpop.eup %4402  ;;  %4412 = vpow2.f32 %v3320_v49  ;;  %v3322_v50 = vmul.f32 1.442695, %v3277_v45  ;;  %v3282_v53 = vsub.f32 %v5887_v10, %v3237_v59  ;;  %3412 = vadd.xlane.f32.xlu0 %v6157_v39 }
 0x693   : > { %v3239_v61 = vpop.xlane.xlu1 %3238  ;;  %v6163_v27 = vsel %vm5758_vm7, %v4403_v52, 0.0 }
 0x694   : > { %v4405_v55 = vpop.eup %4404  ;;  %4414 = vpow2.f32 %v3322_v50  ;;  %v3332_v22 = vmul.f32 1.442695, %v3282_v53  ;;  %v3283_v9 = vsub.f32 %v5899_v2, %v3239_v61  ;;  %3414 = vadd.xlane.f32.xlu1 %v6163_v27 }
 0x695   : > { %v3233_v24 = vpop.xlane.xlu0 %3232  ;;  %v6169_v26 = vsel %vm5758_vm7, %v4405_v55, 0.0 }
 0x696   : > { %v4407_v10 = vpop.eup %4406  ;;  %4416 = vpow2.f32 %v3332_v22  ;;  %v3334_v30 = vmul.f32 1.442695, %v3283_v9  ;;  %v3280_v3 = vsub.f32 %v5910_v43, %v3233_v24  ;;  %3408 = vadd.xlane.f32.xlu0 %v6169_v26 }
 0x697   : > { %v3235_v58 = vpop.xlane.xlu1 %3234  ;;  %v6175_v48 = vsel %vm5758_vm7, %v4407_v10, 0.0 }
 0x698   : > { %v4409_v2 = vpop.eup %4408  ;;  %4418 = vpow2.f32 %v3334_v30  ;;  %v3328_v21 = vmul.f32 1.442695, %v3280_v3  ;;  %v3281_v28 = vsub.f32 %v5922_v25, %v3235_v58  ;;  %3410 = vadd.xlane.f32.xlu1 %v6175_v48 }
 0x699   : > { %v3245_v33 = vpop.xlane.xlu0 %3244  ;;  %v6181_v36 = vsel %vm5758_vm7, %v4409_v2, 0.0 }
 0x69a   : > { %v4411_v43 = vpop.eup %4410  ;;  %4420 = vpow2.f32 %v3328_v21  ;;  %v3330_v49 = vmul.f32 1.442695, %v3281_v28  ;;  %v3286_v45 = vsub.f32 %v5935_v6, %v3245_v33  ;;  %3420 = vadd.xlane.f32.xlu0 %v6181_v36 }
 0x69b   : > { %v3247_v59 = vpop.xlane.xlu1 %3246  ;;  %v6187_v52 = vsel %vm5758_vm7, %v4411_v43, 0.0 }
 0x69c   : > { %v4413_v25 = vpop.eup %4412  ;;  %4422 = vpow2.f32 %v3330_v49  ;;  %v3340_v50 = vmul.f32 1.442695, %v3286_v45  ;;  %v3287_v53 = vsub.f32 %v5952_v20, %v3247_v59  ;;  %3422 = vadd.xlane.f32.xlu1 %v6187_v52 }
 0x69d   : > { %v3241_v61 = vpop.xlane.xlu0 %3240  ;;  %v6193_v55 = vsel %vm5758_vm7, %v4413_v25, 0.0 }
 0x69e   : > { %v4415_v6 = vpop.eup %4414  ;;  %4424 = vpow2.f32 %v3340_v50  ;;  %v3342_v22 = vmul.f32 1.442695, %v3287_v53  ;;  %v3284_v9 = vsub.f32 %v5963_v17, %v3241_v61  ;;  %3416 = vadd.xlane.f32.xlu0 %v6193_v55 }
 0x69f   : > { %v3243_v24 = vpop.xlane.xlu1 %3242  ;;  %v6199_v10 = vsel %vm5758_vm7, %v4415_v6, 0.0 }
 0x6a0   : > { %v4417_v20 = vpop.eup %4416  ;;  %4426 = vpow2.f32 %v3342_v22  ;;  %v3336_v30 = vmul.f32 1.442695, %v3284_v9  ;;  %v3285_v3 = vsub.f32 %v5975_v0, %v3243_v24  ;;  %3418 = vadd.xlane.f32.xlu1 %v6199_v10 }
 0x6a1   : > { %v3253_v58 = vpop.xlane.xlu0 %3252  ;;  %v6205_v2 = vsel %vm5758_vm7, %v4417_v20, 0.0 }
 0x6a2   : > { %v4419_v17 = vpop.eup %4418  ;;  %4428 = vpow2.f32 %v3336_v30  ;;  %v3338_v21 = vmul.f32 1.442695, %v3285_v3  ;;  %v3290_v28 = vsub.f32 %v5988_v47, %v3253_v58  ;;  %3428 = vadd.xlane.f32.xlu0 %v6205_v2 }
 0x6a3   : > { %v3255_v33 = vpop.xlane.xlu1 %3254  ;;  %v6211_v43 = vsel %vm5758_vm7, %v4419_v17, 0.0 }
 0x6a4   : > { %v4421_v0 = vpop.eup %4420  ;;  %4430 = vpow2.f32 %v3338_v21  ;;  %v3348_v49 = vmul.f32 1.442695, %v3290_v28  ;;  %v3291_v45 = vsub.f32 %v6000_v32, %v3255_v33  ;;  %3430 = vadd.xlane.f32.xlu1 %v6211_v43  ;;  %v6647_v33 = vld [vmem:[#allocation11_spill] sm:$0xff] }
 0x6a5   : > { %v3249_v59 = vpop.xlane.xlu0 %3248  ;;  %v6217_v25 = vsel %vm5758_vm7, %v4421_v0, 0.0  ;;  %v6648_v0 = vld [vmem:[#allocation23_spill] sm:$0xff] }
 0x6a6   : > { %v4423_v47 = vpop.eup %4422  ;;  %4432 = vpow2.f32 %v3348_v49  ;;  %v3350_v50 = vmul.f32 1.442695, %v3291_v45  ;;  %v3288_v53 = vsub.f32 %v6011_v11, %v3249_v59  ;;  %3424 = vadd.xlane.f32.xlu0 %v6217_v25  ;;  %v2598_v49 = vadd.f32 %v6648_v0, %v6647_v33 }
 0x6a7   : > { %v3251_v61 = vpop.xlane.xlu1 %3250  ;;  %v6223_v6 = vsel %vm5758_vm7, %v4423_v47, 0.0 }
 0x6a8   : > { %v4425_v32 = vpop.eup %4424  ;;  %4434 = vpow2.f32 %v3350_v50  ;;  %v3344_v22 = vmul.f32 1.442695, %v3288_v53  ;;  %v3289_v9 = vsub.f32 %v6023_v15, %v3251_v61  ;;  %3426 = vadd.xlane.f32.xlu1 %v6223_v6  ;;  %v6649_v61 = vld [vmem:[#allocation13_spill] sm:$0xff] }
 0x6a9   : > { %v3261_v24 = vpop.xlane.xlu0 %3260  ;;  %v6229_v20 = vsel %vm5758_vm7, %v4425_v32, 0.0  ;;  %v6650_v32 = vld [vmem:[#allocation24_spill] sm:$0xff] }
 0x6aa   : > { %v4427_v11 = vpop.eup %4426  ;;  %4436 = vpow2.f32 %v3344_v22  ;;  %v3346_v30 = vmul.f32 1.442695, %v3289_v9  ;;  %3436 = vadd.xlane.f32.xlu0 %v6229_v20  ;;  %v3294_v3 = vsub.f32 %v6036_v12, %v3261_v24  ;;  %v2599_v22 = vadd.f32 %v6650_v32, %v6649_v61  ;;  %v6655_v32 = vld [vmem:[#allocation14_spill] sm:$0xff] }
 0x6ab   : > { %v3263_v58 = vpop.xlane.xlu1 %3262  ;;  %v6235_v17 = vsel %vm5758_vm7, %v4427_v11, 0.0 }
 0x6ac   : > { %v4429_v15 = vpop.eup %4428  ;;  %4438 = vpow2.f32 %v3346_v30  ;;  %3438 = vadd.xlane.f32.xlu1 %v6235_v17  ;;  %v3295_v12 = vsub.f32 %v6048_v1, %v3263_v58  ;;  %v3356_v47 = vmul.f32 1.442695, %v3294_v3  ;;  %v2637_v1 = vadd.f32 %v5940_v19, %v2598_v49  ;;  %v6652_v3 = vld [vmem:[#allocation12_spill] sm:$0xff]  ;;  %v6653_v58 = vld [vmem:[#allocation25_spill] sm:$0xff] }
 0x6ad   : > { %v3257_v21 = vpop.xlane.xlu0 %3256  ;;  %v6240_v28 = vsel %vm5758_vm7, %v4429_v15, 0.0  ;;  %v2600_v15 = vadd.f32 %v6653_v58, %v6652_v3  ;;  %v6659_v58 = vld [vmem:[#allocation15_spill] sm:$0xff] }
 0x6ae   : > { %v4431_v45 = vpop.eup %4430  ;;  %v3292_v59 = vsub.f32 %v6057_v37, %v3257_v21  ;;  %3432 = vadd.xlane.f32.xlu0 %v6240_v28  ;;  %v3358_v33 = vmul.f32 1.442695, %v3295_v12 }
 0x6af   : > { %v3259_v50 = vpop.xlane.xlu1 %3258  ;;  %v6249_v53 = vsel %vm5758_vm7, %v4431_v45, 0.0 }
 0x6b0   : > { %v4433_v9 = vpop.eup %4432  ;;  %v3352_v24 = vmul.f32 1.442695, %v3292_v59  ;;  %v3293_v11 = vsub.f32 %v6066_v60, %v3259_v50  ;;  %3434 = vadd.xlane.f32.xlu1 %v6249_v53  ;;  %v2638_v60 = vadd.f32 %v5940_v19, %v2599_v22 }
 0x6b1   : > { %v2750_v37 = vpop.xlane.xlu0 %2749  ;;  %v6258_v30 = vsel %vm5758_vm7, %v4433_v9, 0.0  ;;  %v6656_v9 = vld [vmem:[#allocation26_spill] sm:$0xff] }
 0x6b2   : > { %6651 = vst [vmem:[#allocation8_spill] sm:$0xff] %v6258_v30  ;;  %v4435_v21 = vpop.eup %4434  ;;  %4440 = vpow2.f32 %v3352_v24  ;;  %v3354_v0 = vmul.f32 1.442695, %v3293_v11  ;;  %v2807_v45 = vmul.f32 %v5846_v57, %v2750_v37  ;;  %3444 = vadd.xlane.f32.xlu0 %v6258_v30  ;;  %v2601_v24 = vadd.f32 %v6656_v9, %v6655_v32  ;;  %v6666_v30 = vld [vmem:[#allocation18_spill] sm:$0xff] }
 0x6b3   : > { %4442 = vpow2.f32 %v3356_v47  ;;  %v2753_v49 = vpop.xlane.xlu1 %2752  ;;  %v6267_v59 = vsel %vm5758_vm7, %v4435_v21, 0.0  ;;  %v2639_v47 = vadd.f32 %v5940_v19, %v2600_v15  ;;  %v6660_v21 = vld [vmem:[#allocation27_spill] sm:$0xff] }
 0x6b4   : > { %6654 = vst [vmem:[#allocation10_spill] sm:$0xff] %v6267_v59  ;;  %v4437_v50 = vpop.eup %4436  ;;  %4444 = vpow2.f32 %v3354_v0  ;;  %v6269_v61 = vadd.f32 %v2807_v45, %v2637_v1  ;;  %v2808_v12 = vmul.f32 %v5846_v57, %v2753_v49  ;;  %3446 = vadd.xlane.f32.xlu1 %v6267_v59  ;;  %v2602_v0 = vadd.f32 %v6660_v21, %v6659_v58 }
 0x6b5   : > { %v2756_v11 = vpop.xlane.xlu0 %2755  ;;  %v6278_v22 = vsel %vm5758_vm7, %v4437_v50, 0.0  ;;  %4446 = vpow2.f32 %v3358_v33  ;;  %v2640_v50 = vadd.f32 %v5940_v19, %v2601_v24 }
 0x6b6   : > { %6657 = vst [vmem:[#allocation35_spill] sm:$0xff] %v6278_v22  ;;  %v4439_v37 = vpop.eup %4438  ;;  %v6280_v3 = vadd.f32 %v2808_v12, %v2638_v60  ;;  %v2809_v1 = vmul.f32 %v5846_v57, %v2756_v11  ;;  %3440 = vadd.xlane.f32.xlu0 %v6278_v22  ;;  %v6662_v60 = vld [vmem:[#allocation17_spill] sm:$0xff]  ;;  %v6663_v12 = vld [vmem:[#allocation28_spill] sm:$0xff]  ;;  %v2641_v58 = vadd.f32 %v5940_v19, %v2602_v0 }
 0x6b7   : > { %v2759_v45 = vpop.xlane.xlu1 %2758  ;;  %v6288_v15 = vsel %vm5758_vm7, %v4439_v37, 0.0  ;;  %v2603_v32 = vadd.f32 %v6663_v12, %v6662_v60  ;;  %v6664_v37 = vld [vmem:[#allocation16_spill] sm:$0xff]  ;;  %v6665_v22 = vld [vmem:[#allocation29_spill] sm:$0xff]  ;;  %v6667_v60 = vld [vmem:[#allocation30_spill] sm:$0xff] }
 0x6b8   : > { %6658 = vst [vmem:[#allocation36_spill] sm:$0xff] %v6280_v3  ;;  %6661 = vst [vmem:[#allocation37_spill] sm:$0xff] %v6288_v15  ;;  %v6290_v49 = vadd.f32 %v2809_v1, %v2639_v47  ;;  %v2810_v33 = vmul.f32 %v5846_v57, %v2759_v45  ;;  %3442 = vadd.xlane.f32.xlu1 %v6288_v15  ;;  %v2604_v47 = vadd.f32 %v6665_v22, %v6664_v37 }
 0x6b9   : > { %v2762_v9 = vpop.xlane.xlu0 %2761  ;;  %v2642_v45 = vadd.f32 %v5940_v19, %v2603_v32  ;;  %v2605_v12 = vadd.f32 %v6667_v60, %v6666_v30  ;;  %v6670_v32 = vld [vmem:[#allocation19_spill] sm:$0xff] }
 0x6ba   : > { %v6297_v11 = vadd.f32 %v2810_v33, %v2640_v50  ;;  %v2811_v21 = vmul.f32 %v5846_v57, %v2762_v9  ;;  %v2643_v22 = vadd.f32 %v5940_v19, %v2604_v47  ;;  %v6672_v47 = vld [vmem:[#allocation20_spill] sm:$0xff] }
 0x6bb   : > { %v2765_v1 = vpop.xlane.xlu1 %2764 }
 0x6bc   : > { %v4441_v59 = vpop.eup %4440  ;;  %v6303_v24 = vadd.f32 %v2811_v21, %v2641_v58  ;;  %v2812_v15 = vmul.f32 %v5846_v57, %v2765_v1  ;;  %v6671_v21 = vld [vmem:[#allocation31_spill] sm:$0xff] }
 0x6bd   : > { %v4443_v50 = vpop.eup %4442  ;;  %v2768_v33 = vpop.xlane.xlu0 %2767  ;;  %v6311_v0 = vsel %vm5758_vm7, %v4441_v59, 0.0  ;;  %v2606_v37 = vadd.f32 %v6671_v21, %v6670_v32 }
 0x6be   : > { %6668 = vst [vmem:[#allocation38_spill] sm:$0xff] %v6311_v0  ;;  %v4445_v9 = vpop.eup %4444  ;;  %v6313_v3 = vadd.f32 %v2812_v15, %v2642_v45  ;;  %v2813_v58 = vmul.f32 %v5846_v57, %v2768_v33  ;;  %3448 = vadd.xlane.f32.xlu0 %v6311_v0  ;;  %v2644_v15 = vadd.f32 %v5940_v19, %v2605_v12  ;;  %v6673_v33 = vld [vmem:[#allocation32_spill] sm:$0xff]  ;;  %v6333_v32 = vsel %vm5758_vm7, %v4443_v50, 0.0 }
 0x6bf   : > { %v2771_v1 = vpop.xlane.xlu1 %2770  ;;  %v6322_v30 = vsel %vm5758_vm7, %v4445_v9, 0.0  ;;  %v4447_v60 = vpop.eup %4446  ;;  %v2607_v0 = vadd.f32 %v6673_v33, %v6672_v47  ;;  %v2645_v9 = vadd.f32 %v5940_v19, %v2606_v37 }
 0x6c0   : > { %6669 = vst [vmem:[#allocation39_spill] sm:$0xff] %v6313_v3  ;;  %v6324_v59 = vadd.f32 %v2813_v58, %v2643_v22  ;;  %v2814_v45 = vmul.f32 %v5846_v57, %v2771_v1  ;;  %3450 = vadd.xlane.f32.xlu1 %v6322_v30  ;;  %v6342_v58 = vsel %vm5758_vm7, %v4447_v60, 0.0 }
 0x6c1   : > { %v2774_v3 = vpop.xlane.xlu0 %2773  ;;  %v2646_v47 = vadd.f32 %v5940_v19, %v2607_v0 }
 0x6c2   : > { %v6335_v21 = vadd.f32 %v2814_v45, %v2644_v15  ;;  %v2815_v22 = vmul.f32 %v5846_v57, %v2774_v3  ;;  %3452 = vadd.xlane.f32.xlu0 %v6333_v32 }
 0x6c3   : > { %v2777_v12 = vpop.xlane.xlu1 %2776 }
 0x6c4   : > { %v6344_v1 = vadd.f32 %v2815_v22, %v2645_v9  ;;  %v2816_v50 = vmul.f32 %v5846_v57, %v2777_v12  ;;  %3454 = vadd.xlane.f32.xlu1 %v6342_v58 }
 0x6c5   : > { %v6351_v3 = vpop.xlane.xlu0 %2779 }
 0x6c6   : > { %v6349_v37 = vadd.f32 %v2816_v50, %v2646_v47 }
 0x6c7   : > { %v6353_v15 = vpop.xlane.xlu1 %2782 }
 0x70f   : > { %v3397_v45 = vpop.xlane.xlu0 %3396 }
 0x710   : > { %4448 = vrcp.f32 %v3397_v45 }
 0x711   : > { %v3399_v41 = vpop.xlane.xlu1 %3398 }
 0x712   : > { %4450 = vrcp.f32 %v3399_v41 }
 0x713   : > { %v3393_v60 = vpop.xlane.xlu0 %3392 }
 0x714   : > { %4452 = vrcp.f32 %v3393_v60 }
 0x715   : > { %v3395_v33 = vpop.xlane.xlu1 %3394 }
 0x716   : > { %4454 = vrcp.f32 %v3395_v33 }
 0x717   : > { %v3405_v19 = vpop.xlane.xlu0 %3404 }
 0x718   : > { %4456 = vrcp.f32 %v3405_v19 }
 0x719   : > { %v3407_v0 = vpop.xlane.xlu1 %3406 }
 0x71a   : > { %v4449_v9 = vpop.eup %4448  ;;  %4458 = vrcp.f32 %v3407_v0 }
 0x71b   : > { %v3461_v22 = vmul.f32 %v4449_v9, %v6109_v54  ;;  %v3401_v12 = vpop.xlane.xlu0 %3400 }
 0x71c   : > { %v4451_v47 = vpop.eup %4450  ;;  %4460 = vrcp.f32 %v3401_v12  ;;  %v6674_v12 = vld [vmem:[#allocation44_spill] sm:$0xff] }
 0x71d   : > { %v3522_v50 = vadd.f32 %v3461_v22, %v5869_v5  ;;  %v3463_v45 = vmul.f32 %v4451_v47, %v6115_v4  ;;  %v3403_v41 = vpop.xlane.xlu1 %3402 }
 0x71e   : > { %v4453_v60 = vpop.eup %4452  ;;  %4462 = vrcp.f32 %v3403_v41 }
 0x71f   : > { %3554 = vst [vmem:[%s6361_s21 + $0x10] sm:$0xff] %v3522_v50  ;;  %v3523_v33 = vadd.f32 %v3463_v45, %v5901_v56  ;;  %v3457_v54 = vmul.f32 %v4453_v60, %v6121_v18  ;;  %v3413_v19 = vpop.xlane.xlu0 %3412 }
 0x720   : > { %v4455_v0 = vpop.eup %4454  ;;  %4464 = vrcp.f32 %v3413_v19 }
 0x721   : > { %3555 = vst [vmem:[%s6361_s21 + $0x18] sm:$0xff] %v3523_v33  ;;  %v3520_v5 = vadd.f32 %v3457_v54, %v5876_v51  ;;  %v3459_v4 = vmul.f32 %v4455_v0, %v6127_v29  ;;  %v3415_v9 = vpop.xlane.xlu1 %3414 }
 0x722   : > { %v4457_v22 = vpop.eup %4456  ;;  %4466 = vrcp.f32 %v3415_v9 }
 0x723   : > { %3552 = vst [vmem:[%s6361_s21] sm:$0xff] %v3520_v5  ;;  %v3521_v47 = vadd.f32 %v3459_v4, %v6674_v12  ;;  %v3469_v56 = vmul.f32 %v4457_v22, %v6133_v16  ;;  %v3409_v18 = vpop.xlane.xlu0 %3408  ;;  %v6675_v12 = vld [vmem:[#allocation45_spill] sm:$0xff] }
 0x724   : > { %v4459_v50 = vpop.eup %4458  ;;  %4468 = vrcp.f32 %v3409_v18  ;;  %v6676_v18 = vld [vmem:[#allocation46_spill] sm:$0xff] }
 0x725   : > { %3553 = vst [vmem:[%s6361_s21 + $0x8] sm:$0xff] %v3521_v47  ;;  %v3526_v45 = vadd.f32 %v3469_v56, %v5916_v38  ;;  %v3471_v51 = vmul.f32 %v4459_v50, %v6139_v46  ;;  %v3411_v29 = vpop.xlane.xlu1 %3410 }
 0x726   : > { %v4461_v41 = vpop.eup %4460  ;;  %4470 = vrcp.f32 %v3411_v29 }
 0x727   : > { %3558 = vst [vmem:[%s6361_s21 + $0x30] sm:$0xff] %v3526_v45  ;;  %v3527_v60 = vadd.f32 %v3471_v51, %v5929_v31  ;;  %v3465_v33 = vmul.f32 %v4461_v41, %v6145_v44  ;;  %v3421_v16 = vpop.xlane.xlu0 %3420  ;;  %v6677_v51 = vld [vmem:[#allocation5_spill] sm:$0xff] }
 0x728   : > { %v4463_v54 = vpop.eup %4462  ;;  %4472 = vrcp.f32 %v3421_v16 }
 0x729   : > { %3559 = vst [vmem:[%s6361_s21 + $0x38] sm:$0xff] %v3527_v60  ;;  %v3524_v19 = vadd.f32 %v3465_v33, %v5946_v63  ;;  %v3467_v38 = vmul.f32 %v4463_v54, %v6151_v35  ;;  %v3423_v46 = vpop.xlane.xlu1 %3422  ;;  %v6678_v33 = vld [vmem:[#allocation6_spill] sm:$0xff] }
 0x72a   : > { %v4465_v0 = vpop.eup %4464  ;;  %4474 = vrcp.f32 %v3423_v46 }
 0x72b   : > { %3556 = vst [vmem:[%s6361_s21 + $0x20] sm:$0xff] %v3524_v19  ;;  %v3525_v5 = vadd.f32 %v3467_v38, %v5957_v8  ;;  %v3477_v31 = vmul.f32 %v4465_v0, %v6157_v39  ;;  %v3417_v44 = vpop.xlane.xlu0 %3416 }
 0x72c   : > { %v4467_v4 = vpop.eup %4466  ;;  %4476 = vrcp.f32 %v3417_v44 }
 0x72d   : > { %3557 = vst [vmem:[%s6361_s21 + $0x28] sm:$0xff] %v3525_v5  ;;  %v3530_v9 = vadd.f32 %v3477_v31, %v5969_v42  ;;  %v3479_v63 = vmul.f32 %v4467_v4, %v6163_v27  ;;  %v3419_v35 = vpop.xlane.xlu1 %3418  ;;  %v6679_v5 = vld [vmem:[#allocation7_spill] sm:$0xff]  ;;  %v6680_v31 = vld [vmem:[#allocation21_spill] sm:$0xff] }
 0x72e   : > { %v4469_v22 = vpop.eup %4468  ;;  %4478 = vrcp.f32 %v3419_v35  ;;  %v2594_v44 = vadd.f32 %v6680_v31, %v6679_v5  ;;  %v6681_v35 = vld [vmem:[#allocation9_spill] sm:$0xff]  ;;  %v6684_v5 = vld [vmem:[#allocation8_spill] sm:$0xff] }
 0x72f   : > { %3562 = vst [vmem:[%s6361_s21 + $0x50] sm:$0xff] %v3530_v9  ;;  %v3531_v47 = vadd.f32 %v3479_v63, %v6675_v12  ;;  %v3473_v8 = vmul.f32 %v4469_v22, %v6169_v26  ;;  %v3429_v39 = vpop.xlane.xlu0 %3428 }
 0x730   : > { %v4471_v56 = vpop.eup %4470  ;;  %4480 = vrcp.f32 %v3429_v39 }
 0x731   : > { %3563 = vst [vmem:[%s6361_s21 + $0x58] sm:$0xff] %v3531_v47  ;;  %v3528_v50 = vadd.f32 %v3473_v8, %v6676_v18  ;;  %v3475_v42 = vmul.f32 %v4471_v56, %v6175_v48  ;;  %v3431_v27 = vpop.xlane.xlu1 %3430 }
 0x732   : > { %v4473_v45 = vpop.eup %4472  ;;  %4482 = vrcp.f32 %v3431_v27 }
 0x733   : > { %3560 = vst [vmem:[%s6361_s21 + $0x40] sm:$0xff] %v3528_v50  ;;  %v3529_v29 = vadd.f32 %v3475_v42, %v6677_v51  ;;  %v3485_v41 = vmul.f32 %v4473_v45, %v6181_v36  ;;  %v3425_v60 = vpop.xlane.xlu0 %3424 }
 0x734   : > { %v4475_v26 = vpop.eup %4474  ;;  %4484 = vrcp.f32 %v3425_v60 }
 0x735   : > { %3561 = vst [vmem:[%s6361_s21 + $0x48] sm:$0xff] %v3529_v29  ;;  %v3534_v16 = vadd.f32 %v3485_v41, %v6678_v33  ;;  %v3487_v54 = vmul.f32 %v4475_v26, %v6187_v52  ;;  %v3427_v19 = vpop.xlane.xlu1 %3426 }
 0x736   : > { %v4477_v48 = vpop.eup %4476  ;;  %4486 = vrcp.f32 %v3427_v19 }
 0x737   : > { %3566 = vst [vmem:[%s6361_s21 + $0x70] sm:$0xff] %v3534_v16  ;;  %v3535_v38 = vadd.f32 %v3487_v54, %v6030_v34  ;;  %v3481_v46 = vmul.f32 %v4477_v48, %v6193_v55  ;;  %v3437_v0 = vpop.xlane.xlu0 %3436  ;;  %v2803_v34 = vmul.f32 %v5846_v57, %v6095_v40  ;;  %v6682_v55 = vld [vmem:[#allocation22_spill] sm:$0xff]  ;;  %v2804_v40 = vmul.f32 %v5846_v57, %v6097_v23 }
 0x738   : > { %v4479_v36 = vpop.eup %4478  ;;  %4488 = vrcp.f32 %v3437_v0  ;;  %v2595_v22 = vadd.f32 %v6682_v55, %v6681_v35 }
 0x739   : > { %3567 = vst [vmem:[%s6361_s21 + $0x78] sm:$0xff] %v3535_v38  ;;  %v3532_v4 = vadd.f32 %v3481_v46, %v6042_v13  ;;  %v3483_v52 = vmul.f32 %v4479_v36, %v6199_v10  ;;  %v3439_v9 = vpop.xlane.xlu1 %3438  ;;  %v4513_v10 = vld [vmem:[%s6531_s10] ss:$0 sm:$0xff] }
 0x73a   : > { %v4481_v63 = vpop.eup %4480  ;;  %4490 = vrcp.f32 %v3439_v9  ;;  %v2633_v39 = vadd.f32 %v4513_v10, %v2594_v44  ;;  %v2634_v42 = vadd.f32 %v4513_v10, %v2595_v22  ;;  %v2817_v10 = vmul.f32 %v5846_v57, %v6351_v3 }
 0x73b   : > { %3564 = vst [vmem:[%s6361_s21 + $0x60] sm:$0xff] %v3532_v4  ;;  %v3533_v12 = vadd.f32 %v3483_v52, %v6051_v62  ;;  %v3493_v47 = vmul.f32 %v4481_v63, %v6205_v2  ;;  %v3433_v8 = vpop.xlane.xlu0 %3432  ;;  %v6686_v63 = vld [vmem:[#allocation35_spill] sm:$0xff] }
 0x73c   : > { %v4483_v13 = vpop.eup %4482  ;;  %4492 = vrcp.f32 %v3433_v8  ;;  %v2835_v2 = vadd.f32 %v2803_v34, %v2633_v39  ;;  %v2836_v29 = vadd.f32 %v2804_v40, %v2634_v42  ;;  %v6688_v8 = vld [vmem:[#allocation39_spill] sm:$0xff]  ;;  %v6689_v39 = vld [vmem:[#allocation38_spill] sm:$0xff] }
 0x73d   : > { %3565 = vst [vmem:[%s6361_s21 + $0x68] sm:$0xff] %v3533_v12  ;;  %v3538_v56 = vadd.f32 %v3493_v47, %v6060_v14  ;;  %v3495_v62 = vmul.f32 %v4483_v13, %v6211_v43  ;;  %v3435_v18 = vpop.xlane.xlu1 %3434  ;;  %v6687_v12 = vld [vmem:[#allocation37_spill] sm:$0xff] }
 0x73e   : > { %v4485_v50 = vpop.eup %4484  ;;  %4494 = vrcp.f32 %v3435_v18 }
 0x73f   : > { %3570 = vst [vmem:[%s6361_s21 + $0x90] sm:$0xff] %v3538_v56  ;;  %v3539_v27 = vadd.f32 %v3495_v62, %v6069_v7  ;;  %v3489_v45 = vmul.f32 %v4485_v50, %v6217_v25  ;;  %v3445_v51 = vpop.xlane.xlu0 %3444 }
 0x740   : > { %v4487_v23 = vpop.eup %4486  ;;  %4496 = vrcp.f32 %v3445_v51 }
 0x741   : > { %3571 = vst [vmem:[%s6361_s21 + $0x98] sm:$0xff] %v3539_v27  ;;  %v3536_v14 = vadd.f32 %v3489_v45, %v2835_v2  ;;  %v3491_v43 = vmul.f32 %v4487_v23, %v6223_v6  ;;  %v3447_v41 = vpop.xlane.xlu1 %3446  ;;  %v6690_v2 = vld [vmem:[#allocation33_spill] sm:$0xff] }
 0x742   : > { %v4489_v60 = vpop.eup %4488  ;;  %4498 = vrcp.f32 %v3447_v41  ;;  %v2849_v42 = vadd.f32 %v2817_v10, %v6690_v2 }
 0x743   : > { %3568 = vst [vmem:[%s6361_s21 + $0x80] sm:$0xff] %v3536_v14  ;;  %v3537_v26 = vadd.f32 %v3491_v43, %v2836_v29  ;;  %v3501_v7 = vmul.f32 %v4489_v60, %v6229_v20  ;;  %v3441_v33 = vpop.xlane.xlu0 %3440 }
 0x744   : > { %v4491_v25 = vpop.eup %4490  ;;  %4500 = vrcp.f32 %v3441_v33 }
 0x745   : > { %3569 = vst [vmem:[%s6361_s21 + $0x88] sm:$0xff] %v3537_v26  ;;  %v3542_v16 = vadd.f32 %v3501_v7, %v6290_v49  ;;  %v3503_v54 = vmul.f32 %v4491_v25, %v6235_v17  ;;  %v3443_v19 = vpop.xlane.xlu1 %3442  ;;  %v6683_v49 = vld [vmem:[#allocation36_spill] sm:$0xff] }
 0x746   : > { %v4493_v6 = vpop.eup %4492  ;;  %4502 = vrcp.f32 %v3443_v19 }
 0x747   : > { %3574 = vst [vmem:[%s6361_s21 + $0xb0] sm:$0xff] %v3542_v16  ;;  %v3543_v48 = vadd.f32 %v3503_v54, %v6297_v11  ;;  %v3497_v38 = vmul.f32 %v4493_v6, %v6240_v28  ;;  %v6685_v11 = vld [vmem:[#allocation10_spill] sm:$0xff] }
 0x748   : > { %v4495_v46 = vpop.eup %4494 }
 0x749   : > { %3575 = vst [vmem:[%s6361_s21 + $0xb8] sm:$0xff] %v3543_v48  ;;  %v3540_v20 = vadd.f32 %v3497_v38, %v6269_v61  ;;  %v3499_v0 = vmul.f32 %v4495_v46, %v6249_v53 }
 0x74a   : > { %v4497_v36 = vpop.eup %4496 }
 0x74b   : > { %3572 = vst [vmem:[%s6361_s21 + $0xa0] sm:$0xff] %v3540_v20  ;;  %v3541_v17 = vadd.f32 %v3499_v0, %v6683_v49  ;;  %v3509_v31 = vmul.f32 %v4497_v36, %v6684_v5  ;;  %v3449_v44 = vpop.xlane.xlu0 %3448 }
 0x74c   : > { %v4499_v4 = vpop.eup %4498  ;;  %4504 = vrcp.f32 %v3449_v44 }
 0x74d   : > { %3573 = vst [vmem:[%s6361_s21 + $0xa8] sm:$0xff] %v3541_v17  ;;  %v3546_v28 = vadd.f32 %v3509_v31, %v6324_v59  ;;  %v3511_v52 = vmul.f32 %v4499_v4, %v6685_v11  ;;  %v3451_v9 = vpop.xlane.xlu1 %3450 }
 0x74e   : > { %v4501_v61 = vpop.eup %4500  ;;  %4506 = vrcp.f32 %v3451_v9 }
 0x74f   : > { %3578 = vst [vmem:[%s6361_s21 + $0xd0] sm:$0xff] %v3546_v28  ;;  %v3547_v53 = vadd.f32 %v3511_v52, %v6335_v21  ;;  %v3505_v34 = vmul.f32 %v4501_v61, %v6686_v63  ;;  %v3453_v35 = vpop.xlane.xlu0 %3452 }
 0x750   : > { %v4503_v55 = vpop.eup %4502  ;;  %4508 = vrcp.f32 %v3453_v35 }
 0x751   : > { %3579 = vst [vmem:[%s6361_s21 + $0xd8] sm:$0xff] %v3547_v53  ;;  %v3544_v22 = vadd.f32 %v3505_v34, %v6303_v24  ;;  %v3507_v59 = vmul.f32 %v4503_v55, %v6687_v12  ;;  %v3455_v47 = vpop.xlane.xlu1 %3454  ;;  %v2818_v24 = vmul.f32 %v5846_v57, %v6353_v15  ;;  %v6691_v57 = vld [vmem:[#allocation34_spill] sm:$0xff] }
 0x752   : > { %4510 = vrcp.f32 %v3455_v47 }
 0x753   : > { %3576 = vst [vmem:[%s6361_s21 + $0xc0] sm:$0xff] %v3544_v22  ;;  %v3545_v13 = vadd.f32 %v3507_v59, %v6688_v8  ;;  %v2850_v15 = vadd.f32 %v2818_v24, %v6691_v57 }
 0x755   : > { %3577 = vst [vmem:[%s6361_s21 + $0xc8] sm:$0xff] %v3545_v13 }
 0x756   : > { %v4505_v21 = vpop.eup %4504 }
 0x757   : > { %v3513_v40 = vmul.f32 %v4505_v21, %v6689_v39 }
 0x758   : > { %v4507_v56 = vpop.eup %4506 }
 0x759   : > { %v3548_v62 = vadd.f32 %v3513_v40, %v6344_v1  ;;  %v3515_v18 = vmul.f32 %v4507_v56, %v6322_v30 }
 0x75a   : > { %v4509_v50 = vpop.eup %4508 }
 0x75b   : > { %3580 = vst [vmem:[%s6361_s21 + $0xe0] sm:$0xff] %v3548_v62  ;;  %v3549_v27 = vadd.f32 %v3515_v18, %v6349_v37  ;;  %v3517_v3 = vmul.f32 %v4509_v50, %v6333_v32 }
 0x75c   : > { %v4511_v45 = vpop.eup %4510 }
 0x75d   : > { %3581 = vst [vmem:[%s6361_s21 + $0xe8] sm:$0xff] %v3549_v27  ;;  %v3550_v1 = vadd.f32 %v3517_v3, %v2849_v42  ;;  %v3519_v30 = vmul.f32 %v4511_v45, %v6342_v58 }
 0x75f   : > { %3582 = vst [vmem:[%s6361_s21 + $0xf0] sm:$0xff] %v3550_v1  ;;  %v3551_v32 = vadd.f32 %v3519_v30, %v2850_v15 }
 0x761   : > { %3583 = vst [vmem:[%s6361_s21 + $0xf8] sm:$0xff] %v3551_v32 }
 0x762   : > { %4527 = shalt.err (!%p4524_p3)
}
 0x763   : > { %s4528_s28 = scalar_lea.hbm %s6472_s26, 4096  ;;  %s4532_s20 = scalar_lea.hbm %s6535_s14, 8192 }
 0x764   : > { %p4529_p4 = scmp.ne.s32.totalorder %s6472_s26, %s4528_s28  ;;  %p4533_p9 = scmp.lt.u32.totalorder %s6472_s26, %s6535_s14 }
 0x765   : > { %p4534_p10 = scmp.lt.u32.totalorder %s4532_s20, %s4528_s28  ;;  %p4536_p12 = scmp.lt.u32.totalorder %s4528_s28, %s6472_s26 }
 0x766   : > { %p4530_p7 = pnand %p4529_p4, %p4697_p5 }
 0x767   : > { %p4535_p11 = por %p4534_p10, %p4533_p9 }
 0x768   : > { %p4531_p8 = pneg %p4530_p7 }
 0x769   : > { %p4537_p13 = por %p4536_p12, %p4535_p11 }
 0x76b   : > { %p4538_p0 = pnand %p4537_p13, %p4531_p8 }
 0x76d   : > { %4541 = shalt.err (!%p4538_p0)
}
 0x76e   : > { %s4582_s18 = smov 128   ;;  %s4583_s25 = smov 8  }
 0x76f   : > { %4122 = dma.vmem_to_hbm [thread:$0]  (%p4697_p5), %s6474_s0, 4096, %s6472_s26, %s6480_s17, %s4582_s18, %s4582_s18, %s4583_s25  }
 0x770 PF: > { %p4128_p1 = scmp.ge.s32.totalorder %s4576_s16, 2  ;;  %s3613_s2 = sand.u32 1, %s4564_s29  }
 0x771   : > { %s3614_s28 = scalar_lea.sflag [#allocation3], %s3613_s2 }
 0x772   : > { %p4125_p2 = pnand %p4128_p1, %p4701_p6 }
 0x774   : > { %4559 = dma.done.wait (!%p4125_p2), %s3614_s28, 4096  }
 0x775   : > { %4561 = vsyncadd (!%p4125_p2), %s3614_s28, 4294963200  ;;  %p24_p3 = scmp.ge.s32.totalorder %s4684_s19, 4   ;;  %s6692_s29 = smov %s4568_s30 }
 0x776   : > { %s6693_s30 = smov %s4572_s15  ;;  %s6694_s15 = smov %s4695_s22 }
 0x777   : > { %s6695_s16 = smov %s4684_s19  ;;  %26 = sbr.rel (!%p24_p3) target bundleno = 7 (0x7), region = 111 }
 0x77e   :  { %3619 = vsyncpa [#allocation3], 1 }
 0x77f   :  { %3621 = vsyncpa [#allocation3 + $0x1], 1 }

</bundles_post_ra>
